<compile_context>
chip_gen: v5e
topology: v5e:2x2
jax: 0.10.0
libtpu: 0.0.40
codegen_flags: <defaults>
</compile_context>

<pallas_src>
import functools

import jax
import jax.numpy as jnp
from jax.experimental import pallas as pl
from jax.experimental.pallas import tpu as pltpu


SUBLANES = 8
LANES = 128


def _round_up(x, m):
    return (x + m - 1) // m * m


def _elementwise_dtype():
    """bf16 bias/ReLU on chips with bf16 VALUs (v6e/v7x); f32 elsewhere (v5e...)."""
    try:
        kind = jax.devices()[0].device_kind.lower()
    except Exception:
        kind = ""
    if ("v6" in kind) or ("v7" in kind) or ("7x" in kind):
        return jnp.bfloat16
    return jnp.float32


# ----------------------------- Pallas kernel --------------------------------
def _tbase_kernel(x_ref,
                  w1_ref, b1_ref,
                  w2_ref, b2_ref,
                  w3_ref, b3_ref,
                  w4_ref, b4_ref,
                  o_ref):
    """Channels-major per-point MLP on one (F, TN) tile of points.

    x_ref:  (1, F, TN) bf16   NCW block straight from HBM (no wrapper transpose)
    w*_ref: (Cout, Cin) bf16  PyTorch conv-weight orientation, BN folded in
    b*_ref: (Cout, 1)         bf16 on v6e/v7x (packed VPU), f32 on v5e; b4 is f32
    o_ref:  (1, KP, TN) f32   KP = k rounded up to 8 sublanes (zero-padded rows)
    """
    x = x_ref[0]                                               # (F, TN) bf16

    def layer(w_ref, b_ref, h):
        # MXU matmul with f32 accumulation; bias + ReLU on the VPU in b's dtype.
        acc = jnp.dot(w_ref[...], h, preferred_element_type=jnp.float32)
        acc = acc.astype(b_ref.dtype) + b_ref[...]
        return jnp.maximum(acc, 0).astype(jnp.bfloat16)

    h = layer(w1_ref, b1_ref, x)           # conv1 + bn1 + relu   (1024, TN)
    h = layer(w2_ref, b2_ref, h)           # conv2 + bn2 + relu   (256,  TN)
    h = layer(w3_ref, b3_ref, h)           # conv3 + bn3 + relu   (256,  TN)
    # drop1 (p=0.2) is identity in eval mode.
    o = jnp.dot(w4_ref[...], h, preferred_element_type=jnp.float32)
    o_ref[0] = (o + b4_ref[...]).astype(o_ref.dtype)           # conv4   (KP, TN)


# ------------------------------- Tiling choice --------------------------------
def _choose_point_tile(n, batch):
    """Pick (lane tile tn, padded length) for the points axis."""
    if n <= 256:
        # One lane-aligned tile per batch row; padding to 128 keeps loads/stores
        # as unmasked full vregs and costs at most 255 dummy points.
        tn = _round_up(max(n, 1), LANES)
        return tn, tn
    best_key, best = None, None
    for tn in (2048, 1024, 512, 256):           # big tiles amortize ~0.35us/step
        n_pad = _round_up(n, tn)
        steps = n_pad // tn
        key = (n_pad - n,                        # minimize padding waste first,
               0 if batch * steps >= 2 else 1,   # keep >=2 grid steps (v7x megacore),
               -tn)                              # then prefer the largest tile.
        if best_key is None or key < best_key:
            best_key, best = key, (tn, n_pad)
    return best


# --------------------------- Parameter construction --------------------------
def _fold_bn(conv_w, conv_b, gamma, beta, mean, var, eps=1e-5):
    """Fold eval-mode BatchNorm1d into a 1x1 conv.  conv_w: (Cout, Cin)."""
    scale = gamma / jnp.sqrt(var + eps)                         # (Cout,)
    w = conv_w * scale[:, None]
    b = (conv_b - mean) * scale + beta
    return w, b


def make_params(key, f, k):
    """Synthetic 'math' parameters (Cout, Cin) f32, BN already folded in."""
    dims = [(f, 1024), (1024, 256), (256, 256), (256, k)]
    keys = jax.random.split(key, 32)
    ki = iter(keys)
    params = []
    for li, (cin, cout) in enumerate(dims):
        w = 0.05 * jax.random.normal(next(ki), (cout, cin), jnp.float32)  # Conv1d (Cout,Cin,1) squeezed
        b = 0.05 * jax.random.normal(next(ki), (cout,), jnp.float32)
        if li < 3:  # conv1/2/3 have a BatchNorm after them
            gamma = 1.0 + 0.1 * jax.random.normal(next(ki), (cout,), jnp.float32)
            beta = 0.1 * jax.random.normal(next(ki), (cout,), jnp.float32)
            mean = 0.1 * jax.random.normal(next(ki), (cout,), jnp.float32)
            var = 0.5 + jnp.abs(jax.random.normal(next(ki), (cout,), jnp.float32))
            w, b = _fold_bn(w, b, gamma, beta, mean, var)
        params.append((w, b))
    return params


def prep_kernel_params(math_params, *, ew_dtype=None):
    """Kernel-side params: weights stay (Cout, Cin) (channels-major kernel), cast
    to bf16; biases become (Cout, 1) columns in the elementwise dtype.  conv4 is
    zero-padded from k up to a multiple of 8 output rows (sublane alignment)."""
    if ew_dtype is None:
        ew_dtype = _elementwise_dtype()
    out = []
    last = len(math_params) - 1
    for li, (w, b) in enumerate(math_params):
        w = jnp.asarray(w, jnp.float32)
        b = jnp.asarray(b, jnp.float32)
        if li == last:
            kp = _round_up(max(w.shape[0], SUBLANES), SUBLANES)
            w = jnp.pad(w, ((0, kp - w.shape[0]), (0, 0)))      # exact-zero rows
            b = jnp.pad(b, ((0, kp - b.shape[0]),))
            bdt = jnp.float32                                    # final bias-add in f32
        else:
            bdt = ew_dtype
        out.append((w.astype(jnp.bfloat16), b[:, None].astype(bdt)))
    return out


# ------------------------------- Forward wrapper ------------------------------
@functools.partial(jax.jit, static_argnames=("k",))
def tbase_forward(x, kernel_params, k=3):
    """x: (B, f, N) float32 (PyTorch NCW).  Mirrors TBase.forward (eval mode)."""
    B, F, N = x.shape
    (w1, b1), (w2, b2), (w3, b3), (w4, b4) = kernel_params
    KP = w4.shape[0]

    tn, n_pad = _choose_point_tile(N, B)
    xb = x.astype(jnp.bfloat16)                  # halve x DMA; fuses with padding
    if n_pad != N:
        xb = jnp.pad(xb, ((0, 0), (0, 0), (0, n_pad - N)))

    grid = (B, n_pad // tn)

    def resident(a):                             # whole array, grid-invariant block
        return pl.BlockSpec(a.shape, lambda b, i: (0,) * a.ndim)

    flops = 2 * B * n_pad * (F * w1.shape[0] + w1.shape[0] * w2.shape[0]
                             + w2.shape[0] * w3.shape[0] + w3.shape[0] * KP)
    bytes_accessed = int(xb.size) * 2 + B * KP * n_pad * 4 + sum(
        int(w.size) * w.dtype.itemsize + int(b.size) * b.dtype.itemsize
        for (w, b) in kernel_params)

    out = pl.pallas_call(
        _tbase_kernel,
        out_shape=jax.ShapeDtypeStruct((B, KP, n_pad), jnp.float32),
        grid_spec=pltpu.PrefetchScalarGridSpec(
            num_scalar_prefetch=0,
            grid=grid,
            in_specs=[
                pl.BlockSpec((1, F, tn), lambda b, i: (b, 0, i)),   # NCW x tile
                resident(w1), resident(b1),
                resident(w2), resident(b2),
                resident(w3), resident(b3),
                resident(w4), resident(b4),
            ],
            out_specs=pl.BlockSpec((1, KP, tn), lambda b, i: (b, 0, i)),
        ),
        compiler_params=pltpu.CompilerParams(
            dimension_semantics=("parallel", "parallel"),
            vmem_limit_bytes=48 * 1024 * 1024,   # tn=2048 intermediates ~16-20 MiB
        ),
        cost_estimate=pl.CostEstimate(
            flops=flops, transcendentals=0, bytes_accessed=bytes_accessed),
    )(xb, w1, b1, w2, b2, w3, b3, w4, b4)

    out = out[:, 0:min(3, k), :N]                # drop sublane/lane padding; xt = x[:, 0:3]
    if N == 1:                                   # x.squeeze(2)
        out = out[:, :, 0]
    return out


def tbase_reference(x, math_params):
    """Pure-JAX f32 reference of the same eval-mode forward."""
    B, F, N = x.shape
    h = jnp.transpose(x, (0, 2, 1)).reshape(B * N, F)
    for li, (w, b) in enumerate(math_params):
        h = h @ w.T + b
        if li < 3:
            h = jnp.maximum(h, 0.0)
    k = h.shape[-1]
    out = h.reshape(B, N, k).transpose(0, 2, 1)
    if N == 1:
        return out[:, 0:3, 0]
    return out[:, 0:3, :]


# ------------------------------------ Main ------------------------------------
if __name__ == "__main__":
    # Synthetic config: f = INC_R + NUM_CLS = 32, k = OUT_T = 3.
    F_DIM, K_DIM = 32, 3
    B, N = 2, 8

    key = jax.random.PRNGKey(0)
    kx, kp, kx1 = jax.random.split(key, 3)
    x = jax.random.normal(kx, (B, F_DIM, N), jnp.float32)

    math_params = make_params(kp, F_DIM, K_DIM)
    kparams = prep_kernel_params(math_params)

    out = jax.block_until_ready(tbase_forward(x, kparams, k=K_DIM))
    ref = tbase_reference(x, math_params)
    assert out.shape == ref.shape, (out.shape, ref.shape)
    # bf16 MXU operands / bf16 activations with f32 accumulation vs pure-f32 ref.
    max_err = float(jnp.max(jnp.abs(out - ref)))
    assert jnp.allclose(out, ref, atol=5e-2, rtol=5e-2), f"mismatch, max_err={max_err}"

    # N == 1 path (x.squeeze(2) in the PyTorch module).
    x1 = jax.random.normal(kx1, (B, F_DIM, 1), jnp.float32)
    out1 = jax.block_until_ready(tbase_forward(x1, kparams, k=K_DIM))
    ref1 = tbase_reference(x1, math_params)
    assert out1.shape == ref1.shape == (B, 3), (out1.shape, ref1.shape)
    assert jnp.allclose(out1, ref1, atol=5e-2, rtol=5e-2)

    print("KERNEL_OK")
</pallas_src>

<mosaic_0001>
module attributes {stable_mosaic.version = 11 : i64} {
  func.func @_tbase_kernel(%arg0: i32, %arg1: i32, %arg2: memref<1x32x128xbf16, #tpu.memory_space<vmem>>, %arg3: memref<1024x32xbf16, #tpu.memory_space<vmem>>, %arg4: memref<1024x1xf32, #tpu.memory_space<vmem>>, %arg5: memref<256x1024xbf16, #tpu.memory_space<vmem>>, %arg6: memref<256x1xf32, #tpu.memory_space<vmem>>, %arg7: memref<256x256xbf16, #tpu.memory_space<vmem>>, %arg8: memref<256x1xf32, #tpu.memory_space<vmem>>, %arg9: memref<8x256xbf16, #tpu.memory_space<vmem>>, %arg10: memref<8x1xf32, #tpu.memory_space<vmem>>, %arg11: memref<1x8x128xf32, #tpu.memory_space<vmem>>) attributes {dimension_semantics = [#tpu.dimension_semantics<parallel>, #tpu.dimension_semantics<parallel>], iteration_bounds = array<i64: 2, 1>, scalar_prefetch = 0 : i64, scratch_operands = 0 : i64, tpu.core_type = #tpu.core_type<tc>, window_params = [{transform_indices = @transform_0, window_bounds = array<i64: 1, 32, 128>}, {pipeline_mode = #tpu.pipeline_mode<synchronous>, transform_indices = @transform_1, window_bounds = array<i64: 1024, 32>}, {pipeline_mode = #tpu.pipeline_mode<synchronous>, transform_indices = @transform_2, window_bounds = array<i64: 1024, 1>}, {pipeline_mode = #tpu.pipeline_mode<synchronous>, transform_indices = @transform_3, window_bounds = array<i64: 256, 1024>}, {pipeline_mode = #tpu.pipeline_mode<synchronous>, transform_indices = @transform_4, window_bounds = array<i64: 256, 1>}, {pipeline_mode = #tpu.pipeline_mode<synchronous>, transform_indices = @transform_5, window_bounds = array<i64: 256, 256>}, {pipeline_mode = #tpu.pipeline_mode<synchronous>, transform_indices = @transform_6, window_bounds = array<i64: 256, 1>}, {pipeline_mode = #tpu.pipeline_mode<synchronous>, transform_indices = @transform_7, window_bounds = array<i64: 8, 256>}, {pipeline_mode = #tpu.pipeline_mode<synchronous>, transform_indices = @transform_8, window_bounds = array<i64: 8, 1>}, {transform_indices = @transform_9, window_bounds = array<i64: 1, 8, 128>}]} {
    %c0 = arith.constant 0 : index
    %c0_0 = arith.constant 0 : index
    %c0_1 = arith.constant 0 : index
    %0 = vector.load %arg2[%c0, %c0_0, %c0_1] : memref<1x32x128xbf16, #tpu.memory_space<vmem>>, vector<1x32x128xbf16>
    %1 = vector.shape_cast %0 : vector<1x32x128xbf16> to vector<32x128xbf16>
    %c0_2 = arith.constant 0 : index
    %c0_3 = arith.constant 0 : index
    %2 = vector.load %arg3[%c0_2, %c0_3] : memref<1024x32xbf16, #tpu.memory_space<vmem>>, vector<1024x32xbf16>
    %cst = arith.constant dense<0.000000e+00> : vector<1024x128xf32>
    %3 = tpu.matmul %2, %1, %cst {dimension_numbers = #tpu.dot_dimension_numbers<[1], [0], [0], [1], [0, 0, 1, 1], [], []>} : vector<1024x32xbf16>, vector<32x128xbf16>, vector<1024x128xf32> -> vector<1024x128xf32>
    %c0_4 = arith.constant 0 : index
    %c0_5 = arith.constant 0 : index
    %4 = vector.load %arg4[%c0_4, %c0_5] : memref<1024x1xf32, #tpu.memory_space<vmem>>, vector<1024x1xf32>
    %5 = vector.broadcast %4 : vector<1024x1xf32> to vector<1024x128xf32>
    %6 = arith.addf %3, %5 : vector<1024x128xf32>
    %cst_6 = arith.constant 0.000000e+00 : f32
    %7 = vector.broadcast %cst_6 : f32 to vector<1024x128xf32>
    %8 = arith.maximumf %6, %7 : vector<1024x128xf32>
    %9 = arith.truncf %8 : vector<1024x128xf32> to vector<1024x128xbf16>
    %c0_7 = arith.constant 0 : index
    %c0_8 = arith.constant 0 : index
    %10 = vector.load %arg5[%c0_7, %c0_8] : memref<256x1024xbf16, #tpu.memory_space<vmem>>, vector<256x1024xbf16>
    %cst_9 = arith.constant dense<0.000000e+00> : vector<256x128xf32>
    %11 = tpu.matmul %10, %9, %cst_9 {dimension_numbers = #tpu.dot_dimension_numbers<[1], [0], [0], [1], [0, 0, 1, 1], [], []>} : vector<256x1024xbf16>, vector<1024x128xbf16>, vector<256x128xf32> -> vector<256x128xf32>
    %c0_10 = arith.constant 0 : index
    %c0_11 = arith.constant 0 : index
    %12 = vector.load %arg6[%c0_10, %c0_11] : memref<256x1xf32, #tpu.memory_space<vmem>>, vector<256x1xf32>
    %13 = vector.broadcast %12 : vector<256x1xf32> to vector<256x128xf32>
    %14 = arith.addf %11, %13 : vector<256x128xf32>
    %cst_12 = arith.constant 0.000000e+00 : f32
    %15 = vector.broadcast %cst_12 : f32 to vector<256x128xf32>
    %16 = arith.maximumf %14, %15 : vector<256x128xf32>
    %17 = arith.truncf %16 : vector<256x128xf32> to vector<256x128xbf16>
    %c0_13 = arith.constant 0 : index
    %c0_14 = arith.constant 0 : index
    %18 = vector.load %arg7[%c0_13, %c0_14] : memref<256x256xbf16, #tpu.memory_space<vmem>>, vector<256x256xbf16>
    %cst_15 = arith.constant dense<0.000000e+00> : vector<256x128xf32>
    %19 = tpu.matmul %18, %17, %cst_15 {dimension_numbers = #tpu.dot_dimension_numbers<[1], [0], [0], [1], [0, 0, 1, 1], [], []>} : vector<256x256xbf16>, vector<256x128xbf16>, vector<256x128xf32> -> vector<256x128xf32>
    %c0_16 = arith.constant 0 : index
    %c0_17 = arith.constant 0 : index
    %20 = vector.load %arg8[%c0_16, %c0_17] : memref<256x1xf32, #tpu.memory_space<vmem>>, vector<256x1xf32>
    %21 = vector.broadcast %20 : vector<256x1xf32> to vector<256x128xf32>
    %22 = arith.addf %19, %21 : vector<256x128xf32>
    %cst_18 = arith.constant 0.000000e+00 : f32
    %23 = vector.broadcast %cst_18 : f32 to vector<256x128xf32>
    %24 = arith.maximumf %22, %23 : vector<256x128xf32>
    %25 = arith.truncf %24 : vector<256x128xf32> to vector<256x128xbf16>
    %c0_19 = arith.constant 0 : index
    %c0_20 = arith.constant 0 : index
    %26 = vector.load %arg9[%c0_19, %c0_20] : memref<8x256xbf16, #tpu.memory_space<vmem>>, vector<8x256xbf16>
    %cst_21 = arith.constant dense<0.000000e+00> : vector<8x128xf32>
    %27 = tpu.matmul %26, %25, %cst_21 {dimension_numbers = #tpu.dot_dimension_numbers<[1], [0], [0], [1], [0, 0, 1, 1], [], []>} : vector<8x256xbf16>, vector<256x128xbf16>, vector<8x128xf32> -> vector<8x128xf32>
    %c0_22 = arith.constant 0 : index
    %c0_23 = arith.constant 0 : index
    %28 = vector.load %arg10[%c0_22, %c0_23] : memref<8x1xf32, #tpu.memory_space<vmem>>, vector<8x1xf32>
    %29 = vector.broadcast %28 : vector<8x1xf32> to vector<8x128xf32>
    %30 = arith.addf %27, %29 : vector<8x128xf32>
    %c0_24 = arith.constant 0 : index
    %c0_25 = arith.constant 0 : index
    %c0_26 = arith.constant 0 : index
    %31 = vector.load %arg11[%c0_24, %c0_25, %c0_26] : memref<1x8x128xf32, #tpu.memory_space<vmem>>, vector<1x8x128xf32>
    %32 = vector.shape_cast %31 : vector<1x8x128xf32> to vector<8x128xf32>
    %33 = vector.shape_cast %30 : vector<8x128xf32> to vector<1x8x128xf32>
    tpu.vector_store %arg11[%c0_24, %c0_25, %c0_26], %33 {strides = array<i32>} : memref<1x8x128xf32, #tpu.memory_space<vmem>>, vector<1x8x128xf32>,
    return
  }
  func.func @transform_0(%arg0: i32, %arg1: i32) -> (i32, i32, i32) {
    %c0_i32 = arith.constant 0 : i32
    %c0_i32_0 = arith.constant 0 : i32
    return %arg0, %c0_i32, %arg1 : i32, i32, i32
  }
  func.func @transform_1(%arg0: i32, %arg1: i32) -> (i32, i32) {
    %c0_i32 = arith.constant 0 : i32
    %c0_i32_0 = arith.constant 0 : i32
    %c0_i32_1 = arith.constant 0 : i32
    return %c0_i32, %c0_i32_0 : i32, i32
  }
  func.func @transform_2(%arg0: i32, %arg1: i32) -> (i32, i32) {
    %c0_i32 = arith.constant 0 : i32
    %c0_i32_0 = arith.constant 0 : i32
    %c0_i32_1 = arith.constant 0 : i32
    return %c0_i32, %c0_i32_0 : i32, i32
  }
  func.func @transform_3(%arg0: i32, %arg1: i32) -> (i32, i32) {
    %c0_i32 = arith.constant 0 : i32
    %c0_i32_0 = arith.constant 0 : i32
    %c0_i32_1 = arith.constant 0 : i32
    return %c0_i32, %c0_i32_0 : i32, i32
  }
  func.func @transform_4(%arg0: i32, %arg1: i32) -> (i32, i32) {
    %c0_i32 = arith.constant 0 : i32
    %c0_i32_0 = arith.constant 0 : i32
    %c0_i32_1 = arith.constant 0 : i32
    return %c0_i32, %c0_i32_0 : i32, i32
  }
  func.func @transform_5(%arg0: i32, %arg1: i32) -> (i32, i32) {
    %c0_i32 = arith.constant 0 : i32
    %c0_i32_0 = arith.constant 0 : i32
    %c0_i32_1 = arith.constant 0 : i32
    return %c0_i32, %c0_i32_0 : i32, i32
  }
  func.func @transform_6(%arg0: i32, %arg1: i32) -> (i32, i32) {
    %c0_i32 = arith.constant 0 : i32
    %c0_i32_0 = arith.constant 0 : i32
    %c0_i32_1 = arith.constant 0 : i32
    return %c0_i32, %c0_i32_0 : i32, i32
  }
  func.func @transform_7(%arg0: i32, %arg1: i32) -> (i32, i32) {
    %c0_i32 = arith.constant 0 : i32
    %c0_i32_0 = arith.constant 0 : i32
    %c0_i32_1 = arith.constant 0 : i32
    return %c0_i32, %c0_i32_0 : i32, i32
  }
  func.func @transform_8(%arg0: i32, %arg1: i32) -> (i32, i32) {
    %c0_i32 = arith.constant 0 : i32
    %c0_i32_0 = arith.constant 0 : i32
    %c0_i32_1 = arith.constant 0 : i32
    return %c0_i32, %c0_i32_0 : i32, i32
  }
  func.func @transform_9(%arg0: i32, %arg1: i32) -> (i32, i32, i32) {
    %c0_i32 = arith.constant 0 : i32
    %c0_i32_0 = arith.constant 0 : i32
    return %arg0, %c0_i32, %arg1 : i32, i32, i32
  }
}

</mosaic_0001>

<bundles_post_ra>
// kernel: tbase_forward.1
= control target key start
LH: loop header
LB: loop body
LE: loop exit
PB: predicated region body
PF: predicated region fallthrough
CT: control target
= control target key end

     0   :  { %s6075_s30 = smov 0   ;;  %s6077_s10 = smov 0   ;;  %s9202_s0 = inlined_call_operand.vmem [shape: bf16[2,32,128], index: 0, kind: input, shape index: {}]   ;;  %s9203_s1 = inlined_call_operand.vmem [shape: bf16[1024,32], index: 1, kind: input, shape index: {}]   ;;  %s9204_s2 = inlined_call_operand.vmem [shape: f32[1024,1], index: 2, kind: input, shape index: {}]   ;;  %s9205_s3 = inlined_call_operand.vmem [shape: bf16[256,1024], index: 3, kind: input, shape index: {}]   ;;  %s9206_s4 = inlined_call_operand.vmem [shape: f32[256,1], index: 4, kind: input, shape index: {}]   ;;  %s9207_s5 = inlined_call_operand.vmem [shape: bf16[256,256], index: 5, kind: input, shape index: {}]   ;;  %s9208_s6 = inlined_call_operand.vmem [shape: f32[256,1], index: 6, kind: input, shape index: {}]   ;;  %s9209_s7 = inlined_call_operand.vmem [shape: bf16[8,256], index: 7, kind: input, shape index: {}]   ;;  %s9210_s8 = inlined_call_operand.vmem [shape: f32[8,1], index: 8, kind: input, shape index: {}]   ;;  %s9211_s9 = inlined_call_operand.vmem [shape: f32[2,8,128], index: 9, kind: output, shape index: {}]  }
   0x1   :  { %s6079_s11 = smov 0  }
   0x2 LB: > { %s31_s12 = sadd.s32 1, %s6018_s10  ;;  %p4761_p0 = scmp.ge.s32.totalorder %s6022_s11, 1  ;;  %s6022_s11 = sphi %s6079_s11, %s19_s11   ;;  %s6018_s10 = sphi %s6077_s10, %s9441_s10   ;;  %s6014_s30 = sphi %s6075_s30, %s9440_s30  }
   0x3   : > { %p33_p1 = scmp.ge.s32.totalorder %s31_s12, 2  ;;  %p306_p2 = scmp.lt.s32.totalorder %s6022_s11, 3 }
   0x5   : > { %s9443_s12 = smov (%p33_p1, %s31_s12), 0  ;;  %p307_p3 = pnand %p4761_p0, %p306_p2 }
   0x7   : > { %310 = sbr.rel (%p307_p3) target bundleno = 2052 (0x804), region = 56 }
   0xc   : > { %v509_v0 = vld [vmem:[%s9204_s2 + $0x70] sm:$0xff]  ;;  %v507_v1 = vld [vmem:[%s9204_s2 + $0x60] sm:$0xff]  ;;  %p347_p4 = scmp.lt.s32.totalorder %s6014_s30, 1  ;;  %v6024_v3 = vmov 0   ;;  %v508_v5 = vld [vmem:[%s9204_s2 + $0x68] sm:$0xff]  ;;  %vm1595_vm0 = vcmask 261120  }
   0xd   : > { %v505_v2 = vld [vmem:[%s9204_s2 + $0x50] sm:$0xff]  ;;  %5999 = vset.pattern.permute.xlu2 %v6024_v3  ;;  %5998 = vset.pattern.permute.xlu1 %v6024_v3  ;;  %v510_v6 = vld [vmem:[%s9204_s2 + $0x78] sm:$0xff]  ;;  %v5738_v9 = vld [vmem:[%s9203_s1] sm:$0xff] }
   0xe   : > { %5997 = vset.pattern.permute.xlu0 %v6024_v3  ;;  %685 = vperm.xlu1 %5998, %v507_v1   ;;  %s9445_s30 = smov (!%p347_p4, %s6014_s30), 1  ;;  %v506_v7 = vld [vmem:[%s9204_s2 + $0x58] sm:$0xff]  ;;  %v504_v10 = vld [vmem:[%s9204_s2 + $0x48] sm:$0xff]  ;;  %v503_v11 = vld [vmem:[%s9204_s2 + $0x40] sm:$0xff] }
   0xf   : > { %695 = vperm.xlu0 %5997, %v509_v0   ;;  %675 = vperm.xlu2 %5999, %v505_v2   ;;  %s5735_s19 = sshll.u32 %s9445_s30, 4  ;;  %v501_v12 = vld [vmem:[%s9204_s2 + $0x30] sm:$0xff]  ;;  %v499_v13 = vld [vmem:[%s9204_s2 + $0x20] sm:$0xff]  ;;  %v502_v14 = vld [vmem:[%s9204_s2 + $0x38] sm:$0xff]  ;;  %s4764_s17 = sshll.u32 %s9445_s30, 3 }
  0x10   : > { %s354_s22 = scalar_lea.vmem %s9202_s0, %s5735_s19  ;;  %v500_v15 = vld [vmem:[%s9204_s2 + $0x28] sm:$0xff]  ;;  %v498_v17 = vld [vmem:[%s9204_s2 + $0x18] sm:$0xff]  ;;  %v497_v18 = vld [vmem:[%s9204_s2 + $0x10] sm:$0xff]  ;;  %s361_s20 = scalar_lea.vmem %s9211_s9, %s4764_s17 }
  0x11   : > { %v5737_v4 = vld [vmem:[%s354_s22 + $0x8] sm:$0xff]  ;;  %v5736_v8 = vld [vmem:[%s354_s22] sm:$0xff]  ;;  %v525_v20 = vld [vmem:[%s9204_s2 + $0xf0] sm:$0xff] }
  0x12   : > { %1794 = vmatpush.bf16.msra.mxu0 %v5737_v4  ;;  %5962 = vmatpush.bf16.msra.mxu3 %v5737_v4  ;;  %v5739_v16 = vld [vmem:[%s9203_s1 + $0x8] sm:$0xff]  ;;  %v495_v19 = vld [vmem:[%s9204_s2] sm:$0xff]  ;;  %v526_v22 = vld [vmem:[%s9204_s2 + $0xf8] sm:$0xff] }
  0x13   : > { %v496_v21 = vld [vmem:[%s9204_s2 + $0x8] sm:$0xff]  ;;  %v5740_v23 = vld [vmem:[%s9203_s1 + $0x10] sm:$0xff]  ;;  %v523_v25 = vld [vmem:[%s9204_s2 + $0xe0] sm:$0xff] }
  0x14   : > { %v524_v24 = vld [vmem:[%s9204_s2 + $0xe8] sm:$0xff]  ;;  %v521_v26 = vld [vmem:[%s9204_s2 + $0xd0] sm:$0xff]  ;;  %v519_v27 = vld [vmem:[%s9204_s2 + $0xc0] sm:$0xff] }
  0x15   : > { %v522_v28 = vld [vmem:[%s9204_s2 + $0xd8] sm:$0xff]  ;;  %v520_v29 = vld [vmem:[%s9204_s2 + $0xc8] sm:$0xff]  ;;  %v517_v32 = vld [vmem:[%s9204_s2 + $0xb0] sm:$0xff] }
  0x16   : > { %690 = vperm.xlu1 %5998, %v508_v5   ;;  %1795 = vmatpush.bf16.msra.mxu0 %v5736_v8  ;;  %v5741_v30 = vld [vmem:[%s9203_s1 + $0x18] sm:$0xff]  ;;  %v515_v33 = vld [vmem:[%s9204_s2 + $0xa0] sm:$0xff]  ;;  %v513_v34 = vld [vmem:[%s9204_s2 + $0x90] sm:$0xff] }
  0x17   : > { %700 = vperm.xlu0 %5997, %v510_v6   ;;  %680 = vperm.xlu2 %5999, %v506_v7   ;;  %v518_v31 = vld [vmem:[%s9204_s2 + $0xb8] sm:$0xff]  ;;  %v516_v35 = vld [vmem:[%s9204_s2 + $0xa8] sm:$0xff]  ;;  %v5742_v37 = vld [vmem:[%s9203_s1 + $0x20] sm:$0xff] }
  0x18   : > { %5963 = vmatpush.bf16.msra.mxu3 %v5736_v8  ;;  %v514_v36 = vld [vmem:[%s9204_s2 + $0x98] sm:$0xff]  ;;  %v512_v38 = vld [vmem:[%s9204_s2 + $0x88] sm:$0xff]  ;;  %v511_v39 = vld [vmem:[%s9204_s2 + $0x80] sm:$0xff] }
  0x19   : > { %5029 = vmatmul.msk.bf16.vlgmr.msra.gmra.mxu0 %vm1595_vm0, %v5738_v9  ;;  %v541_v40 = vld [vmem:[%s9204_s2 + $0x170] sm:$0xff]  ;;  %v539_v41 = vld [vmem:[%s9204_s2 + $0x160] sm:$0xff]  ;;  %v542_v42 = vld [vmem:[%s9204_s2 + $0x178] sm:$0xff] }
  0x1a   : > { %v540_v43 = vld [vmem:[%s9204_s2 + $0x168] sm:$0xff]  ;;  %v574_v46 = vld [vmem:[%s9204_s2 + $0x278] sm:$0xff]  ;;  %v573_v47 = vld [vmem:[%s9204_s2 + $0x270] sm:$0xff] }
  0x1b   : > { %v5743_v44 = vld [vmem:[%s9203_s1 + $0x28] sm:$0xff]  ;;  %v537_v48 = vld [vmem:[%s9204_s2 + $0x150] sm:$0xff]  ;;  %v538_v51 = vld [vmem:[%s9204_s2 + $0x158] sm:$0xff] }
  0x1c   : > { %v557_v50 = vld [vmem:[%s9204_s2 + $0x1f0] sm:$0xff]  ;;  %v558_v52 = vld [vmem:[%s9204_s2 + $0x1f8] sm:$0xff]  ;;  %v572_v55 = vld [vmem:[%s9204_s2 + $0x268] sm:$0xff] }
  0x1d   : > { %v5744_v53 = vld [vmem:[%s9203_s1 + $0x30] sm:$0xff]  ;;  %v571_v56 = vld [vmem:[%s9204_s2 + $0x260] sm:$0xff]  ;;  %v536_v62 = vld [vmem:[%s9204_s2 + $0x148] sm:$0xff] }
  0x1e   : > { %670 = vperm.xlu1 %5998, %v504_v10   ;;  %v535_v57 = vld [vmem:[%s9204_s2 + $0x140] sm:$0xff]  ;;  %v556_v63 = vld [vmem:[%s9204_s2 + $0x1e8] sm:$0xff]  ;;  %v5745_v0 = vld [vmem:[%s9203_s1 + $0x38] sm:$0xff] }
  0x1f   : > { %665 = vperm.xlu0 %5997, %v503_v11   ;;  %655 = vperm.xlu2 %5999, %v501_v12   ;;  %v555_v61 = vld [vmem:[%s9204_s2 + $0x1e0] sm:$0xff]  ;;  %v570_v4 = vld [vmem:[%s9204_s2 + $0x258] sm:$0xff]  ;;  %v569_v5 = vld [vmem:[%s9204_s2 + $0x250] sm:$0xff] }
  0x20   : > { %v533_v6 = vld [vmem:[%s9204_s2 + $0x130] sm:$0xff]  ;;  %v534_v11 = vld [vmem:[%s9204_s2 + $0x138] sm:$0xff] }
  0x21   : > { %v553_v10 = vld [vmem:[%s9204_s2 + $0x1d0] sm:$0xff]  ;;  %v554_v12 = vld [vmem:[%s9204_s2 + $0x1d8] sm:$0xff] }
  0x26   : > { %645 = vperm.xlu1 %5998, %v499_v13   ;;  %v5746_v13 = vld [vmem:[%s9203_s1 + $0x40] sm:$0xff] }
  0x27   : > { %660 = vperm.xlu0 %5997, %v502_v14   ;;  %650 = vperm.xlu2 %5999, %v500_v15  }
  0x29   : > { %5030 = vmatmul.msk.bf16.gmra.mxu0 %vm1595_vm0, %v5739_v16 }
  0x2e   : > { %640 = vperm.xlu1 %5998, %v498_v17  }
  0x2f   : > { %635 = vperm.xlu0 %5997, %v497_v18   ;;  %625 = vperm.xlu2 %5999, %v495_v19   ;;  %v568_v18 = vld [vmem:[%s9204_s2 + $0x248] sm:$0xff]  ;;  %v567_v19 = vld [vmem:[%s9204_s2 + $0x240] sm:$0xff] }
  0x36   : > { %775 = vperm.xlu1 %5998, %v525_v20   ;;  %v531_v20 = vld [vmem:[%s9204_s2 + $0x120] sm:$0xff] }
  0x37   : > { %630 = vperm.xlu0 %5997, %v496_v21   ;;  %780 = vperm.xlu2 %5999, %v526_v22  }
  0x39   : > { %5031 = vmatmul.msk.bf16.gmra.mxu0 %vm1595_vm0, %v5740_v23  ;;  %v5796_v23 = vld [vmem:[%s9203_s1 + $0x1d0] sm:$0xff] }
  0x3a   : > { %5087 = vmatmul.msk.bf16.vlgmr.msra.gmra.mxu3 %vm1595_vm0, %v5796_v23  ;;  %v548_v23 = vld [vmem:[%s9204_s2 + $0x1a8] sm:$0xff] }
  0x3e   : > { %770 = vperm.xlu1 %5998, %v524_v24  }
  0x3f   : > { %765 = vperm.xlu0 %5997, %v523_v25   ;;  %755 = vperm.xlu2 %5999, %v521_v26   ;;  %v551_v26 = vld [vmem:[%s9204_s2 + $0x1c0] sm:$0xff] }
  0x46   : > { %745 = vperm.xlu1 %5998, %v519_v27   ;;  %v532_v27 = vld [vmem:[%s9204_s2 + $0x128] sm:$0xff] }
  0x47   : > { %760 = vperm.xlu0 %5997, %v522_v28   ;;  %750 = vperm.xlu2 %5999, %v520_v29   ;;  %v552_v28 = vld [vmem:[%s9204_s2 + $0x1c8] sm:$0xff] }
  0x48   : > { %v5747_v29 = vld [vmem:[%s9203_s1 + $0x48] sm:$0xff] }
  0x49   : > { %5032 = vmatmul.msk.bf16.gmra.mxu0 %vm1595_vm0, %v5741_v30 }
  0x4e   : > { %740 = vperm.xlu1 %5998, %v518_v31  }
  0x4f   : > { %735 = vperm.xlu0 %5997, %v517_v32   ;;  %725 = vperm.xlu2 %5999, %v515_v33  }
  0x56   : > { %715 = vperm.xlu1 %5998, %v513_v34  }
  0x57   : > { %730 = vperm.xlu0 %5997, %v516_v35   ;;  %720 = vperm.xlu2 %5999, %v514_v36   ;;  %v566_v36 = vld [vmem:[%s9204_s2 + $0x238] sm:$0xff] }
  0x59   : > { %5033 = vmatmul.msk.bf16.gmra.mxu0 %vm1595_vm0, %v5742_v37 }
  0x5e   : > { %710 = vperm.xlu1 %5998, %v512_v38  }
  0x5f   : > { %705 = vperm.xlu0 %5997, %v511_v39   ;;  %855 = vperm.xlu2 %5999, %v541_v40   ;;  %v565_v39 = vld [vmem:[%s9204_s2 + $0x230] sm:$0xff] }
  0x60   : > { %v529_v40 = vld [vmem:[%s9204_s2 + $0x110] sm:$0xff] }
  0x66   : > { %845 = vperm.xlu1 %5998, %v539_v41  }
  0x67   : > { %860 = vperm.xlu0 %5997, %v542_v42   ;;  %850 = vperm.xlu2 %5999, %v540_v43  }
  0x69   : > { %v6230_v45 = vpop.permute.xlu2 %675  ;;  %5034 = vmatmul.msk.bf16.gmra.mxu0 %vm1595_vm0, %v5743_v44 }
  0x6e   : > { %1020 = vperm.xlu1 %5998, %v574_v46   ;;  %v5797_v46 = vld [vmem:[%s9203_s1 + $0x1d8] sm:$0xff] }
  0x6f   : > { %1015 = vperm.xlu0 %5997, %v573_v47   ;;  %835 = vperm.xlu2 %5999, %v537_v48  }
  0x70   : > { %5088 = vmatmul.msk.bf16.gmra.mxu3 %vm1595_vm0, %v5797_v46 }
  0x71   : > { %v6242_v49 = vpop.permute.xlu2 %680 }
  0x76   : > { %935 = vperm.xlu1 %5998, %v557_v50  }
  0x77   : > { %840 = vperm.xlu0 %5997, %v538_v51   ;;  %940 = vperm.xlu2 %5999, %v558_v52  }
  0x79   : > { %v6256_v54 = vpop.permute.xlu2 %655  ;;  %5035 = vmatmul.msk.bf16.gmra.mxu0 %vm1595_vm0, %v5744_v53  ;;  %v549_v53 = vld [vmem:[%s9204_s2 + $0x1b0] sm:$0xff] }
  0x7e   : > { %1010 = vperm.xlu1 %5998, %v572_v55   ;;  %v530_v55 = vld [vmem:[%s9204_s2 + $0x118] sm:$0xff] }
  0x7f   : > { %1005 = vperm.xlu0 %5997, %v571_v56   ;;  %825 = vperm.xlu2 %5999, %v535_v57   ;;  %v550_v56 = vld [vmem:[%s9204_s2 + $0x1b8] sm:$0xff] }
  0x80   : > { %v6268_v58 = vpop.permute.xlu1 %685 }
  0x81   : > { %v6270_v59 = vpop.permute.xlu0 %695  ;;  %v6272_v60 = vpop.permute.xlu2 %650 }
  0x86   : > { %925 = vperm.xlu1 %5998, %v555_v61   ;;  %v5748_v61 = vld [vmem:[%s9203_s1 + $0x50] sm:$0xff] }
  0x87   : > { %830 = vperm.xlu0 %5997, %v536_v62   ;;  %930 = vperm.xlu2 %5999, %v556_v63  }
  0x88   : > { %v6286_v1 = vpop.permute.xlu1 %690 }
  0x89   : > { %v6288_v2 = vpop.permute.xlu0 %700  ;;  %v626_v3 = vpop.permute.xlu2 %625  ;;  %5036 = vmatmul.msk.bf16.gmra.mxu0 %vm1595_vm0, %v5745_v0 }
  0x8e   : > { %1000 = vperm.xlu1 %5998, %v570_v4   ;;  %v564_v4 = vld [vmem:[%s9204_s2 + $0x228] sm:$0xff] }
  0x8f   : > { %995 = vperm.xlu0 %5997, %v569_v5   ;;  %815 = vperm.xlu2 %5999, %v533_v6   ;;  %v563_v5 = vld [vmem:[%s9204_s2 + $0x220] sm:$0xff] }
  0x90   : > { %v6300_v7 = vpop.permute.xlu1 %670  ;;  %v527_v6 = vld [vmem:[%s9204_s2 + $0x100] sm:$0xff] }
  0x91   : > { %v6302_v8 = vpop.permute.xlu0 %665  ;;  %v6304_v9 = vpop.permute.xlu2 %780 }
  0x96   : > { %915 = vperm.xlu1 %5998, %v553_v10   ;;  %v1797_v15 = vpop.f32.mrf.mxu0 }
  0x97   : > { %820 = vperm.xlu0 %5997, %v534_v11   ;;  %920 = vperm.xlu2 %5999, %v554_v12   ;;  %v1798_v30 = vadd.f32 %v1797_v15, %v626_v3 }
  0x98   : > { %v6318_v14 = vpop.permute.xlu1 %645 }
  0x99   : > { %v6320_v16 = vpop.permute.xlu0 %660  ;;  %v6322_v17 = vpop.permute.xlu2 %755  ;;  %5037 = vmatmul.msk.bf16.gmra.mxu0 %vm1595_vm0, %v5746_v13  ;;  %v2117_v37 = vmax.f32 %v1798_v30, 0.0  ;;  %v5798_v13 = vld [vmem:[%s9203_s1 + $0x1e0] sm:$0xff]  ;;  %v562_v30 = vld [vmem:[%s9204_s2 + $0x218] sm:$0xff] }
  0x9a   : > { %5089 = vmatmul.msk.bf16.gmra.mxu3 %vm1595_vm0, %v5798_v13 }
  0x9e   : > { %990 = vperm.xlu1 %5998, %v568_v18   ;;  %v1799_v22 = vpop.f32.mrf.mxu0 }
  0x9f   : > { %985 = vperm.xlu0 %5997, %v567_v19   ;;  %805 = vperm.xlu2 %5999, %v531_v20  }
  0xa0   : > { %v641_v21 = vpop.permute.xlu1 %640 }
  0xa1   : > { %v636_v24 = vpop.permute.xlu0 %635  ;;  %v6337_v25 = vpop.permute.xlu2 %750 }
  0xa6   : > { %905 = vperm.xlu1 %5998, %v551_v26   ;;  %v1802_v32 = vpop.f32.mrf.mxu0 }
  0xa7   : > { %810 = vperm.xlu0 %5997, %v532_v27   ;;  %910 = vperm.xlu2 %5999, %v552_v28   ;;  %v1803_v42 = vadd.f32 %v1802_v32, %v636_v24  ;;  %v561_v32 = vld [vmem:[%s9204_s2 + $0x210] sm:$0xff] }
  0xa8   : > { %v6352_v31 = vpop.permute.xlu1 %775 }
  0xa9   : > { %v631_v33 = vpop.permute.xlu0 %630  ;;  %v6354_v34 = vpop.permute.xlu2 %725  ;;  %5038 = vmatmul.msk.bf16.gmra.mxu0 %vm1595_vm0, %v5747_v29  ;;  %v2119_v51 = vmax.f32 %v1803_v42, 0.0 }
  0xaa   : > { %v1800_v35 = vadd.f32 %v1799_v22, %v631_v33  ;;  %v528_v22 = vld [vmem:[%s9204_s2 + $0x108] sm:$0xff]  ;;  %v545_v33 = vld [vmem:[%s9204_s2 + $0x190] sm:$0xff] }
  0xac   : > { %v2118_v38 = vmax.f32 %v1800_v35, 0.0 }
  0xae   : > { %980 = vperm.xlu1 %5998, %v566_v36   ;;  %v6366_v41 = vpack.c.bf16 %v2118_v38, %v2117_v37  ;;  %v1804_v44 = vpop.f32.mrf.mxu0  ;;  %v5799_v38 = vld [vmem:[%s9203_s1 + $0x1e8] sm:$0xff] }
  0xaf   : > { %975 = vperm.xlu0 %5997, %v565_v39   ;;  %795 = vperm.xlu2 %5999, %v529_v40   ;;  %v1805_v50 = vadd.f32 %v1804_v44, %v641_v21 }
  0xb0   : > { %v6368_v43 = vpop.permute.xlu1 %770  ;;  %5090 = vmatmul.msk.bf16.gmra.mxu3 %vm1595_vm0, %v5799_v38 }
  0xb1   : > { %v6373_v47 = vpop.permute.xlu0 %765  ;;  %v6375_v48 = vpop.permute.xlu2 %720  ;;  %v2120_v52 = vmax.f32 %v1805_v50, 0.0  ;;  %v546_v50 = vld [vmem:[%s9204_s2 + $0x198] sm:$0xff] }
  0xb3   : > { %v6387_v57 = vpack.c.bf16 %v2120_v52, %v2119_v51  ;;  %v560_v51 = vld [vmem:[%s9204_s2 + $0x208] sm:$0xff] }
  0xb6   : > { %895 = vperm.xlu1 %5998, %v549_v53   ;;  %v1807_v63 = vpop.f32.mrf.mxu0 }
  0xb7   : > { %800 = vperm.xlu0 %5997, %v530_v55   ;;  %900 = vperm.xlu2 %5999, %v550_v56   ;;  %v1808_v10 = vadd.f32 %v1807_v63, %v6318_v14  ;;  %v547_v14 = vld [vmem:[%s9204_s2 + $0x1a0] sm:$0xff]  ;;  %v544_v63 = vld [vmem:[%s9204_s2 + $0x188] sm:$0xff] }
  0xb8   : > { %v6392_v62 = vpop.permute.xlu1 %745 }
  0xb9   : > { %v6394_v0 = vpop.permute.xlu0 %760  ;;  %v6396_v3 = vpop.permute.xlu2 %855  ;;  %5039 = vmatmul.msk.bf16.gmra.mxu0 %vm1595_vm0, %v5748_v61  ;;  %v2121_v20 = vmax.f32 %v1808_v10, 0.0 }
  0xbe   : > { %970 = vperm.xlu1 %5998, %v564_v4   ;;  %v1809_v12 = vpop.f32.mrf.mxu0  ;;  %v543_v4 = vld [vmem:[%s9204_s2 + $0x180] sm:$0xff] }
  0xbf   : > { %965 = vperm.xlu0 %5997, %v563_v5   ;;  %785 = vperm.xlu2 %5999, %v527_v6   ;;  %v1810_v19 = vadd.f32 %v1809_v12, %v6272_v60  ;;  %v5749_v60 = vld [vmem:[%s9203_s1 + $0x58] sm:$0xff]  ;;  %v589_v5 = vld [vmem:[%s9204_s2 + $0x2f0] sm:$0xff] }
  0xc0   : > { %v6409_v11 = vpop.permute.xlu1 %740  ;;  %v5800_v12 = vld [vmem:[%s9203_s1 + $0x1f0] sm:$0xff] }
  0xc1   : > { %v6414_v15 = vpop.permute.xlu0 %735  ;;  %v6416_v18 = vpop.permute.xlu2 %850  ;;  %v2122_v21 = vmax.f32 %v1810_v19, 0.0  ;;  %5091 = vmatmul.msk.bf16.gmra.mxu3 %vm1595_vm0, %v5800_v12 }
  0xc3   : > { %v6429_v24 = vpack.c.bf16 %v2122_v21, %v2121_v20  ;;  %v587_v20 = vld [vmem:[%s9204_s2 + $0x2e0] sm:$0xff]  ;;  %v590_v21 = vld [vmem:[%s9204_s2 + $0x2f8] sm:$0xff] }
  0xc6   : > { %885 = vperm.xlu1 %5998, %v547_v14   ;;  %v1812_v27 = vpop.f32.mrf.mxu0  ;;  %v588_v14 = vld [vmem:[%s9204_s2 + $0x2e8] sm:$0xff] }
  0xc7   : > { %790 = vperm.xlu0 %5997, %v528_v22   ;;  %890 = vperm.xlu2 %5999, %v548_v23   ;;  %v1813_v35 = vadd.f32 %v1812_v27, %v6256_v54  ;;  %v559_v54 = vld [vmem:[%s9204_s2 + $0x200] sm:$0xff]  ;;  %v5751_v22 = vld [vmem:[%s9203_s1 + $0x68] sm:$0xff] }
  0xc8   : > { %v6434_v26 = vpop.permute.xlu1 %715 }
  0xc9   : > { %v6436_v28 = vpop.permute.xlu0 %730  ;;  %v6438_v29 = vpop.permute.xlu2 %835  ;;  %5040 = vmatmul.msk.bf16.gmra.mxu0 %vm1595_vm0, %v5749_v60  ;;  %v2123_v44 = vmax.f32 %v1813_v35, 0.0  ;;  %v585_v35 = vld [vmem:[%s9204_s2 + $0x2d0] sm:$0xff] }
  0xce   : > { %960 = vperm.xlu1 %5998, %v562_v30   ;;  %v1814_v37 = vpop.f32.mrf.mxu0 }
  0xcf   : > { %955 = vperm.xlu0 %5997, %v561_v32   ;;  %875 = vperm.xlu2 %5999, %v545_v33   ;;  %v1815_v42 = vadd.f32 %v1814_v37, %v6320_v16  ;;  %v5750_v16 = vld [vmem:[%s9203_s1 + $0x60] sm:$0xff]  ;;  %v622_v32 = vld [vmem:[%s9204_s2 + $0x3f8] sm:$0xff]  ;;  %v621_v33 = vld [vmem:[%s9204_s2 + $0x3f0] sm:$0xff] }
  0xd0   : > { %v6451_v36 = vpop.permute.xlu1 %710 }
  0xd1   : > { %v6456_v39 = vpop.permute.xlu0 %705  ;;  %v6458_v40 = vpop.permute.xlu2 %940  ;;  %v2124_v46 = vmax.f32 %v1815_v42, 0.0  ;;  %v5801_v42 = vld [vmem:[%s9203_s1 + $0x1f8] sm:$0xff] }
  0xd2   : > { %5092 = vmatmul.msk.bf16.gmra.mxu3 %vm1595_vm0, %v5801_v42  ;;  %v603_v42 = vld [vmem:[%s9204_s2 + $0x360] sm:$0xff] }
  0xd3   : > { %v6471_v52 = vpack.c.bf16 %v2124_v46, %v2123_v44 }
  0xd6   : > { %945 = vperm.xlu1 %5998, %v559_v54   ;;  %v6478_v55 = vpop.f32.mrf.mxu0  ;;  %v605_v54 = vld [vmem:[%s9204_s2 + $0x370] sm:$0xff] }
  0xd7   : > { %880 = vperm.xlu0 %5997, %v546_v50   ;;  %950 = vperm.xlu2 %5999, %v560_v51   ;;  %v586_v50 = vld [vmem:[%s9204_s2 + $0x2d8] sm:$0xff] }
  0xd8   : > { %v6476_v53 = vpop.permute.xlu1 %845  ;;  %v606_v51 = vld [vmem:[%s9204_s2 + $0x378] sm:$0xff] }
  0xd9   : > { %v6480_v56 = vpop.permute.xlu0 %860  ;;  %v6482_v61 = vpop.permute.xlu2 %825  ;;  %5041 = vmatmul.msk.bf16.gmra.mxu0 %vm1595_vm0, %v5750_v16  ;;  %v5752_v16 = vld [vmem:[%s9203_s1 + $0x70] sm:$0xff] }
  0xde   : > { %870 = vperm.xlu1 %5998, %v544_v63   ;;  %v6496_v10 = vpop.f32.mrf.mxu0 }
  0xdf   : > { %865 = vperm.xlu0 %5997, %v543_v4   ;;  %1095 = vperm.xlu2 %5999, %v589_v5  }
  0xe0   : > { %v6494_v6 = vpop.permute.xlu1 %1020 }
  0xe1   : > { %9212 = vst [vmem:[#allocation2_spill] sm:$0xff] %v6494_v6  ;;  %v6501_v13 = vpop.permute.xlu0 %1015  ;;  %v6503_v19 = vpop.permute.xlu2 %930 }
  0xe2   : > { %9213 = vst [vmem:[#allocation3_spill] sm:$0xff] %v6501_v13 }
  0xe6   : > { %1085 = vperm.xlu1 %5998, %v587_v20   ;;  %v6520_v60 = vpop.f32.mrf.mxu0  ;;  %v620_v20 = vld [vmem:[%s9204_s2 + $0x3e8] sm:$0xff] }
  0xe7   : > { %1100 = vperm.xlu0 %5997, %v590_v21   ;;  %1090 = vperm.xlu2 %5999, %v588_v14   ;;  %v619_v21 = vld [vmem:[%s9204_s2 + $0x3e0] sm:$0xff] }
  0xe8   : > { %v6518_v23 = vpop.permute.xlu1 %935  ;;  %v583_v14 = vld [vmem:[%s9204_s2 + $0x2c0] sm:$0xff] }
  0xe9   : > { %v6522_v27 = vpop.permute.xlu0 %840  ;;  %v6524_v30 = vpop.permute.xlu2 %815  ;;  %5042 = vmatmul.msk.bf16.gmra.mxu0 %vm1595_vm0, %v5751_v22 }
  0xee   : > { %1260 = vperm.xlu1 %5998, %v622_v32   ;;  %v1824_v38 = vpop.f32.mrf.mxu0 }
  0xef   : > { %1255 = vperm.xlu0 %5997, %v621_v33   ;;  %1075 = vperm.xlu2 %5999, %v585_v35  }
  0xf0   : > { %v6536_v37 = vpop.permute.xlu1 %1010 }
  0xf1   : > { %9214 = vst [vmem:[#allocation4_spill] sm:$0xff] %v6536_v37  ;;  %v6541_v44 = vpop.permute.xlu0 %1005  ;;  %v6543_v46 = vpop.permute.xlu2 %920 }
  0xf2   : > { %9215 = vst [vmem:[#allocation5_spill] sm:$0xff] %v6541_v44 }
  0xf6   : > { %1175 = vperm.xlu1 %5998, %v605_v54   ;;  %v1827_v4 = vpop.f32.mrf.mxu0  ;;  %v584_v54 = vld [vmem:[%s9204_s2 + $0x2c8] sm:$0xff] }
  0xf7   : > { %1080 = vperm.xlu0 %5997, %v586_v50   ;;  %1180 = vperm.xlu2 %5999, %v606_v51   ;;  %v604_v50 = vld [vmem:[%s9204_s2 + $0x368] sm:$0xff]  ;;  %v5753_v51 = vld [vmem:[%s9203_s1 + $0x78] sm:$0xff] }
  0xf8   : > { %v6558_v63 = vpop.permute.xlu1 %925 }
  0xf9   : > { %v6560_v5 = vpop.permute.xlu0 %830  ;;  %v6562_v12 = vpop.permute.xlu2 %805  ;;  %5043 = vmatmul.msk.bf16.gmra.mxu0 %vm1595_vm0, %v5752_v16 }
  0xfe   : > { %1250 = vperm.xlu1 %5998, %v620_v20   ;;  %v1829_v32 = vpop.f32.mrf.mxu0 }
  0xff   : > { %1245 = vperm.xlu0 %5997, %v619_v21   ;;  %1065 = vperm.xlu2 %5999, %v583_v14   ;;  %v1830_v13 = vadd.f32 %v1829_v32, %v6286_v1 }
 0x100   : > { %v6574_v22 = vpop.permute.xlu1 %1000 }
 0x101   : > { %9216 = vst [vmem:[#allocation6_spill] sm:$0xff] %v6574_v22  ;;  %v6576_v33 = vpop.permute.xlu0 %995  ;;  %v6578_v35 = vpop.permute.xlu2 %910  ;;  %v2130_v1 = vmax.f32 %v1830_v13, 0.0  ;;  %v1820_v13 = vadd.f32 %v6496_v10, %v6300_v7  ;;  %v579_v7 = vld [vmem:[%s9204_s2 + $0x2a0] sm:$0xff] }
 0x102   : > { %9217 = vst [vmem:[#allocation7_spill] sm:$0xff] %v6576_v33  ;;  %v618_v33 = vld [vmem:[%s9204_s2 + $0x3d8] sm:$0xff] }
 0x103   : > { %9218 = vst [vmem:[#allocation8_spill] sm:$0xff] %v6578_v35  ;;  %v2126_v10 = vmax.f32 %v1820_v13, 0.0  ;;  %v600_v13 = vld [vmem:[%s9204_s2 + $0x348] sm:$0xff] }
 0x106   : > { %1165 = vperm.xlu1 %5998, %v603_v42   ;;  %v1832_v20 = vpop.f32.mrf.mxu0  ;;  %v617_v42 = vld [vmem:[%s9204_s2 + $0x3d0] sm:$0xff] }
 0x107   : > { %1070 = vperm.xlu0 %5997, %v584_v54   ;;  %1170 = vperm.xlu2 %5999, %v604_v50   ;;  %v581_v54 = vld [vmem:[%s9204_s2 + $0x2b0] sm:$0xff]  ;;  %v1833_v50 = vadd.f32 %v1832_v20, %v6270_v59  ;;  %v1828_v59 = vadd.f32 %v1827_v4, %v6268_v58  ;;  %v582_v20 = vld [vmem:[%s9204_s2 + $0x2b8] sm:$0xff]  ;;  %v1823_v58 = vadd.f32 %v6520_v60, %v6230_v45  ;;  %v616_v45 = vld [vmem:[%s9204_s2 + $0x3c8] sm:$0xff] }
 0x108   : > { %v6592_v16 = vpop.permute.xlu1 %915  ;;  %v1818_v60 = vadd.f32 %v6478_v55, %v6302_v8 }
 0x109   : > { %9219 = vst [vmem:[#allocation9_spill] sm:$0xff] %v6592_v16  ;;  %v6594_v21 = vpop.permute.xlu0 %820  ;;  %v6596_v14 = vpop.permute.xlu2 %795  ;;  %5044 = vmatmul.msk.bf16.gmra.mxu0 %vm1595_vm0, %v5753_v51  ;;  %v2131_v35 = vmax.f32 %v1833_v50, 0.0  ;;  %v2129_v4 = vmax.f32 %v1828_v59, 0.0 }
 0x10e   : > { %1240 = vperm.xlu1 %5998, %v618_v33   ;;  %v1834_v51 = vpop.f32.mrf.mxu0  ;;  %v601_v33 = vld [vmem:[%s9204_s2 + $0x350] sm:$0xff] }
 0x10f   : > { %1235 = vperm.xlu0 %5997, %v617_v42   ;;  %1055 = vperm.xlu2 %5999, %v581_v54   ;;  %v1835_v37 = vadd.f32 %v1834_v51, %v6288_v2  ;;  %v602_v42 = vld [vmem:[%s9204_s2 + $0x358] sm:$0xff]  ;;  %v1825_v2 = vadd.f32 %v1824_v38, %v6242_v49  ;;  %v2127_v51 = vmax.f32 %v1823_v58, 0.0 }
 0x110   : > { %v6609_v22 = vpop.permute.xlu1 %990 }
 0x111   : > { %9220 = vst [vmem:[#allocation10_spill] sm:$0xff] %v6609_v22  ;;  %v6611_v44 = vpop.permute.xlu0 %985  ;;  %v6613_v6 = vpop.permute.xlu2 %900  ;;  %v2132_v16 = vmax.f32 %v1835_v37, 0.0  ;;  %v5754_v37 = vld [vmem:[%s9203_s1 + $0x80] sm:$0xff]  ;;  %v2128_v38 = vmax.f32 %v1825_v2, 0.0 }
 0x112   : > { %9221 = vst [vmem:[#allocation11_spill] sm:$0xff] %v6611_v44 }
 0x113   : > { %v2252_v54 = vpack.c.bf16 %v2132_v16, %v2131_v35  ;;  %v2251_v16 = vpack.c.bf16 %v2130_v1, %v2129_v4  ;;  %v2250_v59 = vpack.c.bf16 %v2128_v38, %v2127_v51 }
 0x115   : > { %3269 = vmatpush.bf16.msra.mxu1 %v2252_v54  ;;  %5964 = vmatpush.bf16.msra.mxu2 %v2252_v54 }
 0x116   : > { %1155 = vperm.xlu1 %5998, %v601_v33   ;;  %v1837_v50 = vpop.f32.mrf.mxu0  ;;  %v615_v33 = vld [vmem:[%s9204_s2 + $0x3c0] sm:$0xff] }
 0x117   : > { %1060 = vperm.xlu0 %5997, %v582_v20   ;;  %1160 = vperm.xlu2 %5999, %v602_v42   ;;  %v1838_v20 = vadd.f32 %v1837_v50, %v6456_v39  ;;  %v2125_v42 = vmax.f32 %v1818_v60, 0.0  ;;  %v599_v39 = vld [vmem:[%s9204_s2 + $0x340] sm:$0xff]  ;;  %v580_v50 = vld [vmem:[%s9204_s2 + $0x2a8] sm:$0xff] }
 0x118   : > { %v6633_v32 = vpop.permute.xlu1 %905 }
 0x119   : > { %v6635_v35 = vpop.permute.xlu0 %810  ;;  %v6637_v49 = vpop.permute.xlu2 %785  ;;  %5045 = vmatmul.msk.bf16.gmra.mxu0 %vm1595_vm0, %v5754_v37  ;;  %3270 = vmatpush.bf16.msra.mxu1 %v2251_v16  ;;  %v2249_v37 = vpack.c.bf16 %v2126_v10, %v2125_v42  ;;  %v2133_v58 = vmax.f32 %v1838_v20, 0.0  ;;  %v5095_v20 = vld [vmem:[%s9205_s3] sm:$0xf] }
 0x11a   : > { %5965 = vmatpush.bf16.msra.mxu2 %v2251_v16 }
 0x11d   : > { %3271 = vmatpush.bf16.msra.mxu1 %v2250_v59 }
 0x11e   : > { %1230 = vperm.xlu1 %5998, %v616_v45   ;;  %5966 = vmatpush.bf16.msra.mxu2 %v2250_v59  ;;  %v1839_v55 = vpop.f32.mrf.mxu0 }
 0x11f   : > { %1225 = vperm.xlu0 %5997, %v615_v33   ;;  %1045 = vperm.xlu2 %5999, %v579_v7   ;;  %v1840_v1 = vadd.f32 %v1839_v55, %v6451_v36  ;;  %v5755_v36 = vld [vmem:[%s9203_s1 + $0x88] sm:$0xff]  ;;  %v614_v33 = vld [vmem:[%s9204_s2 + $0x3b8] sm:$0xff]  ;;  %v613_v7 = vld [vmem:[%s9204_s2 + $0x3b0] sm:$0xff] }
 0x120   : > { %v6654_v8 = vpop.permute.xlu1 %980 }
 0x121   : > { %9222 = vst [vmem:[#allocation12_spill] sm:$0xff] %v6654_v8  ;;  %v6656_v54 = vpop.permute.xlu0 %975  ;;  %v6658_v2 = vpop.permute.xlu2 %890  ;;  %v2134_v4 = vmax.f32 %v1840_v1, 0.0  ;;  %3272 = vmatpush.bf16.msra.mxu1 %v2249_v37 }
 0x122   : > { %9223 = vst [vmem:[#allocation13_spill] sm:$0xff] %v6656_v54  ;;  %5967 = vmatpush.bf16.msra.mxu2 %v2249_v37  ;;  %v5383_v37 = vld [vmem:[%s9205_s3 + $0x240] sm:$0xf] }
 0x123   : > { %v6670_v38 = vpack.c.bf16 %v2134_v4, %v2133_v58 }
 0x125   : > { %3273 = vmatpush.bf16.msra.mxu1 %v6471_v52 }
 0x126   : > { %1145 = vperm.xlu1 %5998, %v599_v39   ;;  %5968 = vmatpush.bf16.msra.mxu2 %v6471_v52  ;;  %v1842_v45 = vpop.f32.mrf.mxu0  ;;  %v577_v52 = vld [vmem:[%s9204_s2 + $0x290] sm:$0xff] }
 0x127   : > { %1050 = vperm.xlu0 %5997, %v580_v50   ;;  %1150 = vperm.xlu2 %5999, %v600_v13   ;;  %v1843_v10 = vadd.f32 %v1842_v45, %v6434_v26  ;;  %v5806_v26 = vld [vmem:[%s9205_s3 + $0x1c] sm:$0xf0]  ;;  %v597_v39 = vld [vmem:[%s9204_s2 + $0x330] sm:$0xff]  ;;  %v598_v50 = vld [vmem:[%s9204_s2 + $0x338] sm:$0xff] }
 0x128   : > { %v6675_v16 = vpop.permute.xlu1 %895  ;;  %v5096_v13 = vor.u32 %v5806_v26, %v5095_v20  ;;  %v611_v20 = vld [vmem:[%s9204_s2 + $0x3a0] sm:$0xff] }
 0x129   : > { %v6679_v60 = vpop.permute.xlu0 %800  ;;  %v6681_v51 = vpop.permute.xlu2 %875  ;;  %5046 = vmatmul.msk.bf16.gmra.mxu0 %vm1595_vm0, %v5755_v36  ;;  %3274 = vmatpush.bf16.msra.mxu1 %v6429_v24  ;;  %v2135_v58 = vmax.f32 %v1843_v10, 0.0 }
 0x12a   : > { %5969 = vmatpush.bf16.msra.mxu2 %v6429_v24 }
 0x12d   : > { %3275 = vmatpush.bf16.msra.mxu1 %v6387_v57 }
 0x12e   : > { %1220 = vperm.xlu1 %5998, %v614_v33   ;;  %5970 = vmatpush.bf16.msra.mxu2 %v6387_v57  ;;  %v1844_v24 = vpop.f32.mrf.mxu0  ;;  %v5878_v57 = vld [vmem:[%s9205_s3 + $0x25c] sm:$0xf0]  ;;  %v5756_v33 = vld [vmem:[%s9203_s1 + $0x90] sm:$0xff] }
 0x12f   : > { %1215 = vperm.xlu0 %5997, %v613_v7   ;;  %1035 = vperm.xlu2 %5999, %v577_v52   ;;  %v1845_v1 = vadd.f32 %v1844_v24, %v6375_v48  ;;  %v578_v48 = vld [vmem:[%s9204_s2 + $0x298] sm:$0xff]  ;;  %v5384_v36 = vor.u32 %v5878_v57, %v5383_v37  ;;  %v612_v24 = vld [vmem:[%s9204_s2 + $0x3a8] sm:$0xff] }
 0x130   : > { %v6696_v59 = vpop.permute.xlu1 %970 }
 0x131   : > { %9224 = vst [vmem:[#allocation14_spill] sm:$0xff] %v6696_v59  ;;  %v6703_v42 = vpop.permute.xlu0 %965  ;;  %v6705_v55 = vpop.permute.xlu2 %950  ;;  %v2136_v4 = vmax.f32 %v1845_v1, 0.0  ;;  %3276 = vmatpush.bf16.msra.mxu1 %v6366_v41  ;;  %v575_v1 = vld [vmem:[%s9204_s2 + $0x280] sm:$0xff] }
 0x132   : > { %9225 = vst [vmem:[#allocation15_spill] sm:$0xff] %v6703_v42  ;;  %5971 = vmatpush.bf16.msra.mxu2 %v6366_v41 }
 0x133   : > { %v6728_v45 = vpack.c.bf16 %v2136_v4, %v2135_v58  ;;  %v5127_v58 = vld [vmem:[%s9205_s3 + $0x40] sm:$0xf] }
 0x134   : > { %3277 = vmatmul.bf16.vlgmr.msra.gmra.mxu1 %v5096_v13  ;;  %v5886_v13 = vld [vmem:[%s9205_s3 + $0x29c] sm:$0xf0] }
 0x135   : > { %3322 = vmatmul.bf16.vlgmr.msra.gmra.mxu2 %v5384_v36 }
 0x136   : > { %1135 = vperm.xlu1 %5998, %v597_v39   ;;  %v1847_v7 = vpop.f32.mrf.mxu0 }
 0x137   : > { %1040 = vperm.xlu0 %5997, %v578_v48   ;;  %1140 = vperm.xlu2 %5999, %v598_v50   ;;  %v1848_v26 = vadd.f32 %v1847_v7, %v6354_v34  ;;  %v5814_v50 = vld [vmem:[%s9205_s3 + $0x5c] sm:$0xf0] }
 0x138   : > { %v6733_v41 = vpop.permute.xlu1 %885  ;;  %v5415_v34 = vld [vmem:[%s9205_s3 + $0x280] sm:$0xf] }
 0x139   : > { %v6735_v52 = vpop.permute.xlu0 %790  ;;  %v6737_v10 = vpop.permute.xlu2 %1095  ;;  %5047 = vmatmul.msk.bf16.gmra.mxu0 %vm1595_vm0, %v5756_v33  ;;  %v2137_v36 = vmax.f32 %v1848_v26, 0.0  ;;  %v595_v7 = vld [vmem:[%s9204_s2 + $0x320] sm:$0xff]  ;;  %v5757_v26 = vld [vmem:[%s9203_s1 + $0x98] sm:$0xff] }
 0x13a   : > { %9226 = vst [vmem:[#allocation16_spill] sm:$0xff] %v6737_v10 }
 0x13e   : > { %1210 = vperm.xlu1 %5998, %v612_v24   ;;  %v1849_v57 = vpop.f32.mrf.mxu0  ;;  %v596_v24 = vld [vmem:[%s9204_s2 + $0x328] sm:$0xff] }
 0x13f   : > { %1205 = vperm.xlu0 %5997, %v611_v20   ;;  %1025 = vperm.xlu2 %5999, %v575_v1   ;;  %v1850_v48 = vadd.f32 %v1849_v57, %v6436_v28  ;;  %v576_v28 = vld [vmem:[%s9204_s2 + $0x288] sm:$0xff]  ;;  %v5128_v20 = vor.u32 %v5814_v50, %v5127_v58  ;;  %v5416_v1 = vor.u32 %v5886_v13, %v5415_v34  ;;  %v610_v58 = vld [vmem:[%s9204_s2 + $0x398] sm:$0xff]  ;;  %v609_v50 = vld [vmem:[%s9204_s2 + $0x390] sm:$0xff] }
 0x140   : > { %v6750_v37 = vpop.permute.xlu1 %960  ;;  %v593_v34 = vld [vmem:[%s9204_s2 + $0x310] sm:$0xff] }
 0x141   : > { %9227 = vst [vmem:[#allocation17_spill] sm:$0xff] %v6750_v37  ;;  %v6755_v4 = vpop.permute.xlu0 %955  ;;  %v6757_v39 = vpop.permute.xlu2 %1090  ;;  %v2138_v33 = vmax.f32 %v1850_v48, 0.0 }
 0x142   : > { %9228 = vst [vmem:[#allocation18_spill] sm:$0xff] %v6755_v4 }
 0x143   : > { %9229 = vst [vmem:[#allocation19_spill] sm:$0xff] %v6757_v39  ;;  %v6778_v57 = vpack.c.bf16 %v2138_v33, %v2137_v36 }
 0x144   : > { %3282 = vmatmul.bf16.gmra.mxu1 %v5128_v20 }
 0x145   : > { %3327 = vmatmul.bf16.gmra.mxu2 %v5416_v1  ;;  %v5822_v1 = vld [vmem:[%s9205_s3 + $0x9c] sm:$0xf0] }
 0x146   : > { %1125 = vperm.xlu1 %5998, %v595_v7   ;;  %v1852_v39 = vpop.f32.mrf.mxu0  ;;  %v5159_v7 = vld [vmem:[%s9205_s3 + $0x80] sm:$0xf] }
 0x147   : > { %1030 = vperm.xlu0 %5997, %v576_v28   ;;  %1130 = vperm.xlu2 %5999, %v596_v24   ;;  %v1853_v13 = vadd.f32 %v1852_v39, %v6414_v15  ;;  %v5447_v15 = vld [vmem:[%s9205_s3 + $0x2c0] sm:$0xf] }
 0x148   : > { %v6783_v48 = vpop.permute.xlu1 %945  ;;  %v5894_v39 = vld [vmem:[%s9205_s3 + $0x2dc] sm:$0xf0] }
 0x149   : > { %v6785_v10 = vpop.permute.xlu0 %880  ;;  %v6787_v44 = vpop.permute.xlu2 %1075  ;;  %5048 = vmatmul.msk.bf16.gmra.mxu0 %vm1595_vm0, %v5757_v26  ;;  %v2139_v26 = vmax.f32 %v1853_v13, 0.0  ;;  %v5758_v13 = vld [vmem:[%s9203_s1 + $0xa0] sm:$0xff] }
 0x14a   : > { %9230 = vst [vmem:[#allocation20_spill] sm:$0xff] %v6787_v44 }
 0x14e   : > { %1200 = vperm.xlu1 %5998, %v610_v58   ;;  %v1854_v33 = vpop.f32.mrf.mxu0 }
 0x14f   : > { %1195 = vperm.xlu0 %5997, %v609_v50   ;;  %1115 = vperm.xlu2 %5999, %v593_v34   ;;  %v1855_v20 = vadd.f32 %v1854_v33, %v6409_v11  ;;  %v607_v50 = vld [vmem:[%s9204_s2 + $0x380] sm:$0xff]  ;;  %v594_v11 = vld [vmem:[%s9204_s2 + $0x318] sm:$0xff]  ;;  %v608_v34 = vld [vmem:[%s9204_s2 + $0x388] sm:$0xff]  ;;  %v5160_v33 = vor.u32 %v5822_v1, %v5159_v7 }
 0x150   : > { %v6800_v36 = vpop.permute.xlu1 %870  ;;  %v592_v7 = vld [vmem:[%s9204_s2 + $0x308] sm:$0xff]  ;;  %v591_v1 = vld [vmem:[%s9204_s2 + $0x300] sm:$0xff] }
 0x151   : > { %v6805_v28 = vpop.permute.xlu0 %865  ;;  %v6807_v24 = vpop.permute.xlu2 %1180  ;;  %v2140_v58 = vmax.f32 %v1855_v20, 0.0 }
 0x152   : > { %9231 = vst [vmem:[#allocation21_spill] sm:$0xff] %v6807_v24  ;;  %v5448_v24 = vor.u32 %v5894_v39, %v5447_v15 }
 0x153   : > { %v6828_v44 = vpack.c.bf16 %v2140_v58, %v2139_v26  ;;  %v5191_v26 = vld [vmem:[%s9205_s3 + $0xc0] sm:$0xf] }
 0x154   : > { %3287 = vmatmul.bf16.gmra.mxu1 %v5160_v33  ;;  %v5902_v33 = vld [vmem:[%s9205_s3 + $0x31c] sm:$0xf0] }
 0x155   : > { %3332 = vmatmul.bf16.gmra.mxu2 %v5448_v24  ;;  %v2451_v24 = vld [vmem:[%s9206_s4 + $0x70] sm:$0xff] }
 0x156   : > { %1185 = vperm.xlu1 %5998, %v607_v50   ;;  %v6835_v22 = vpop.f32.mrf.mxu0 }
 0x157   : > { %1120 = vperm.xlu0 %5997, %v594_v11   ;;  %1190 = vperm.xlu2 %5999, %v608_v34   ;;  %v5830_v11 = vld [vmem:[%s9205_s3 + $0xdc] sm:$0xf0] }
 0x158   : > { %v6833_v20 = vpop.permute.xlu1 %1085  ;;  %v5479_v34 = vld [vmem:[%s9205_s3 + $0x300] sm:$0xf] }
 0x159   : > { %9232 = vst [vmem:[#allocation22_spill] sm:$0xff] %v6833_v20  ;;  %v6837_v8 = vpop.permute.xlu0 %1100  ;;  %v6839_v54 = vpop.permute.xlu2 %1065  ;;  %5049 = vmatmul.msk.bf16.gmra.mxu0 %vm1595_vm0, %v5758_v13  ;;  %v2449_v13 = vld [vmem:[%s9206_s4 + $0x60] sm:$0xff] }
 0x15a   : > { %9233 = vst [vmem:[#allocation23_spill] sm:$0xff] %v6837_v8 }
 0x15b   : > { %9234 = vst [vmem:[#allocation24_spill] sm:$0xff] %v6839_v54  ;;  %v5759_v54 = vld [vmem:[%s9203_s1 + $0xa8] sm:$0xff] }
 0x15e   : > { %1110 = vperm.xlu1 %5998, %v592_v7   ;;  %v6853_v39 = vpop.f32.mrf.mxu0  ;;  %v2452_v7 = vld [vmem:[%s9206_s4 + $0x78] sm:$0xff] }
 0x15f   : > { %1105 = vperm.xlu0 %5997, %v591_v1   ;;  %2541 = vperm.xlu2 %5999, %v2451_v24   ;;  %v2450_v1 = vld [vmem:[%s9206_s4 + $0x68] sm:$0xff]  ;;  %v5192_v24 = vor.u32 %v5830_v11, %v5191_v26  ;;  %v2448_v26 = vld [vmem:[%s9206_s4 + $0x58] sm:$0xff]  ;;  %v2447_v11 = vld [vmem:[%s9206_s4 + $0x50] sm:$0xff] }
 0x160   : > { %v6851_v15 = vpop.permute.xlu1 %1260 }
 0x161   : > { %9235 = vst [vmem:[#allocation25_spill] sm:$0xff] %v6851_v15  ;;  %v6858_v58 = vpop.permute.xlu0 %1255  ;;  %v6860_v50 = vpop.permute.xlu2 %1170 }
 0x162   : > { %9236 = vst [vmem:[#allocation26_spill] sm:$0xff] %v6858_v58 }
 0x163   : > { %9237 = vst [vmem:[#allocation27_spill] sm:$0xff] %v6860_v50  ;;  %v5480_v50 = vor.u32 %v5902_v33, %v5479_v34 }
 0x164   : > { %3292 = vmatmul.bf16.gmra.mxu1 %v5192_v24  ;;  %v5511_v24 = vld [vmem:[%s9205_s3 + $0x340] sm:$0xf] }
 0x165   : > { %3337 = vmatmul.bf16.gmra.mxu2 %v5480_v50  ;;  %v2467_v50 = vld [vmem:[%s9206_s4 + $0xf0] sm:$0xff] }
 0x166   : > { %2531 = vperm.xlu1 %5998, %v2449_v13   ;;  %v6885_v8 = vpop.f32.mrf.mxu0 }
 0x167   : > { %2546 = vperm.xlu0 %5997, %v2452_v7   ;;  %2536 = vperm.xlu2 %5999, %v2450_v1   ;;  %v5838_v1 = vld [vmem:[%s9205_s3 + $0x11c] sm:$0xf0] }
 0x168   : > { %v6883_v20 = vpop.permute.xlu1 %1175 }
 0x169   : > { %9238 = vst [vmem:[#allocation28_spill] sm:$0xff] %v6883_v20  ;;  %v6887_v15 = vpop.permute.xlu0 %1080  ;;  %v6889_v58 = vpop.permute.xlu2 %1055  ;;  %5050 = vmatmul.msk.bf16.gmra.mxu0 %vm1595_vm0, %v5759_v54  ;;  %v5223_v54 = vld [vmem:[%s9205_s3 + $0x100] sm:$0xf] }
 0x16a   : > { %9239 = vst [vmem:[#allocation29_spill] sm:$0xff] %v6887_v15  ;;  %v5224_v20 = vor.u32 %v5838_v1, %v5223_v54  ;;  %v2466_v54 = vld [vmem:[%s9206_s4 + $0xe8] sm:$0xff] }
 0x16b   : > { %9240 = vst [vmem:[#allocation30_spill] sm:$0xff] %v6889_v58  ;;  %v5760_v58 = vld [vmem:[%s9203_s1 + $0xb0] sm:$0xff] }
 0x16e   : > { %2526 = vperm.xlu1 %5998, %v2448_v26   ;;  %v6903_v33 = vpop.f32.mrf.mxu0  ;;  %v5910_v26 = vld [vmem:[%s9205_s3 + $0x35c] sm:$0xf0] }
 0x16f   : > { %2521 = vperm.xlu0 %5997, %v2447_v11   ;;  %2621 = vperm.xlu2 %5999, %v2467_v50   ;;  %v2445_v11 = vld [vmem:[%s9206_s4 + $0x40] sm:$0xff]  ;;  %v2468_v50 = vld [vmem:[%s9206_s4 + $0xf8] sm:$0xff]  ;;  %v5512_v15 = vor.u32 %v5910_v26, %v5511_v24 }
 0x170   : > { %v6901_v34 = vpop.permute.xlu1 %1250 }
 0x171   : > { %9241 = vst [vmem:[#allocation31_spill] sm:$0xff] %v6901_v34  ;;  %v6908_v13 = vpop.permute.xlu0 %1245  ;;  %v6910_v7 = vpop.permute.xlu2 %1160 }
 0x172   : > { %9242 = vst [vmem:[#allocation32_spill] sm:$0xff] %v6908_v13 }
 0x173   : > { %9243 = vst [vmem:[#allocation33_spill] sm:$0xff] %v6910_v7  ;;  %v2446_v7 = vld [vmem:[%s9206_s4 + $0x48] sm:$0xff] }
 0x174   : > { %3297 = vmatmul.bf16.gmra.mxu1 %v5224_v20  ;;  %v2443_v20 = vld [vmem:[%s9206_s4 + $0x30] sm:$0xff] }
 0x175   : > { %3342 = vmatmul.bf16.gmra.mxu2 %v5512_v15 }
 0x176   : > { %2511 = vperm.xlu1 %5998, %v2445_v11   ;;  %v1867_v13 = vpop.f32.mrf.mxu0  ;;  %v5846_v11 = vld [vmem:[%s9205_s3 + $0x15c] sm:$0xf0] }
 0x177   : > { %2626 = vperm.xlu0 %5997, %v2468_v50   ;;  %2516 = vperm.xlu2 %5999, %v2446_v7   ;;  %v2465_v7 = vld [vmem:[%s9206_s4 + $0xe0] sm:$0xff] }
 0x178   : > { %v6933_v34 = vpop.permute.xlu1 %1165  ;;  %v5543_v50 = vld [vmem:[%s9205_s3 + $0x380] sm:$0xf] }
 0x179   : > { %9244 = vst [vmem:[#allocation34_spill] sm:$0xff] %v6933_v34  ;;  %v6935_v59 = vpop.permute.xlu0 %1070  ;;  %v6937_v42 = vpop.permute.xlu2 %1045  ;;  %5051 = vmatmul.msk.bf16.gmra.mxu0 %vm1595_vm0, %v5760_v58  ;;  %v5255_v58 = vld [vmem:[%s9205_s3 + $0x140] sm:$0xf] }
 0x17a   : > { %9245 = vst [vmem:[#allocation35_spill] sm:$0xff] %v6935_v59  ;;  %v5256_v34 = vor.u32 %v5846_v11, %v5255_v58  ;;  %v2442_v58 = vld [vmem:[%s9206_s4 + $0x28] sm:$0xff] }
 0x17b   : > { %9246 = vst [vmem:[#allocation36_spill] sm:$0xff] %v6937_v42  ;;  %v5761_v42 = vld [vmem:[%s9203_s1 + $0xb8] sm:$0xff] }
 0x17e   : > { %2616 = vperm.xlu1 %5998, %v2466_v54   ;;  %v1869_v1 = vpop.f32.mrf.mxu0  ;;  %v5918_v54 = vld [vmem:[%s9205_s3 + $0x39c] sm:$0xf0] }
 0x17f   : > { %2611 = vperm.xlu0 %5997, %v2465_v7   ;;  %2501 = vperm.xlu2 %5999, %v2443_v20   ;;  %v2463_v7 = vld [vmem:[%s9206_s4 + $0xd0] sm:$0xff]  ;;  %v2444_v20 = vld [vmem:[%s9206_s4 + $0x38] sm:$0xff]  ;;  %v5544_v59 = vor.u32 %v5918_v54, %v5543_v50  ;;  %v5287_v50 = vld [vmem:[%s9205_s3 + $0x180] sm:$0xf] }
 0x180   : > { %v6949_v15 = vpop.permute.xlu1 %1240 }
 0x181   : > { %9247 = vst [vmem:[#allocation37_spill] sm:$0xff] %v6949_v15  ;;  %v6954_v24 = vpop.permute.xlu0 %1235  ;;  %v6956_v26 = vpop.permute.xlu2 %1150 }
 0x182   : > { %9248 = vst [vmem:[#allocation38_spill] sm:$0xff] %v6954_v24 }
 0x183   : > { %9249 = vst [vmem:[#allocation39_spill] sm:$0xff] %v6956_v26  ;;  %v2464_v26 = vld [vmem:[%s9206_s4 + $0xd8] sm:$0xff] }
 0x184   : > { %3302 = vmatmul.bf16.gmra.mxu1 %v5256_v34 }
 0x185   : > { %3347 = vmatmul.bf16.gmra.mxu2 %v5544_v59  ;;  %v2461_v59 = vld [vmem:[%s9206_s4 + $0xc0] sm:$0xff] }
 0x186   : > { %2601 = vperm.xlu1 %5998, %v2463_v7   ;;  %v1872_v15 = vpop.f32.mrf.mxu0 }
 0x187   : > { %2506 = vperm.xlu0 %5997, %v2444_v20   ;;  %2606 = vperm.xlu2 %5999, %v2464_v26   ;;  %v2441_v26 = vld [vmem:[%s9206_s4 + $0x20] sm:$0xff]  ;;  %v1873_v34 = vadd.f32 %v1872_v15, %v6352_v31 }
 0x188   : > { %v6979_v24 = vpop.permute.xlu1 %1155  ;;  %v5575_v31 = vld [vmem:[%s9205_s3 + $0x3c0] sm:$0xf] }
 0x189   : > { %9250 = vst [vmem:[#allocation40_spill] sm:$0xff] %v6979_v24  ;;  %v6981_v37 = vpop.permute.xlu0 %1060  ;;  %v6983_v4 = vpop.permute.xlu2 %1035  ;;  %5052 = vmatmul.msk.bf16.gmra.mxu0 %vm1595_vm0, %v5761_v42  ;;  %v5926_v15 = vld [vmem:[%s9205_s3 + $0x3dc] sm:$0xf0] }
 0x18a   : > { %9251 = vst [vmem:[#allocation41_spill] sm:$0xff] %v6981_v37 }
 0x18b   : > { %9252 = vst [vmem:[#allocation42_spill] sm:$0xff] %v6983_v4 }
 0x18e   : > { %2496 = vperm.xlu1 %5998, %v2442_v58   ;;  %v1874_v42 = vpop.f32.mrf.mxu0  ;;  %v5854_v58 = vld [vmem:[%s9205_s3 + $0x19c] sm:$0xf0] }
 0x18f   : > { %2491 = vperm.xlu0 %5997, %v2441_v26   ;;  %2591 = vperm.xlu2 %5999, %v2461_v59   ;;  %v1875_v20 = vadd.f32 %v1874_v42, %v6304_v9  ;;  %v1870_v26 = vadd.f32 %v1869_v1, %v6368_v43  ;;  %v2147_v59 = vmax.f32 %v1873_v34, 0.0  ;;  %v2439_v9 = vld [vmem:[%s9206_s4 + $0x10] sm:$0xff]  ;;  %v2462_v42 = vld [vmem:[%s9206_s4 + $0xc8] sm:$0xff]  ;;  %v5288_v37 = vor.u32 %v5854_v58, %v5287_v50  ;;  %v5762_v34 = vld [vmem:[%s9203_s1 + $0xc0] sm:$0xff] }
 0x190   : > { %v6996_v11 = vpop.permute.xlu1 %1230  ;;  %v1865_v43 = vadd.f32 %v6903_v33, %v6394_v0  ;;  %v1860_v0 = vadd.f32 %v6853_v39, %v6337_v25 }
 0x191   : > { %9253 = vst [vmem:[#allocation43_spill] sm:$0xff] %v6996_v11  ;;  %v7001_v54 = vpop.permute.xlu0 %1225  ;;  %v7003_v7 = vpop.permute.xlu2 %1140  ;;  %v2148_v24 = vmax.f32 %v1875_v20, 0.0  ;;  %v1868_v11 = vadd.f32 %v1867_v13, %v6373_v47  ;;  %v2146_v1 = vmax.f32 %v1870_v26, 0.0  ;;  %v1863_v47 = vadd.f32 %v6885_v8, %v6322_v17  ;;  %v2459_v17 = vld [vmem:[%s9206_s4 + $0xb0] sm:$0xff]  ;;  %v2437_v8 = vld [vmem:[%s9206_s4] sm:$0xff] }
 0x192   : > { %9254 = vst [vmem:[#allocation44_spill] sm:$0xff] %v7001_v54  ;;  %v5576_v54 = vor.u32 %v5926_v15, %v5575_v31  ;;  %v2144_v33 = vmax.f32 %v1865_v43, 0.0  ;;  %v2142_v39 = vmax.f32 %v1860_v0, 0.0  ;;  %v5763_v0 = vld [vmem:[%s9203_s1 + $0xc8] sm:$0xff] }
 0x193   : > { %9255 = vst [vmem:[#allocation45_spill] sm:$0xff] %v7003_v7  ;;  %v2440_v7 = vld [vmem:[%s9206_s4 + $0x18] sm:$0xff]  ;;  %v2260_v4 = vpack.c.bf16 %v2148_v24, %v2147_v59  ;;  %v2145_v13 = vmax.f32 %v1868_v11, 0.0  ;;  %v2143_v25 = vmax.f32 %v1863_v47, 0.0 }
 0x194   : > { %3307 = vmatmul.bf16.gmra.mxu1 %v5288_v37 }
 0x195   : > { %3352 = vmatmul.bf16.gmra.mxu2 %v5576_v54  ;;  %v2259_v37 = vpack.c.bf16 %v2146_v1, %v2145_v13  ;;  %v2460_v54 = vld [vmem:[%s9206_s4 + $0xb8] sm:$0xff] }
 0x196   : > { %2481 = vperm.xlu1 %5998, %v2439_v9   ;;  %v1877_v50 = vpop.f32.mrf.mxu0  ;;  %3358 = vmatpush.bf16.msrb.mxu2 %v2260_v4  ;;  %v1858_v4 = vadd.f32 %v6835_v22, %v6392_v62  ;;  %v5319_v22 = vld [vmem:[%s9205_s3 + $0x1c0] sm:$0xf] }
 0x197   : > { %2596 = vperm.xlu0 %5997, %v2462_v42   ;;  %2486 = vperm.xlu2 %5999, %v2440_v7   ;;  %v1878_v11 = vadd.f32 %v1877_v50, %v6637_v49  ;;  %v2258_v7 = vpack.c.bf16 %v2144_v33, %v2143_v25  ;;  %v5862_v49 = vld [vmem:[%s9205_s3 + $0x1dc] sm:$0xf0]  ;;  %v2438_v50 = vld [vmem:[%s9206_s4 + $0x8] sm:$0xff] }
 0x198   : > { %v7031_v20 = vpop.permute.xlu1 %1145  ;;  %v2141_v26 = vmax.f32 %v1858_v4, 0.0  ;;  %v5320_v47 = vor.u32 %v5862_v49, %v5319_v22  ;;  %v2455_v4 = vld [vmem:[%s9206_s4 + $0x90] sm:$0xff]  ;;  %v2453_v25 = vld [vmem:[%s9206_s4 + $0x80] sm:$0xff] }
 0x199   : > { %9256 = vst [vmem:[#allocation46_spill] sm:$0xff] %v7031_v20  ;;  %v7035_v24 = vpop.permute.xlu0 %1050  ;;  %v7037_v58 = vpop.permute.xlu2 %1025  ;;  %5053 = vmatmul.msk.bf16.gmra.mxu0 %vm1595_vm0, %v5762_v34  ;;  %v2149_v42 = vmax.f32 %v1878_v11, 0.0  ;;  %v2457_v34 = vld [vmem:[%s9206_s4 + $0xa0] sm:$0xff] }
 0x19a   : > { %9257 = vst [vmem:[#allocation47_spill] sm:$0xff] %v7035_v24  ;;  %3359 = vmatpush.bf16.msrb.mxu2 %v2259_v37  ;;  %v2257_v1 = vpack.c.bf16 %v2142_v39, %v2141_v26  ;;  %v5097_v22 = vld [vmem:[%s9205_s3 + $0x20] sm:$0xf0] }
 0x19e   : > { %2586 = vperm.xlu1 %5998, %v2460_v54   ;;  %v1879_v15 = vpop.f32.mrf.mxu0  ;;  %3360 = vmatpush.bf16.msrb.mxu2 %v2258_v7  ;;  %v5351_v7 = vld [vmem:[%s9205_s3 + $0x200] sm:$0xf] }
 0x19f   : > { %2581 = vperm.xlu0 %5997, %v2459_v17   ;;  %2471 = vperm.xlu2 %5999, %v2437_v8   ;;  %v1880_v62 = vadd.f32 %v1879_v15, %v6735_v52  ;;  %v2458_v52 = vld [vmem:[%s9206_s4 + $0xa8] sm:$0xff]  ;;  %v2456_v8 = vld [vmem:[%s9206_s4 + $0x98] sm:$0xff] }
 0x1a0   : > { %v7054_v31 = vpop.permute.xlu1 %1220 }
 0x1a1   : > { %9258 = vst [vmem:[#allocation48_spill] sm:$0xff] %v7054_v31  ;;  %v7056_v59 = vpop.permute.xlu0 %1215  ;;  %v7058_v9 = vpop.permute.xlu2 %1130  ;;  %v2150_v43 = vmax.f32 %v1880_v62, 0.0  ;;  %v5802_v62 = vld [vmem:[%s9205_s3 + $0x4] sm:$0xf] }
 0x1a2   : > { %9259 = vst [vmem:[#allocation49_spill] sm:$0xff] %v7056_v59  ;;  %3361 = vmatpush.bf16.msrb.mxu2 %v2257_v1 }
 0x1a3   : > { %9260 = vst [vmem:[#allocation50_spill] sm:$0xff] %v7058_v9  ;;  %v7076_v13 = vpack.c.bf16 %v2150_v43, %v2149_v42  ;;  %v4076_v43 = vld [vmem:[%s9208_s6 + $0x78] sm:$0xff]  ;;  %v4063_v9 = vld [vmem:[%s9208_s6 + $0x10] sm:$0xff] }
 0x1a4   : > { %3312 = vmatmul.bf16.gmra.mxu1 %v5320_v47 }
 0x1a6   : > { %2571 = vperm.xlu1 %5998, %v2457_v34   ;;  %v1882_v37 = vpop.f32.mrf.mxu0  ;;  %3362 = vmatpush.bf16.msrb.mxu2 %v6828_v44  ;;  %v5100_v34 = vor.u32 %v5802_v62, %v5097_v22 }
 0x1a7   : > { %2476 = vperm.xlu0 %5997, %v2438_v50   ;;  %2576 = vperm.xlu2 %5999, %v2458_v52   ;;  %v1883_v39 = vadd.f32 %v1882_v37, %v6596_v14  ;;  %v5870_v14 = vld [vmem:[%s9205_s3 + $0x21c] sm:$0xf0]  ;;  %v5764_v52 = vld [vmem:[%s9203_s1 + $0xd0] sm:$0xff] }
 0x1a8   : > { %v7081_v33 = vpop.permute.xlu1 %1135  ;;  %v5352_v1 = vor.u32 %v5870_v14, %v5351_v7 }
 0x1a9   : > { %9261 = vst [vmem:[#allocation51_spill] sm:$0xff] %v7081_v33  ;;  %v7083_v54 = vpop.permute.xlu0 %1040  ;;  %v7085_v17 = vpop.permute.xlu2 %1115  ;;  %5054 = vmatmul.msk.bf16.gmra.mxu0 %vm1595_vm0, %v5763_v0  ;;  %v2151_v49 = vmax.f32 %v1883_v39, 0.0  ;;  %v4073_v39 = vld [vmem:[%s9208_s6 + $0x60] sm:$0xff] }
 0x1aa   : > { %9262 = vst [vmem:[#allocation52_spill] sm:$0xff] %v7085_v17  ;;  %3363 = vmatpush.bf16.msrb.mxu2 %v6778_v57 }
 0x1ae   : > { %2566 = vperm.xlu1 %5998, %v2456_v8   ;;  %v1884_v11 = vpop.f32.mrf.mxu0  ;;  %3364 = vmatpush.bf16.msrb.mxu2 %v6728_v45  ;;  %v4075_v45 = vld [vmem:[%s9208_s6 + $0x70] sm:$0xff] }
 0x1af   : > { %2561 = vperm.xlu0 %5997, %v2455_v4   ;;  %2551 = vperm.xlu2 %5999, %v2453_v25   ;;  %v1885_v57 = vadd.f32 %v1884_v11, %v6679_v60  ;;  %v2454_v60 = vld [vmem:[%s9206_s4 + $0x88] sm:$0xff]  ;;  %v4091_v25 = vld [vmem:[%s9208_s6 + $0xf0] sm:$0xff] }
 0x1b0   : > { %v7100_v44 = vpop.permute.xlu1 %1210 }
 0x1b1   : > { %9263 = vst [vmem:[#allocation53_spill] sm:$0xff] %v7100_v44  ;;  %v7105_v15 = vpop.permute.xlu0 %1205  ;;  %v7107_v26 = vpop.permute.xlu2 %1190  ;;  %v2152_v42 = vmax.f32 %v1885_v57, 0.0 }
 0x1b2   : > { %9264 = vst [vmem:[#allocation54_spill] sm:$0xff] %v7105_v15  ;;  %3365 = vmatpush.bf16.msrb.mxu2 %v6670_v38  ;;  %v4092_v38 = vld [vmem:[%s9208_s6 + $0xf8] sm:$0xff] }
 0x1b3   : > { %9265 = vst [vmem:[#allocation55_spill] sm:$0xff] %v7107_v26  ;;  %v7130_v50 = vpack.c.bf16 %v2152_v42, %v2151_v49  ;;  %v5810_v49 = vld [vmem:[%s9205_s3 + $0x44] sm:$0xf] }
 0x1b4   : > { %3317 = vmatmul.bf16.gmra.mxu1 %v5352_v1  ;;  %v5129_v42 = vld [vmem:[%s9205_s3 + $0x60] sm:$0xf0]  ;;  %v4090_v1 = vld [vmem:[%s9208_s6 + $0xe8] sm:$0xff] }
 0x1b5   : > { %3366 = vmatmul.bf16.vlgmr.msrb.gmra.mxu2 %v5100_v34  ;;  %v5132_v34 = vor.u32 %v5810_v49, %v5129_v42  ;;  %v4071_v49 = vld [vmem:[%s9208_s6 + $0x50] sm:$0xff] }
 0x1b6   : > { %4165 = vperm.xlu1 %5998, %v4075_v45   ;;  %v1887_v0 = vpop.f32.mrf.mxu0  ;;  %v4087_v42 = vld [vmem:[%s9208_s6 + $0xd0] sm:$0xff] }
 0x1b7   : > { %2556 = vperm.xlu0 %5997, %v2454_v60   ;;  %4170 = vperm.xlu2 %5999, %v4076_v43   ;;  %v1888_v11 = vadd.f32 %v1887_v0, %v6562_v12  ;;  %v4089_v43 = vld [vmem:[%s9208_s6 + $0xe0] sm:$0xff]  ;;  %v5765_v0 = vld [vmem:[%s9203_s1 + $0xd8] sm:$0xff] }
 0x1b8   : > { %v7135_v47 = vpop.permute.xlu1 %1125  ;;  %v7141_v4 = vpop.f32.mrf.mxu2 }
 0x1b9   : > { %9266 = vst [vmem:[#allocation56_spill] sm:$0xff] %v7135_v47  ;;  %v7137_v37 = vpop.permute.xlu0 %1030  ;;  %v7139_v8 = vpop.permute.xlu2 %2541  ;;  %5055 = vmatmul.msk.bf16.gmra.mxu0 %vm1595_vm0, %v5764_v52  ;;  %v2153_v12 = vmax.f32 %v1888_v11, 0.0 }
 0x1ba   : > { %9267 = vst [vmem:[#allocation57_spill] sm:$0xff] %v7141_v4 }
 0x1be   : > { %4250 = vperm.xlu1 %5998, %v4092_v38   ;;  %v1889_v57 = vpop.f32.mrf.mxu0 }
 0x1bf   : > { %4245 = vperm.xlu0 %5997, %v4091_v25   ;;  %4155 = vperm.xlu2 %5999, %v4073_v39   ;;  %v1890_v22 = vadd.f32 %v1889_v57, %v6635_v35  ;;  %v4074_v35 = vld [vmem:[%s9208_s6 + $0x68] sm:$0xff] }
 0x1c0   : > { %v7154_v7 = vpop.permute.xlu1 %1200  ;;  %v7167_v60 = vpop.f32.mrf.mxu2 }
 0x1c1   : > { %9268 = vst [vmem:[#allocation58_spill] sm:$0xff] %v7154_v7  ;;  %v7156_v14 = vpop.permute.xlu0 %1195  ;;  %v7158_v62 = vpop.permute.xlu2 %2536  ;;  %v2154_v45 = vmax.f32 %v1890_v22, 0.0  ;;  %v4072_v22 = vld [vmem:[%s9208_s6 + $0x58] sm:$0xff] }
 0x1c2   : > { %9269 = vst [vmem:[#allocation59_spill] sm:$0xff] %v7156_v14 }
 0x1c3   : > { %9270 = vst [vmem:[#allocation60_spill] sm:$0xff] %v7158_v62  ;;  %v7178_v52 = vpack.c.bf16 %v2154_v45, %v2153_v12 }
 0x1c4   : > { %9271 = vst [vmem:[#allocation61_spill] sm:$0xff] %v7167_v60 }
 0x1c5   : > { %3371 = vmatmul.bf16.gmra.mxu2 %v5132_v34 }
 0x1c6   : > { %4235 = vperm.xlu1 %5998, %v4089_v43   ;;  %v1892_v25 = vpop.f32.mrf.mxu0 }
 0x1c7   : > { %4160 = vperm.xlu0 %5997, %v4074_v35   ;;  %4240 = vperm.xlu2 %5999, %v4090_v1   ;;  %v1893_v12 = vadd.f32 %v1892_v25, %v6524_v30 }
 0x1c8   : > { %v7183_v38 = vpop.permute.xlu1 %1185  ;;  %v7189_v57 = vpop.f32.mrf.mxu2 }
 0x1c9   : > { %9272 = vst [vmem:[#allocation62_spill] sm:$0xff] %v7183_v38  ;;  %v7185_v39 = vpop.permute.xlu0 %1120  ;;  %v7187_v11 = vpop.permute.xlu2 %2621  ;;  %5056 = vmatmul.msk.bf16.gmra.mxu0 %vm1595_vm0, %v5765_v0  ;;  %v5818_v0 = vld [vmem:[%s9205_s3 + $0x84] sm:$0xf]  ;;  %v2155_v30 = vmax.f32 %v1893_v12, 0.0 }
 0x1ca   : > { %9273 = vst [vmem:[#allocation63_spill] sm:$0xff] %v7185_v39  ;;  %v5766_v12 = vld [vmem:[%s9203_s1 + $0xe0] sm:$0xff] }
 0x1cb   : > { %9274 = vst [vmem:[#allocation64_spill] sm:$0xff] %v7189_v57 }
 0x1ce   : > { %4150 = vperm.xlu1 %5998, %v4072_v22   ;;  %v1894_v43 = vpop.f32.mrf.mxu0  ;;  %v5161_v22 = vld [vmem:[%s9205_s3 + $0xa0] sm:$0xf0] }
 0x1cf   : > { %4145 = vperm.xlu0 %5997, %v4071_v49   ;;  %4225 = vperm.xlu2 %5999, %v4087_v42   ;;  %v1895_v34 = vadd.f32 %v1894_v43, %v6594_v21  ;;  %v4069_v42 = vld [vmem:[%s9208_s6 + $0x40] sm:$0xff]  ;;  %v4088_v21 = vld [vmem:[%s9208_s6 + $0xd8] sm:$0xff]  ;;  %v4070_v43 = vld [vmem:[%s9208_s6 + $0x48] sm:$0xff]  ;;  %v5164_v60 = vor.u32 %v5818_v0, %v5161_v22 }
 0x1d0   : > { %v7202_v45 = vpop.permute.xlu1 %1110  ;;  %v7215_v49 = vpop.f32.mrf.mxu2  ;;  %v4086_v0 = vld [vmem:[%s9208_s6 + $0xc8] sm:$0xff]  ;;  %v4067_v22 = vld [vmem:[%s9208_s6 + $0x30] sm:$0xff] }
 0x1d1   : > { %9275 = vst [vmem:[#allocation65_spill] sm:$0xff] %v7202_v45  ;;  %v7204_v35 = vpop.permute.xlu0 %1105  ;;  %v7206_v1 = vpop.permute.xlu2 %2516  ;;  %v2156_v25 = vmax.f32 %v1895_v34, 0.0 }
 0x1d2   : > { %9276 = vst [vmem:[#allocation66_spill] sm:$0xff] %v7204_v35  ;;  %v4080_v35 = vld [vmem:[%s9208_s6 + $0x98] sm:$0xff] }
 0x1d3   : > { %9277 = vst [vmem:[#allocation67_spill] sm:$0xff] %v7206_v1  ;;  %v7226_v62 = vpack.c.bf16 %v2156_v25, %v2155_v30 }
 0x1d4   : > { %9278 = vst [vmem:[#allocation68_spill] sm:$0xff] %v7215_v49 }
 0x1d5   : > { %3376 = vmatmul.bf16.gmra.mxu2 %v5164_v60  ;;  %v4085_v60 = vld [vmem:[%s9208_s6 + $0xc0] sm:$0xff] }
 0x1d6   : > { %4135 = vperm.xlu1 %5998, %v4069_v42   ;;  %v7233_v1 = vpop.f32.mrf.mxu0 }
 0x1d7   : > { %4230 = vperm.xlu0 %5997, %v4088_v21   ;;  %4140 = vperm.xlu2 %5999, %v4070_v43   ;;  %v5826_v43 = vld [vmem:[%s9205_s3 + $0xc4] sm:$0xf] }
 0x1d8   : > { %v7231_v34 = vpop.permute.xlu1 %2531  ;;  %v7239_v7 = vpop.f32.mrf.mxu2 }
 0x1d9   : > { %v7235_v49 = vpop.permute.xlu0 %2546  ;;  %v7237_v38 = vpop.permute.xlu2 %2501  ;;  %5057 = vmatmul.msk.bf16.gmra.mxu0 %vm1595_vm0, %v5766_v12  ;;  %v5193_v12 = vld [vmem:[%s9205_s3 + $0xe0] sm:$0xf0] }
 0x1da   : > { %9279 = vst [vmem:[#allocation69_spill] sm:$0xff] %v7235_v49 }
 0x1de   : > { %4220 = vperm.xlu1 %5998, %v4086_v0   ;;  %v7253_v25 = vpop.f32.mrf.mxu0  ;;  %v4083_v0 = vld [vmem:[%s9208_s6 + $0xb0] sm:$0xff] }
 0x1df   : > { %4215 = vperm.xlu0 %5997, %v4085_v60   ;;  %4125 = vperm.xlu2 %5999, %v4067_v22   ;;  %v4068_v60 = vld [vmem:[%s9208_s6 + $0x38] sm:$0xff] }
 0x1e0   : > { %v7251_v30 = vpop.permute.xlu1 %2526  ;;  %v7265_v49 = vpop.f32.mrf.mxu2  ;;  %v4084_v22 = vld [vmem:[%s9208_s6 + $0xb8] sm:$0xff] }
 0x1e1   : > { %9280 = vst [vmem:[#allocation70_spill] sm:$0xff] %v7251_v30  ;;  %v7255_v42 = vpop.permute.xlu0 %2521  ;;  %v7257_v21 = vpop.permute.xlu2 %2606  ;;  %v5196_v30 = vor.u32 %v5826_v43, %v5193_v12  ;;  %v4066_v43 = vld [vmem:[%s9208_s6 + $0x28] sm:$0xff] }
 0x1e2   : > { %9281 = vst [vmem:[#allocation71_spill] sm:$0xff] %v7257_v21  ;;  %v5767_v21 = vld [vmem:[%s9203_s1 + $0xe8] sm:$0xff] }
 0x1e3   : > { %9282 = vst [vmem:[#allocation72_spill] sm:$0xff] %v7265_v49 }
 0x1e5   : > { %3381 = vmatmul.bf16.gmra.mxu2 %v5196_v30  ;;  %v4065_v30 = vld [vmem:[%s9208_s6 + $0x20] sm:$0xff] }
 0x1e6   : > { %4205 = vperm.xlu1 %5998, %v4083_v0   ;;  %v7281_v26 = vpop.f32.mrf.mxu0  ;;  %v4081_v0 = vld [vmem:[%s9208_s6 + $0xa0] sm:$0xff] }
 0x1e7   : > { %4130 = vperm.xlu0 %5997, %v4068_v60   ;;  %4210 = vperm.xlu2 %5999, %v4084_v22  }
 0x1e8   : > { %v7279_v49 = vpop.permute.xlu1 %2511  ;;  %v3338_v33 = vpop.f32.mrf.mxu2 }
 0x1e9   : > { %v7283_v14 = vpop.permute.xlu0 %2626  ;;  %v2592_v20 = vpop.permute.xlu2 %2591  ;;  %5058 = vmatmul.msk.bf16.gmra.mxu0 %vm1595_vm0, %v5767_v21 }
 0x1ea   : > { %9283 = vst [vmem:[#allocation73_spill] sm:$0xff] %v7283_v14  ;;  %v7289_v12 = vadd.f32 %v3338_v33, %v2592_v20  ;;  %v5834_v20 = vld [vmem:[%s9205_s3 + $0x104] sm:$0xf] }
 0x1eb   : > { %v5225_v33 = vld [vmem:[%s9205_s3 + $0x120] sm:$0xf0] }
 0x1ee   : > { %4120 = vperm.xlu1 %5998, %v4066_v43   ;;  %v1904_v21 = vpop.f32.mrf.mxu0  ;;  %v4082_v43 = vld [vmem:[%s9208_s6 + $0xa8] sm:$0xff] }
 0x1ef   : > { %4115 = vperm.xlu0 %5997, %v4065_v30   ;;  %4195 = vperm.xlu2 %5999, %v4081_v0   ;;  %v4064_v30 = vld [vmem:[%s9208_s6 + $0x18] sm:$0xff]  ;;  %v5228_v0 = vor.u32 %v5834_v20, %v5225_v33  ;;  %v4061_v33 = vld [vmem:[%s9208_s6] sm:$0xff] }
 0x1f0   : > { %v7297_v60 = vpop.permute.xlu1 %2616  ;;  %v3340_v14 = vpop.f32.mrf.mxu2 }
 0x1f1   : > { %9284 = vst [vmem:[#allocation74_spill] sm:$0xff] %v7297_v60  ;;  %v2612_v22 = vpop.permute.xlu0 %2611  ;;  %v5768_v60 = vld [vmem:[%s9203_s1 + $0xf0] sm:$0xff] }
 0x1f5   : > { %3386 = vmatmul.bf16.gmra.mxu2 %v5228_v0  ;;  %v4077_v0 = vld [vmem:[%s9208_s6 + $0x80] sm:$0xff] }
 0x1f6   : > { %4105 = vperm.xlu1 %5998, %v4063_v9   ;;  %v1907_v47 = vpop.f32.mrf.mxu0  ;;  %v4079_v9 = vld [vmem:[%s9208_s6 + $0x90] sm:$0xff] }
 0x1f7   : > { %4200 = vperm.xlu0 %5997, %v4082_v43   ;;  %4110 = vperm.xlu2 %5999, %v4064_v30  }
 0x1f8   : > { %v2602_v39 = vpop.permute.xlu1 %2601  ;;  %v3343_v45 = vpop.f32.mrf.mxu2 }
 0x1f9   : > { %v7317_v17 = vpop.permute.xlu0 %2506  ;;  %5059 = vmatmul.msk.bf16.gmra.mxu0 %vm1595_vm0, %v5768_v60  ;;  %v7323_v20 = vadd.f32 %v3343_v45, %v2602_v39  ;;  %v5842_v60 = vld [vmem:[%s9205_s3 + $0x144] sm:$0xf] }
 0x1fa   : > { %v5257_v39 = vld [vmem:[%s9205_s3 + $0x160] sm:$0xf0] }
 0x1fe   : > { %4190 = vperm.xlu1 %5998, %v4080_v35   ;;  %v1909_v43 = vpop.f32.mrf.mxu0  ;;  %v4062_v35 = vld [vmem:[%s9208_s6 + $0x8] sm:$0xff] }
 0x1ff   : > { %4185 = vperm.xlu0 %5997, %v4079_v9   ;;  %4095 = vperm.xlu2 %5999, %v4061_v33   ;;  %v4078_v9 = vld [vmem:[%s9208_s6 + $0x88] sm:$0xff]  ;;  %v5260_v33 = vor.u32 %v5842_v60, %v5257_v39  ;;  %v4640_v60 = vld [vmem:[%s9210_s8] sm:$0xff] }
 0x200   : > { %v7339_v45 = vpop.f32.mrf.mxu2 }
 0x201   : > { %v7331_v30 = vpop.permute.xlu0 %2491  ;;  %9285 = vst [vmem:[#allocation75_spill] sm:$0xff] %v7339_v45  ;;  %v5769_v45 = vld [vmem:[%s9203_s1 + $0xf8] sm:$0xff] }
 0x205   : > { %3391 = vmatmul.bf16.gmra.mxu2 %v5260_v33 }
 0x206   : > { %4175 = vperm.xlu1 %5998, %v4077_v0   ;;  %v1912_v57 = vpop.f32.mrf.mxu0 }
 0x207   : > { %4100 = vperm.xlu0 %5997, %v4062_v35   ;;  %4180 = vperm.xlu2 %5999, %v4078_v9   ;;  %v1913_v39 = vadd.f32 %v1912_v57, %v6396_v3  ;;  %v1910_v35 = vadd.f32 %v1909_v43, %v6416_v18  ;;  %v1908_v3 = vadd.f32 %v1907_v47, %v6476_v53 }
 0x208   : > { %v3348_v15 = vpop.f32.mrf.mxu2  ;;  %v1905_v18 = vadd.f32 %v1904_v21, %v6522_v27  ;;  %v1900_v53 = vadd.f32 %v7253_v25, %v6560_v5  ;;  %v1898_v27 = vadd.f32 %v7233_v1, %v6482_v61  ;;  %v5858_v61 = vld [vmem:[%s9205_s3 + $0x1c4] sm:$0xf] }
 0x209   : > { %v2597_v4 = vpop.permute.xlu0 %2596  ;;  %5060 = vmatmul.msk.bf16.gmra.mxu0 %vm1595_vm0, %v5769_v45  ;;  %v7356_v44 = vadd.f32 %v3348_v15, %v2612_v22  ;;  %v5289_v15 = vld [vmem:[%s9205_s3 + $0x1a0] sm:$0xf0]  ;;  %v2163_v57 = vmax.f32 %v1913_v39, 0.0  ;;  %v2162_v43 = vmax.f32 %v1910_v35, 0.0 }
 0x20a   : > { %v7353_v24 = vadd.f32 %v3340_v14, %v2597_v4  ;;  %v5850_v4 = vld [vmem:[%s9205_s3 + $0x184] sm:$0xf]  ;;  %v2160_v47 = vmax.f32 %v1905_v18, 0.0  ;;  %v2157_v35 = vmax.f32 %v1898_v27, 0.0 }
 0x20b   : > { %v5292_v45 = vor.u32 %v5850_v4, %v5289_v15  ;;  %v5321_v1 = vld [vmem:[%s9205_s3 + $0x1e0] sm:$0xf0] }
 0x20c   : > { %9286 = vst [vmem:[#allocation76_spill] sm:$0xff] %v7353_v24  ;;  %v2161_v24 = vmax.f32 %v1908_v3, 0.0 }
 0x20e   : > { %v1914_v0 = vpop.f32.mrf.mxu0  ;;  %v2267_v39 = vpack.c.bf16 %v2162_v43, %v2161_v24 }
 0x20f   : > { %4643 = vperm.xlu0 %5997, %v4640_v60   ;;  %v1915_v33 = vadd.f32 %v1914_v0, %v6480_v56  ;;  %v3278_v60 = vpop.f32.mrf.mxu1  ;;  %v1903_v0 = vadd.f32 %v7281_v26, %v6438_v29  ;;  %v2158_v29 = vmax.f32 %v1900_v53, 0.0 }
 0x211   : > { %v2582_v9 = vpop.permute.xlu0 %2581  ;;  %v2164_v22 = vmax.f32 %v1915_v33, 0.0  ;;  %v2159_v21 = vmax.f32 %v1903_v0, 0.0  ;;  %v7385_v33 = vpop.f32.mrf.mxu2  ;;  %v2265_v24 = vpack.c.bf16 %v2158_v29, %v2157_v35  ;;  %v5772_v35 = vld [vmem:[%s9203_s1 + $0x110] sm:$0xff] }
 0x212   : > { %v7371_v14 = vadd.f32 %v7239_v7, %v2582_v9  ;;  %v5770_v7 = vld [vmem:[%s9203_s1 + $0x100] sm:$0xff]  ;;  %9287 = vst [vmem:[#allocation77_spill] sm:$0xff] %v7385_v33 }
 0x213   : > { %v2268_v56 = vpack.c.bf16 %v2164_v22, %v2163_v57  ;;  %v2266_v26 = vpack.c.bf16 %v2160_v47, %v2159_v21  ;;  %v5324_v22 = vor.u32 %v5858_v61, %v5321_v1 }
 0x215   : > { %3447 = vmatpush.bf16.msrb.mxu3 %v2268_v56  ;;  %3396 = vmatmul.bf16.gmra.mxu2 %v5292_v45  ;;  %v7407_v56 = vpop.permute.xlu2 %2486 }
 0x216   : > { %v1917_v9 = vpop.f32.mrf.mxu0 }
 0x217   : > { %v1918_v4 = vadd.f32 %v1917_v9, %v6805_v28  ;;  %v7388_v3 = vpop.f32.mrf.mxu1 }
 0x219   : > { %5061 = vmatmul.msk.bf16.gmra.mxu0 %vm1595_vm0, %v5770_v7  ;;  %3448 = vmatpush.bf16.msrb.mxu3 %v2267_v39  ;;  %v2165_v25 = vmax.f32 %v1918_v4, 0.0  ;;  %v7403_v18 = vpop.f32.mrf.mxu2  ;;  %v5807_v7 = vld [vmem:[%s9205_s3 + $0x24] sm:$0xf0] }
 0x21d   : > { %3449 = vmatpush.bf16.msrb.mxu3 %v2266_v26 }
 0x21e   : > { %v1919_v15 = vpop.f32.mrf.mxu0 }
 0x21f   : > { %v1920_v5 = vadd.f32 %v1919_v15, %v6800_v36  ;;  %v5771_v36 = vld [vmem:[%s9203_s1 + $0x108] sm:$0xff]  ;;  %v3283_v43 = vpop.f32.mrf.mxu1 }
 0x221   : > { %v2166_v57 = vmax.f32 %v1920_v5, 0.0  ;;  %3450 = vmatpush.bf16.msrb.mxu3 %v2265_v24  ;;  %v7424_v47 = vpop.f32.mrf.mxu2 }
 0x222   : > { %9288 = vst [vmem:[#allocation78_spill] sm:$0xff] %v7424_v47 }
 0x223   : > { %v7397_v28 = vpack.c.bf16 %v2166_v57, %v2165_v25  ;;  %v5135_v25 = vld [vmem:[%s9205_s3 + $0x48] sm:$0xf] }
 0x224   : > { %v5815_v57 = vld [vmem:[%s9205_s3 + $0x64] sm:$0xf0] }
 0x225   : > { %3451 = vmatpush.bf16.msrb.mxu3 %v7226_v62  ;;  %3401 = vmatmul.bf16.gmra.mxu2 %v5324_v22  ;;  %v5103_v62 = vld [vmem:[%s9205_s3 + $0x8] sm:$0xf] }
 0x226   : > { %v1922_v45 = vpop.f32.mrf.mxu0 }
 0x227   : > { %v1923_v0 = vadd.f32 %v1922_v45, %v6681_v51  ;;  %v5353_v51 = vld [vmem:[%s9205_s3 + $0x220] sm:$0xf0]  ;;  %v7427_v29 = vpop.f32.mrf.mxu1 }
 0x228   : > { %v5385_v45 = vld [vmem:[%s9205_s3 + $0x260] sm:$0xf0] }
 0x229   : > { %5062 = vmatmul.msk.bf16.gmra.mxu0 %vm1595_vm0, %v5771_v36  ;;  %3452 = vmatpush.bf16.msrb.mxu3 %v7178_v52  ;;  %v5866_v52 = vld [vmem:[%s9205_s3 + $0x204] sm:$0xf]  ;;  %v2167_v39 = vmax.f32 %v1923_v0, 0.0  ;;  %v7453_v0 = vpop.f32.mrf.mxu3 }
 0x22a   : > { %v5356_v21 = vor.u32 %v5866_v52, %v5353_v51  ;;  %v5874_v36 = vld [vmem:[%s9205_s3 + $0x244] sm:$0xf]  ;;  %9289 = vst [vmem:[#allocation79_spill] sm:$0xff] %v7453_v0  ;;  %v5773_v51 = vld [vmem:[%s9203_s1 + $0x118] sm:$0xff] }
 0x22d   : > { %3453 = vmatpush.bf16.msrb.mxu3 %v7130_v50  ;;  %v5104_v50 = vor.u32 %v5807_v7, %v5103_v62 }
 0x22e   : > { %v1924_v9 = vpop.f32.mrf.mxu0 }
 0x22f   : > { %v1925_v53 = vadd.f32 %v1924_v9, %v6785_v10  ;;  %v2472_v10 = vpop.permute.xlu2 %2471  ;;  %v3288_v61 = vpop.f32.mrf.mxu1 }
 0x230   : > { %v3279_v15 = vadd.f32 %v3278_v60, %v2472_v10 }
 0x231   : > { %v2168_v27 = vmax.f32 %v1925_v53, 0.0  ;;  %3454 = vmatpush.bf16.msrb.mxu3 %v7076_v13  ;;  %v7437_v13 = vpop.permute.xlu1 %2496  ;;  %v5388_v53 = vor.u32 %v5874_v36, %v5385_v45 }
 0x233   : > { %v7429_v26 = vpack.c.bf16 %v2168_v27, %v2167_v39 }
 0x234   : > { %3455 = vmatmul.bf16.vlgmr.msrb.gmra.mxu3 %v5104_v50 }
 0x235   : > { %3406 = vmatmul.bf16.gmra.mxu2 %v5356_v21 }
 0x236   : > { %v1927_v4 = vpop.f32.mrf.mxu0 }
 0x237   : > { %v1928_v1 = vadd.f32 %v1927_v4, %v6733_v41  ;;  %v5136_v41 = vor.u32 %v5815_v57, %v5135_v25  ;;  %v7462_v39 = vpop.f32.mrf.mxu1  ;;  %v5882_v25 = vld [vmem:[%s9205_s3 + $0x284] sm:$0xf] }
 0x238   : > { %v3367_v5 = vpop.f32.mrf.mxu2  ;;  %v5417_v57 = vld [vmem:[%s9205_s3 + $0x2a0] sm:$0xf0] }
 0x239   : > { %5063 = vmatmul.msk.bf16.gmra.mxu0 %vm1595_vm0, %v5772_v35  ;;  %v7435_v24 = vadd.f32 %v3367_v5, %v3279_v15  ;;  %v2169_v62 = vmax.f32 %v1928_v1, 0.0  ;;  %v7467_v35 = vpop.f32.mrf.mxu3  ;;  %v5167_v15 = vld [vmem:[%s9205_s3 + $0x88] sm:$0xf] }
 0x23a   : > { %9290 = vst [vmem:[#allocation80_spill] sm:$0xff] %v7467_v35  ;;  %v5823_v5 = vld [vmem:[%s9205_s3 + $0xa4] sm:$0xf0] }
 0x23e   : > { %v1929_v22 = vpop.f32.mrf.mxu0 }
 0x23f   : > { %v1930_v60 = vadd.f32 %v1929_v22, %v6658_v2  ;;  %v2482_v2 = vpop.permute.xlu1 %2481  ;;  %v3293_v22 = vpop.f32.mrf.mxu1 }
 0x240   : > { %v7455_v9 = vpop.f32.mrf.mxu2  ;;  %v3284_v27 = vadd.f32 %v3283_v43, %v2482_v2  ;;  %v3289_v2 = vadd.f32 %v3288_v61, %v7331_v30  ;;  %v5890_v30 = vld [vmem:[%s9205_s3 + $0x2c4] sm:$0xf] }
 0x241   : > { %v2170_v7 = vmax.f32 %v1930_v60, 0.0  ;;  %v5449_v61 = vld [vmem:[%s9205_s3 + $0x2e0] sm:$0xf0] }
 0x243   : > { %v7457_v52 = vpack.c.bf16 %v2170_v7, %v2169_v62  ;;  %v7487_v7 = vpop.f32.mrf.mxu3 }
 0x244   : > { %3460 = vmatmul.bf16.gmra.mxu3 %v5136_v41  ;;  %v5420_v41 = vor.u32 %v5882_v25, %v5417_v57  ;;  %9291 = vst [vmem:[#allocation81_spill] sm:$0xff] %v7487_v7  ;;  %v5452_v25 = vor.u32 %v5890_v30, %v5449_v61 }
 0x245   : > { %3411 = vmatmul.bf16.gmra.mxu2 %v5388_v53 }
 0x246   : > { %v1932_v50 = vpop.f32.mrf.mxu0 }
 0x247   : > { %v1933_v4 = vadd.f32 %v1932_v50, %v6675_v16  ;;  %v5168_v16 = vor.u32 %v5823_v5, %v5167_v15 }
 0x248   : > { %v3372_v21 = vpop.f32.mrf.mxu2 }
 0x249   : > { %5064 = vmatmul.msk.bf16.gmra.mxu0 %vm1595_vm0, %v5773_v51  ;;  %v7465_v10 = vadd.f32 %v3372_v21, %v3284_v27  ;;  %v2171_v60 = vmax.f32 %v1933_v4, 0.0  ;;  %v7498_v27 = vpop.f32.mrf.mxu1  ;;  %v5199_v21 = vld [vmem:[%s9205_s3 + $0xc8] sm:$0xf] }
 0x24a   : > { %v5831_v4 = vld [vmem:[%s9205_s3 + $0xe4] sm:$0xf0] }
 0x24b   : > { %v7508_v5 = vpop.f32.mrf.mxu3 }
 0x24c   : > { %9292 = vst [vmem:[#allocation82_spill] sm:$0xff] %v7508_v5 }
 0x24e   : > { %v1934_v1 = vpop.f32.mrf.mxu0 }
 0x24f   : > { %v1935_v43 = vadd.f32 %v1934_v1, %v6613_v6  ;;  %v5774_v6 = vld [vmem:[%s9203_s1 + $0x120] sm:$0xff]  ;;  %v5200_v1 = vor.u32 %v5831_v4, %v5199_v21  ;;  %v5839_v21 = vld [vmem:[%s9205_s3 + $0x124] sm:$0xf0] }
 0x250   : > { %v7483_v45 = vpop.f32.mrf.mxu2 }
 0x251   : > { %v2172_v36 = vmax.f32 %v1935_v43, 0.0  ;;  %v3298_v57 = vpop.f32.mrf.mxu1 }
 0x253   : > { %v7485_v62 = vpack.c.bf16 %v2172_v36, %v2171_v60  ;;  %v3294_v36 = vadd.f32 %v3293_v22, %v7237_v38  ;;  %v5898_v38 = vld [vmem:[%s9205_s3 + $0x304] sm:$0xf] }
 0x254   : > { %3465 = vmatmul.bf16.gmra.mxu3 %v5168_v16  ;;  %v5775_v16 = vld [vmem:[%s9203_s1 + $0x128] sm:$0xff]  ;;  %v5481_v22 = vld [vmem:[%s9205_s3 + $0x320] sm:$0xf0] }
 0x255   : > { %3416 = vmatmul.bf16.gmra.mxu2 %v5420_v41  ;;  %v7524_v41 = vpop.f32.mrf.mxu3 }
 0x256   : > { %v7492_v53 = vpop.f32.mrf.mxu0  ;;  %9293 = vst [vmem:[#allocation83_spill] sm:$0xff] %v7524_v41  ;;  %v9300_v41 = vld [vmem:[#allocation9_spill] sm:$0xff] }
 0x258   : > { %v3377_v51 = vpop.f32.mrf.mxu2 }
 0x259   : > { %5065 = vmatmul.msk.bf16.gmra.mxu0 %vm1595_vm0, %v5774_v6  ;;  %v7496_v50 = vadd.f32 %v3377_v51, %v3289_v2  ;;  %v5231_v51 = vld [vmem:[%s9205_s3 + $0x108] sm:$0xf]  ;;  %v7535_v30 = vpop.f32.mrf.mxu1 }
 0x25a   : > { %9294 = vst [vmem:[#allocation84_spill] sm:$0xff] %v7535_v30  ;;  %v5232_v61 = vor.u32 %v5839_v21, %v5231_v51  ;;  %v3299_v30 = vadd.f32 %v3298_v57, %v7279_v49  ;;  %v5263_v21 = vld [vmem:[%s9205_s3 + $0x148] sm:$0xf]  ;;  %v5906_v49 = vld [vmem:[%s9205_s3 + $0x344] sm:$0xf] }
 0x25e   : > { %v7506_v15 = vpop.f32.mrf.mxu0 }
 0x260   : > { %v7516_v43 = vpop.f32.mrf.mxu2 }
 0x261   : > { %v3303_v47 = vpop.f32.mrf.mxu1 }
 0x262   : > { %v3304_v59 = vadd.f32 %v3303_v47, %v7255_v42 }
 0x264   : > { %3470 = vmatmul.bf16.gmra.mxu3 %v5200_v1 }
 0x265   : > { %3421 = vmatmul.bf16.gmra.mxu2 %v5452_v25  ;;  %v5484_v25 = vor.u32 %v5898_v38, %v5481_v22  ;;  %v5847_v38 = vld [vmem:[%s9205_s3 + $0x164] sm:$0xf0] }
 0x266   : > { %v7521_v60 = vpop.f32.mrf.mxu0  ;;  %v5264_v57 = vor.u32 %v5847_v38, %v5263_v21 }
 0x268   : > { %v3382_v6 = vpop.f32.mrf.mxu2 }
 0x269   : > { %5066 = vmatmul.msk.bf16.gmra.mxu0 %vm1595_vm0, %v5775_v16  ;;  %v7527_v2 = vadd.f32 %v3382_v6, %v3294_v36  ;;  %v7545_v16 = vpop.f32.mrf.mxu3  ;;  %v5776_v36 = vld [vmem:[%s9203_s1 + $0x130] sm:$0xff] }
 0x26a   : > { %9295 = vst [vmem:[#allocation85_spill] sm:$0xff] %v7545_v16  ;;  %v1943_v16 = vadd.f32 %v7521_v60, %v9300_v41  ;;  %v1938_v60 = vadd.f32 %v7492_v53, %v6633_v32  ;;  %v5863_v32 = vld [vmem:[%s9205_s3 + $0x1e4] sm:$0xf0] }
 0x26c   : > { %v2175_v41 = vmax.f32 %v1943_v16, 0.0 }
 0x26e   : > { %v1944_v4 = vpop.f32.mrf.mxu0 }
 0x270   : > { %v7543_v1 = vpop.f32.mrf.mxu2 }
 0x271   : > { %v7554_v51 = vpop.f32.mrf.mxu3 }
 0x272   : > { %9296 = vst [vmem:[#allocation86_spill] sm:$0xff] %v7554_v51 }
 0x274   : > { %3475 = vmatmul.bf16.gmra.mxu3 %v5232_v61 }
 0x275   : > { %3426 = vmatmul.bf16.gmra.mxu2 %v5484_v25  ;;  %v7570_v25 = vpop.f32.mrf.mxu1 }
 0x276   : > { %v1947_v6 = vpop.f32.mrf.mxu0  ;;  %9298 = vst [vmem:[#allocation88_spill] sm:$0xff] %v7570_v25 }
 0x278   : > { %v3387_v33 = vpop.f32.mrf.mxu2 }
 0x279   : > { %5067 = vmatmul.msk.bf16.gmra.mxu0 %vm1595_vm0, %v5776_v36  ;;  %v7552_v0 = vadd.f32 %v3387_v33, %v3299_v30  ;;  %v5513_v33 = vld [vmem:[%s9205_s3 + $0x360] sm:$0xf0]  ;;  %v5777_v36 = vld [vmem:[%s9203_s1 + $0x138] sm:$0xff]  ;;  %v7575_v7 = vpop.f32.mrf.mxu3 }
 0x27a   : > { %v5516_v61 = vor.u32 %v5906_v49, %v5513_v33  ;;  %v5295_v33 = vld [vmem:[%s9205_s3 + $0x188] sm:$0xf] }
 0x27d   : > { %v3308_v38 = vpop.f32.mrf.mxu1 }
 0x27e   : > { %v1949_v22 = vpop.f32.mrf.mxu0 }
 0x27f   : > { %v1950_v25 = vadd.f32 %v1949_v22, %v6503_v19 }
 0x280   : > { %v7568_v30 = vpop.f32.mrf.mxu2 }
 0x281   : > { %9297 = vst [vmem:[#allocation87_spill] sm:$0xff] %v7568_v30  ;;  %v2178_v22 = vmax.f32 %v1950_v25, 0.0 }
 0x284   : > { %3480 = vmatmul.bf16.gmra.mxu3 %v5264_v57  ;;  %v5855_v57 = vld [vmem:[%s9205_s3 + $0x1a4] sm:$0xf0] }
 0x285   : > { %3431 = vmatmul.bf16.gmra.mxu2 %v5516_v61  ;;  %v5296_v47 = vor.u32 %v5855_v57, %v5295_v33  ;;  %v5778_v33 = vld [vmem:[%s9203_s1 + $0x140] sm:$0xff] }
 0x286   : > { %v1952_v35 = vpop.f32.mrf.mxu0 }
 0x287   : > { %v1953_v49 = vadd.f32 %v1952_v35, %v6518_v23  ;;  %v5545_v23 = vld [vmem:[%s9205_s3 + $0x3a0] sm:$0xf0]  ;;  %v7596_v35 = vpop.f32.mrf.mxu3 }
 0x288   : > { %v3392_v5 = vpop.f32.mrf.mxu2 }
 0x289   : > { %5068 = vmatmul.msk.bf16.gmra.mxu0 %vm1595_vm0, %v5777_v36  ;;  %v7579_v21 = vadd.f32 %v3392_v5, %v3304_v59  ;;  %v5914_v59 = vld [vmem:[%s9205_s3 + $0x384] sm:$0xf]  ;;  %v1948_v5 = vadd.f32 %v1947_v6, %v6558_v63  ;;  %v2179_v36 = vmax.f32 %v1953_v49, 0.0  ;;  %v7607_v6 = vpop.f32.mrf.mxu1  ;;  %v9302_v49 = vld [vmem:[#allocation8_spill] sm:$0xff] }
 0x28a   : > { %v5548_v19 = vor.u32 %v5914_v59, %v5545_v23  ;;  %9301 = vst [vmem:[#allocation9_spill] sm:$0xff] %v7607_v6  ;;  %v1940_v57 = vadd.f32 %v7506_v15, %v9302_v49  ;;  %v5779_v49 = vld [vmem:[%s9203_s1 + $0x148] sm:$0xff]  ;;  %v9322_v6 = vld [vmem:[#allocation6_spill] sm:$0xff] }
 0x28b   : > { %v2177_v51 = vmax.f32 %v1948_v5, 0.0  ;;  %v2173_v5 = vmax.f32 %v1938_v60, 0.0 }
 0x28c   : > { %v2174_v23 = vmax.f32 %v1940_v57, 0.0 }
 0x28e   : > { %v1954_v61 = vpop.f32.mrf.mxu0 }
 0x28f   : > { %v1955_v42 = vadd.f32 %v1954_v61, %v6458_v40  ;;  %v1945_v40 = vadd.f32 %v1944_v4, %v6543_v46  ;;  %v2275_v4 = vpack.c.bf16 %v2178_v22, %v2177_v51  ;;  %v7617_v59 = vpop.f32.mrf.mxu3  ;;  %v2273_v51 = vpack.c.bf16 %v2174_v23, %v2173_v5 }
 0x290   : > { %v7599_v31 = vpop.f32.mrf.mxu2 }
 0x291   : > { %v2180_v30 = vmax.f32 %v1955_v42, 0.0  ;;  %9299 = vst [vmem:[#allocation89_spill] sm:$0xff] %v7599_v31  ;;  %v2176_v46 = vmax.f32 %v1945_v40, 0.0 }
 0x293   : > { %v2276_v61 = vpack.c.bf16 %v2180_v30, %v2179_v36  ;;  %v3309_v30 = vadd.f32 %v3308_v38, %v7231_v34  ;;  %v5327_v34 = vld [vmem:[%s9205_s3 + $0x1c8] sm:$0xf]  ;;  %v5922_v38 = vld [vmem:[%s9205_s3 + $0x3c4] sm:$0xf] }
 0x294   : > { %3485 = vmatmul.bf16.gmra.mxu3 %v5296_v47  ;;  %v2274_v47 = vpack.c.bf16 %v2176_v46, %v2175_v41  ;;  %v5328_v36 = vor.u32 %v5863_v32, %v5327_v34  ;;  %v7653_v41 = vpop.permute.xlu2 %2576  ;;  %v9306_v34 = vld [vmem:[#allocation17_spill] sm:$0xff] }
 0x295   : > { %3536 = vmatpush.bf16.msrb.mxu1 %v2276_v61  ;;  %3436 = vmatmul.bf16.gmra.mxu2 %v5548_v19  ;;  %v3313_v19 = vpop.f32.mrf.mxu1 }
 0x296   : > { %v1957_v63 = vpop.f32.mrf.mxu0  ;;  %v3314_v46 = vadd.f32 %v3313_v19, %v7139_v8  ;;  %v5871_v8 = vld [vmem:[%s9205_s3 + $0x224] sm:$0xf0]  ;;  %v5780_v19 = vld [vmem:[%s9203_s1 + $0x150] sm:$0xff] }
 0x297   : > { %v1958_v15 = vadd.f32 %v1957_v63, %v6783_v48  ;;  %v5577_v48 = vld [vmem:[%s9205_s3 + $0x3e0] sm:$0xf0] }
 0x298   : > { %v3397_v25 = vpop.f32.mrf.mxu2 }
 0x299   : > { %5069 = vmatmul.msk.bf16.gmra.mxu0 %vm1595_vm0, %v5778_v33  ;;  %3537 = vmatpush.bf16.msrb.mxu1 %v2275_v4  ;;  %v7615_v42 = vadd.f32 %v3397_v25, %v3309_v30  ;;  %v2181_v40 = vmax.f32 %v1958_v15, 0.0  ;;  %v5580_v33 = vor.u32 %v5922_v38, %v5577_v48  ;;  %v9305_v25 = vld [vmem:[#allocation18_spill] sm:$0xff] }
 0x29d   : > { %3538 = vmatpush.bf16.msrb.mxu1 %v2274_v47  ;;  %v7648_v60 = vpop.f32.mrf.mxu1  ;;  %v5105_v47 = vld [vmem:[%s9205_s3 + $0x28] sm:$0xf0] }
 0x29e   : > { %v1959_v53 = vpop.f32.mrf.mxu0  ;;  %9304 = vst [vmem:[#allocation90_spill] sm:$0xff] %v7648_v60 }
 0x29f   : > { %v1960_v16 = vadd.f32 %v1959_v53, %v6705_v55  ;;  %v7637_v55 = vpop.f32.mrf.mxu3 }
 0x2a0   : > { %v7633_v61 = vpop.f32.mrf.mxu2 }
 0x2a1   : > { %v2182_v22 = vmax.f32 %v1960_v16, 0.0  ;;  %9303 = vst [vmem:[#allocation8_spill] sm:$0xff] %v7633_v61  ;;  %3539 = vmatpush.bf16.msrb.mxu1 %v2273_v51 }
 0x2a3   : > { %v7635_v63 = vpack.c.bf16 %v2182_v22, %v2181_v40  ;;  %v2552_v22 = vpop.permute.xlu2 %2551 }
 0x2a4   : > { %3490 = vmatmul.bf16.gmra.mxu3 %v5328_v36 }
 0x2a5   : > { %3540 = vmatpush.bf16.msrb.mxu1 %v7485_v62  ;;  %3441 = vmatmul.bf16.gmra.mxu2 %v5580_v33  ;;  %v5359_v62 = vld [vmem:[%s9205_s3 + $0x208] sm:$0xf]  ;;  %v3318_v36 = vpop.f32.mrf.mxu1 }
 0x2a6   : > { %v1962_v57 = vpop.f32.mrf.mxu0  ;;  %v5360_v53 = vor.u32 %v5871_v8, %v5359_v62 }
 0x2a7   : > { %v1963_v23 = vadd.f32 %v1962_v57, %v9305_v25  ;;  %v7666_v15 = vpop.f32.mrf.mxu3  ;;  %v5391_v25 = vld [vmem:[%s9205_s3 + $0x248] sm:$0xf] }
 0x2a8   : > { %v3402_v4 = vpop.f32.mrf.mxu2 }
 0x2a9   : > { %5070 = vmatmul.msk.bf16.gmra.mxu0 %vm1595_vm0, %v5779_v49  ;;  %3541 = vmatpush.bf16.msrb.mxu1 %v7457_v52  ;;  %v7646_v30 = vadd.f32 %v3402_v4, %v3314_v46  ;;  %v5803_v52 = vld [vmem:[%s9205_s3 + $0xc] sm:$0xf]  ;;  %v3319_v49 = vadd.f32 %v3318_v36, %v2552_v22  ;;  %v2477_v46 = vpop.permute.xlu0 %2476 }
 0x2aa   : > { %v5108_v16 = vor.u32 %v5803_v52, %v5105_v47  ;;  %v3281_v62 = vadd.f32 %v7388_v3, %v2477_v46  ;;  %v5879_v52 = vld [vmem:[%s9205_s3 + $0x264] sm:$0xf0]  ;;  %v5137_v47 = vld [vmem:[%s9205_s3 + $0x68] sm:$0xf0] }
 0x2ac   : > { %v3370_v3 = vadd.f32 %v7455_v9, %v3281_v62  ;;  %v5781_v9 = vld [vmem:[%s9203_s1 + $0x158] sm:$0xff]  ;;  %v3286_v62 = vadd.f32 %v7427_v29, %v7407_v56 }
 0x2ad   : > { %3542 = vmatpush.bf16.msrb.mxu1 %v7429_v26  ;;  %v2183_v26 = vmax.f32 %v1963_v23, 0.0  ;;  %v9308_v23 = vld [vmem:[#allocation15_spill] sm:$0xff] }
 0x2ae   : > { %v1964_v5 = vpop.f32.mrf.mxu0  ;;  %v3375_v56 = vadd.f32 %v7483_v45, %v3286_v62  ;;  %v5782_v45 = vld [vmem:[%s9203_s1 + $0x160] sm:$0xff] }
 0x2af   : > { %v1965_v32 = vadd.f32 %v1964_v5, %v9306_v34  ;;  %v9309_v34 = vld [vmem:[#allocation14_spill] sm:$0xff] }
 0x2b0   : > { %v7669_v38 = vpop.f32.mrf.mxu2 }
 0x2b1   : > { %v2184_v51 = vmax.f32 %v1965_v32, 0.0  ;;  %9307 = vst [vmem:[#allocation18_spill] sm:$0xff] %v7669_v38  ;;  %3543 = vmatpush.bf16.msrb.mxu1 %v7397_v28 }
 0x2b3   : > { %v7672_v48 = vpack.c.bf16 %v2184_v51, %v2183_v26  ;;  %v5392_v26 = vor.u32 %v5879_v52, %v5391_v25  ;;  %v5423_v25 = vld [vmem:[%s9205_s3 + $0x288] sm:$0xf] }
 0x2b4   : > { %3495 = vmatmul.bf16.gmra.mxu3 %v5360_v53  ;;  %3544 = vmatmul.bf16.vlgmr.msrb.gmra.mxu1 %v5108_v16  ;;  %v5887_v52 = vld [vmem:[%s9205_s3 + $0x2a4] sm:$0xf0] }
 0x2b6   : > { %v1967_v40 = vpop.f32.mrf.mxu0 }
 0x2b7   : > { %v3456_v33 = vpop.f32.mrf.mxu3  ;;  %v1968_v8 = vadd.f32 %v1967_v40, %v9308_v23  ;;  %v9311_v23 = vld [vmem:[#allocation13_spill] sm:$0xff] }
 0x2b8   : > { %v7678_v57 = vadd.f32 %v3456_v33, %v7435_v24  ;;  %v3407_v4 = vpop.f32.mrf.mxu2  ;;  %v5811_v24 = vld [vmem:[%s9205_s3 + $0x4c] sm:$0xf] }
 0x2b9   : > { %5071 = vmatmul.msk.bf16.gmra.mxu0 %vm1595_vm0, %v5780_v19  ;;  %v7681_v28 = vadd.f32 %v3407_v4, %v3319_v49  ;;  %v5140_v51 = vor.u32 %v5811_v24, %v5137_v47  ;;  %v2185_v36 = vmax.f32 %v1968_v8, 0.0  ;;  %v5169_v24 = vld [vmem:[%s9205_s3 + $0xa8] sm:$0xf0]  ;;  %v9312_v47 = vld [vmem:[#allocation12_spill] sm:$0xff] }
 0x2be   : > { %v1969_v5 = vpop.f32.mrf.mxu0 }
 0x2bf   : > { %v1970_v32 = vadd.f32 %v1969_v5, %v9309_v34  ;;  %v3458_v53 = vpop.f32.mrf.mxu3 }
 0x2c0   : > { %v7699_v16 = vadd.f32 %v3458_v53, %v3370_v3  ;;  %v7701_v40 = vpop.f32.mrf.mxu2 }
 0x2c1   : > { %v2186_v19 = vmax.f32 %v1970_v32, 0.0  ;;  %9310 = vst [vmem:[#allocation17_spill] sm:$0xff] %v7701_v40  ;;  %v5424_v32 = vor.u32 %v5887_v52, %v5423_v25  ;;  %v3291_v25 = vadd.f32 %v7462_v39, %v7437_v13  ;;  %v5201_v52 = vld [vmem:[%s9205_s3 + $0xe8] sm:$0xf0] }
 0x2c3   : > { %v7703_v22 = vpack.c.bf16 %v2186_v19, %v2185_v36 }
 0x2c4   : > { %3500 = vmatmul.bf16.gmra.mxu3 %v5392_v26  ;;  %3549 = vmatmul.bf16.gmra.mxu1 %v5140_v51 }
 0x2c6   : > { %v1972_v33 = vpop.f32.mrf.mxu0 }
 0x2c7   : > { %v3461_v49 = vpop.f32.mrf.mxu3  ;;  %v1973_v8 = vadd.f32 %v1972_v33, %v9311_v23  ;;  %v5455_v23 = vld [vmem:[%s9205_s3 + $0x2c8] sm:$0xf] }
 0x2c8   : > { %v7709_v46 = vadd.f32 %v3461_v49, %v7465_v10  ;;  %v7711_v4 = vpop.f32.mrf.mxu2  ;;  %v5819_v10 = vld [vmem:[%s9205_s3 + $0x8c] sm:$0xf] }
 0x2c9   : > { %5072 = vmatmul.msk.bf16.gmra.mxu0 %vm1595_vm0, %v5781_v9  ;;  %v5172_v53 = vor.u32 %v5819_v10, %v5169_v24  ;;  %v2187_v26 = vmax.f32 %v1973_v8, 0.0  ;;  %v5895_v8 = vld [vmem:[%s9205_s3 + $0x2e4] sm:$0xf0]  ;;  %v3380_v10 = vadd.f32 %v7516_v43, %v3291_v25 }
 0x2ce   : > { %v1974_v29 = vpop.f32.mrf.mxu0 }
 0x2cf   : > { %v1975_v3 = vadd.f32 %v1974_v29, %v9312_v47  ;;  %v3463_v5 = vpop.f32.mrf.mxu3 }
 0x2d0   : > { %v7731_v34 = vadd.f32 %v3463_v5, %v3375_v56  ;;  %v7733_v36 = vpop.f32.mrf.mxu2  ;;  %v5456_v56 = vor.u32 %v5895_v8, %v5455_v23 }
 0x2d1   : > { %v2188_v51 = vmax.f32 %v1975_v3, 0.0  ;;  %9313 = vst [vmem:[#allocation15_spill] sm:$0xff] %v7733_v36  ;;  %v5783_v3 = vld [vmem:[%s9203_s1 + $0x168] sm:$0xff]  ;;  %v9321_v36 = vld [vmem:[#allocation5_spill] sm:$0xff] }
 0x2d3   : > { %v7735_v19 = vpack.c.bf16 %v2188_v51, %v2187_v26  ;;  %v3296_v51 = vadd.f32 %v7498_v27, %v7317_v17 }
 0x2d4   : > { %3505 = vmatmul.bf16.gmra.mxu3 %v5424_v32  ;;  %3554 = vmatmul.bf16.gmra.mxu1 %v5172_v53 }
 0x2d5   : > { %v3385_v25 = vadd.f32 %v7543_v1, %v3296_v51  ;;  %v5843_v51 = vld [vmem:[%s9205_s3 + $0x14c] sm:$0xf] }
 0x2d6   : > { %v7740_v9 = vpop.f32.mrf.mxu0 }
 0x2d7   : > { %v3466_v33 = vpop.f32.mrf.mxu3 }
 0x2d8   : > { %v7743_v49 = vadd.f32 %v3466_v33, %v7496_v50  ;;  %v7745_v62 = vpop.f32.mrf.mxu2  ;;  %v5827_v50 = vld [vmem:[%s9205_s3 + $0xcc] sm:$0xf]  ;;  %v5903_v33 = vld [vmem:[%s9205_s3 + $0x324] sm:$0xf0] }
 0x2d9   : > { %5073 = vmatmul.msk.bf16.gmra.mxu0 %vm1595_vm0, %v5782_v45  ;;  %v5204_v29 = vor.u32 %v5827_v50, %v5201_v52  ;;  %v5487_v45 = vld [vmem:[%s9205_s3 + $0x308] sm:$0xf] }
 0x2da   : > { %v5488_v8 = vor.u32 %v5903_v33, %v5487_v45 }
 0x2de   : > { %v7763_v24 = vpop.f32.mrf.mxu0 }
 0x2df   : > { %v3468_v13 = vpop.f32.mrf.mxu3 }
 0x2e0   : > { %v7765_v39 = vadd.f32 %v3468_v13, %v3380_v10  ;;  %v7767_v47 = vpop.f32.mrf.mxu2  ;;  %v5784_v10 = vld [vmem:[%s9203_s1 + $0x170] sm:$0xff] }
 0x2e4   : > { %3510 = vmatmul.bf16.gmra.mxu3 %v5456_v56  ;;  %3559 = vmatmul.bf16.gmra.mxu1 %v5204_v29 }
 0x2e6   : > { %v7772_v5 = vpop.f32.mrf.mxu0 }
 0x2e7   : > { %v3471_v32 = vpop.f32.mrf.mxu3 }
 0x2e8   : > { %v7775_v43 = vadd.f32 %v3471_v32, %v7527_v2  ;;  %v3422_v53 = vpop.f32.mrf.mxu2  ;;  %v5835_v2 = vld [vmem:[%s9205_s3 + $0x10c] sm:$0xf]  ;;  %v5519_v32 = vld [vmem:[%s9205_s3 + $0x348] sm:$0xf] }
 0x2e9   : > { %5074 = vmatmul.msk.bf16.gmra.mxu0 %vm1595_vm0, %v5783_v3  ;;  %v7779_v26 = vadd.f32 %v3422_v53, %v7371_v14  ;;  %v5233_v14 = vld [vmem:[%s9205_s3 + $0x128] sm:$0xf0]  ;;  %v5911_v53 = vld [vmem:[%s9205_s3 + $0x364] sm:$0xf0] }
 0x2ea   : > { %v5236_v50 = vor.u32 %v5835_v2, %v5233_v14 }
 0x2ee   : > { %v1984_v23 = vpop.f32.mrf.mxu0 }
 0x2ef   : > { %v3473_v17 = vpop.f32.mrf.mxu3  ;;  %v1985_v31 = vadd.f32 %v1984_v23, %v9322_v6  ;;  %v9325_v23 = vld [vmem:[#allocation11_spill] sm:$0xff] }
 0x2f0   : > { %v7796_v27 = vadd.f32 %v3473_v17, %v3385_v25  ;;  %v7798_v52 = vpop.f32.mrf.mxu2  ;;  %v5785_v25 = vld [vmem:[%s9203_s1 + $0x178] sm:$0xff] }
 0x2f1   : > { %9314 = vst [vmem:[#allocation14_spill] sm:$0xff] %v7798_v52  ;;  %v9323_v52 = vld [vmem:[#allocation7_spill] sm:$0xff] }
 0x2f4   : > { %3515 = vmatmul.bf16.gmra.mxu3 %v5488_v8  ;;  %3564 = vmatmul.bf16.gmra.mxu1 %v5236_v50 }
 0x2f6   : > { %v1987_v13 = vpop.f32.mrf.mxu0 }
 0x2f7   : > { %v3476_v56 = vpop.f32.mrf.mxu3  ;;  %v1988_v40 = vadd.f32 %v1987_v13, %v9321_v36  ;;  %v9324_v13 = vld [vmem:[#allocation10_spill] sm:$0xff] }
 0x2f8   : > { %v7804_v29 = vadd.f32 %v3476_v56, %v7552_v0  ;;  %v3427_v1 = vpop.f32.mrf.mxu2  ;;  %v5265_v0 = vld [vmem:[%s9205_s3 + $0x168] sm:$0xf0] }
 0x2f9   : > { %5075 = vmatmul.msk.bf16.gmra.mxu0 %vm1595_vm0, %v5784_v10  ;;  %v7808_v3 = vadd.f32 %v3427_v1, %v7289_v12  ;;  %v5520_v12 = vor.u32 %v5911_v53, %v5519_v32  ;;  %v5268_v2 = vor.u32 %v5843_v51, %v5265_v0  ;;  %v5551_v1 = vld [vmem:[%s9205_s3 + $0x388] sm:$0xf]  ;;  %v5297_v0 = vld [vmem:[%s9205_s3 + $0x1a8] sm:$0xf0] }
 0x2fa   : > { %v9317_v32 = vld [vmem:[#allocation3_spill] sm:$0xff] }
 0x2fb   : > { %v5919_v51 = vld [vmem:[%s9205_s3 + $0x3a4] sm:$0xf0] }
 0x2fe   : > { %v1989_v45 = vpop.f32.mrf.mxu0 }
 0x2ff   : > { %v7822_v33 = vpop.f32.mrf.mxu3 }
 0x300   : > { %9315 = vst [vmem:[#allocation13_spill] sm:$0xff] %v7822_v33  ;;  %v7824_v14 = vpop.f32.mrf.mxu2 }
 0x301   : > { %9316 = vst [vmem:[#allocation12_spill] sm:$0xff] %v7824_v14 }
 0x304   : > { %3520 = vmatmul.bf16.gmra.mxu3 %v5520_v12  ;;  %3569 = vmatmul.bf16.gmra.mxu1 %v5268_v2  ;;  %v9318_v12 = vld [vmem:[#allocation4_spill] sm:$0xff] }
 0x305   : > { %v1990_v2 = vadd.f32 %v1989_v45, %v9318_v12  ;;  %v1983_v45 = vadd.f32 %v7772_v5, %v9323_v52 }
 0x306   : > { %v1992_v17 = vpop.f32.mrf.mxu0 }
 0x307   : > { %v3481_v8 = vpop.f32.mrf.mxu3  ;;  %v1993_v53 = vadd.f32 %v1992_v17, %v9317_v32  ;;  %v5552_v17 = vor.u32 %v5919_v51, %v5551_v1  ;;  %v2194_v33 = vmax.f32 %v1990_v2, 0.0  ;;  %v5786_v1 = vld [vmem:[%s9203_s1 + $0x180] sm:$0xff]  ;;  %v2192_v51 = vmax.f32 %v1985_v31, 0.0  ;;  %v5583_v31 = vld [vmem:[%s9205_s3 + $0x3c8] sm:$0xf] }
 0x308   : > { %v7830_v50 = vadd.f32 %v3481_v8, %v7579_v21  ;;  %v3432_v10 = vpop.f32.mrf.mxu2  ;;  %v5851_v21 = vld [vmem:[%s9205_s3 + $0x18c] sm:$0xf]  ;;  %v2191_v5 = vmax.f32 %v1983_v45, 0.0 }
 0x309   : > { %5076 = vmatmul.msk.bf16.gmra.mxu0 %vm1595_vm0, %v5785_v25  ;;  %v7834_v56 = vadd.f32 %v3432_v10, %v7323_v20  ;;  %v9319_v25 = vld [vmem:[#allocation2_spill] sm:$0xff]  ;;  %v5300_v32 = vor.u32 %v5851_v21, %v5297_v0  ;;  %v2195_v38 = vmax.f32 %v1993_v53, 0.0  ;;  %v1980_v53 = vadd.f32 %v7763_v24, %v9324_v13 }
 0x30a   : > { %v2282_v0 = vpack.c.bf16 %v2192_v51, %v2191_v5  ;;  %v7906_v5 = vpop.f32.mrf.mxu1 }
 0x30b   : > { %9330 = vst [vmem:[#allocation5_spill] sm:$0xff] %v7906_v5 }
 0x30e   : > { %v1994_v20 = vpop.f32.mrf.mxu0 }
 0x30f   : > { %v1995_v8 = vadd.f32 %v1994_v20, %v9319_v25  ;;  %v7851_v10 = vpop.f32.mrf.mxu3  ;;  %v2193_v20 = vmax.f32 %v1988_v40, 0.0 }
 0x310   : > { %9320 = vst [vmem:[#allocation3_spill] sm:$0xff] %v7851_v10  ;;  %v7854_v61 = vpop.f32.mrf.mxu2 }
 0x311   : > { %v2196_v60 = vmax.f32 %v1995_v8, 0.0  ;;  %v2283_v6 = vpack.c.bf16 %v2194_v33, %v2193_v20  ;;  %v5859_v33 = vld [vmem:[%s9205_s3 + $0x1cc] sm:$0xf] }
 0x313   : > { %v2284_v14 = vpack.c.bf16 %v2196_v60, %v2195_v38  ;;  %v1978_v60 = vadd.f32 %v7740_v9, %v9325_v23  ;;  %v3354_v23 = vadd.f32 %v7403_v18, %v7187_v11  ;;  %v5867_v18 = vld [vmem:[%s9205_s3 + $0x20c] sm:$0xf] }
 0x314   : > { %3525 = vmatmul.bf16.gmra.mxu3 %v5552_v17  ;;  %3574 = vmatmul.bf16.gmra.mxu1 %v5300_v32 }
 0x315   : > { %3625 = vmatpush.bf16.msra.mxu2 %v2284_v14  ;;  %v2190_v14 = vmax.f32 %v1980_v53, 0.0  ;;  %v2189_v24 = vmax.f32 %v1978_v60, 0.0  ;;  %v9328_v53 = vld [vmem:[#allocation26_spill] sm:$0xff] }
 0x316   : > { %v1997_v36 = vpop.f32.mrf.mxu0  ;;  %v2113_v51 = vadd.f32 %v7637_v55, %v9328_v53 }
 0x317   : > { %v3486_v21 = vpop.f32.mrf.mxu3  ;;  %v1998_v9 = vadd.f32 %v1997_v36, %v7037_v58  ;;  %v2281_v8 = vpack.c.bf16 %v2190_v14, %v2189_v24  ;;  %v9331_v14 = vld [vmem:[#allocation32_spill] sm:$0xff] }
 0x318   : > { %v7867_v38 = vadd.f32 %v3486_v21, %v7615_v42  ;;  %v3437_v40 = vpop.f32.mrf.mxu2  ;;  %v5927_v42 = vld [vmem:[%s9205_s3 + $0x3e4] sm:$0xf0]  ;;  %v9329_v21 = vld [vmem:[#allocation25_spill] sm:$0xff]  ;;  %v2108_v55 = vadd.f32 %v7596_v35, %v9331_v14  ;;  %v2243_v24 = vmax.f32 %v2113_v51, 0.0  ;;  %v5111_v35 = vld [vmem:[%s9205_s3 + $0x10] sm:$0xf] }
 0x319   : > { %5077 = vmatmul.msk.bf16.gmra.mxu0 %vm1595_vm0, %v5786_v1  ;;  %3626 = vmatpush.bf16.msra.mxu2 %v2283_v6  ;;  %v7871_v52 = vadd.f32 %v3437_v40, %v7356_v44  ;;  %v5329_v44 = vld [vmem:[%s9205_s3 + $0x1e8] sm:$0xf0]  ;;  %v5584_v58 = vor.u32 %v5927_v42, %v5583_v31  ;;  %v2197_v32 = vmax.f32 %v1998_v9, 0.0  ;;  %v2115_v6 = vadd.f32 %v7666_v15, %v9329_v21  ;;  %v9334_v42 = vld [vmem:[#allocation37_spill] sm:$0xff]  ;;  %v9340_v14 = vld [vmem:[#allocation44_spill] sm:$0xff] }
 0x31a   : > { %v5332_v17 = vor.u32 %v5859_v33, %v5329_v44  ;;  %v2105_v33 = vadd.f32 %v7575_v7, %v9334_v42  ;;  %v2241_v44 = vmax.f32 %v2108_v55, 0.0  ;;  %v9341_v55 = vld [vmem:[#allocation83_spill] sm:$0xff] }
 0x31b   : > { %v2244_v11 = vmax.f32 %v2115_v6, 0.0  ;;  %v9338_v6 = vld [vmem:[#allocation43_spill] sm:$0xff] }
 0x31c   : > { %v2240_v7 = vmax.f32 %v2105_v33, 0.0 }
 0x31d   : > { %3627 = vmatpush.bf16.msra.mxu2 %v2282_v0  ;;  %v9332_v0 = vld [vmem:[#allocation31_spill] sm:$0xff] }
 0x31e   : > { %v1999_v12 = vpop.f32.mrf.mxu0  ;;  %v2110_v15 = vadd.f32 %v7617_v59, %v9332_v0  ;;  %v5808_v59 = vld [vmem:[%s9205_s3 + $0x2c] sm:$0xf0]  ;;  %v2098_v0 = vadd.f32 %v9341_v55, %v9340_v14  ;;  %v9351_v14 = vld [vmem:[#allocation47_spill] sm:$0xff] }
 0x31f   : > { %v2000_v2 = vadd.f32 %v1999_v12, %v7137_v37  ;;  %v7887_v25 = vpop.f32.mrf.mxu3  ;;  %v5787_v37 = vld [vmem:[%s9203_s1 + $0x188] sm:$0xff] }
 0x320   : > { %9326 = vst [vmem:[#allocation4_spill] sm:$0xff] %v7887_v25  ;;  %v7889_v20 = vpop.f32.mrf.mxu2  ;;  %v2242_v12 = vmax.f32 %v2110_v15, 0.0  ;;  %v2237_v42 = vmax.f32 %v2098_v0, 0.0 }
 0x321   : > { %v2198_v45 = vmax.f32 %v2000_v2, 0.0  ;;  %9327 = vst [vmem:[#allocation2_spill] sm:$0xff] %v7889_v20  ;;  %3628 = vmatpush.bf16.msra.mxu2 %v2281_v8  ;;  %v9336_v8 = vld [vmem:[#allocation38_spill] sm:$0xff] }
 0x322   : > { %v2307_v15 = vpack.c.bf16 %v2242_v12, %v2241_v44 }
 0x323   : > { %v7891_v1 = vpack.c.bf16 %v2198_v45, %v2197_v32  ;;  %v2308_v32 = vpack.c.bf16 %v2244_v11, %v2243_v24  ;;  %v9342_v24 = vld [vmem:[#allocation48_spill] sm:$0xff]  ;;  %v9343_v11 = vld [vmem:[#allocation82_spill] sm:$0xff] }
 0x324   : > { %3530 = vmatmul.bf16.gmra.mxu3 %v5584_v58  ;;  %3579 = vmatmul.bf16.gmra.mxu1 %v5332_v17  ;;  %v9337_v58 = vld [vmem:[#allocation86_spill] sm:$0xff] }
 0x325   : > { %3629 = vmatpush.bf16.msra.mxu2 %v7735_v19  ;;  %v2103_v17 = vadd.f32 %v9337_v58, %v9336_v8 }
 0x326   : > { %v2002_v36 = vpop.f32.mrf.mxu0 }
 0x327   : > { %v3491_v13 = vpop.f32.mrf.mxu3 }
 0x328   : > { %v7904_v60 = vadd.f32 %v3491_v13, %v7646_v30  ;;  %v3442_v19 = vpop.f32.mrf.mxu2  ;;  %v9333_v30 = vld [vmem:[#allocation42_spill] sm:$0xff] }
 0x329   : > { %5078 = vmatmul.msk.bf16.gmra.mxu0 %vm1595_vm0, %v5787_v37  ;;  %3630 = vmatpush.bf16.msra.mxu2 %v7703_v22  ;;  %v7910_v40 = vadd.f32 %v3442_v19, %v3354_v23  ;;  %v2003_v31 = vadd.f32 %v2002_v36, %v9333_v30  ;;  %v5361_v22 = vld [vmem:[%s9205_s3 + $0x228] sm:$0xf0]  ;;  %v5112_v37 = vor.u32 %v5808_v59, %v5111_v35  ;;  %v9339_v23 = vld [vmem:[#allocation85_spill] sm:$0xff] }
 0x32a   : > { %v5364_v45 = vor.u32 %v5867_v18, %v5361_v22  ;;  %v2100_v19 = vadd.f32 %v9339_v23, %v9338_v6  ;;  %v2095_v18 = vadd.f32 %v9343_v11, %v9342_v24  ;;  %v9344_v30 = vld [vmem:[#allocation49_spill] sm:$0xff]  ;;  %v5816_v6 = vld [vmem:[%s9205_s3 + $0x6c] sm:$0xf0]  ;;  %v2562_v11 = vpop.permute.xlu0 %2561 }
 0x32b   : > { %v2199_v36 = vmax.f32 %v2003_v31, 0.0  ;;  %v9345_v31 = vld [vmem:[#allocation81_spill] sm:$0xff] }
 0x32c   : > { %v2093_v22 = vadd.f32 %v9345_v31, %v9344_v30 }
 0x32d   : > { %3631 = vmatpush.bf16.msra.mxu2 %v7672_v48 }
 0x32e   : > { %v2004_v9 = vpop.f32.mrf.mxu0  ;;  %v2235_v8 = vmax.f32 %v2093_v22, 0.0 }
 0x32f   : > { %v2005_v48 = vadd.f32 %v2004_v9, %v7083_v54  ;;  %v7933_v2 = vpop.f32.mrf.mxu3  ;;  %v2239_v54 = vmax.f32 %v2103_v17, 0.0  ;;  %v2238_v9 = vmax.f32 %v2100_v19, 0.0  ;;  %v9346_v17 = vld [vmem:[#allocation53_spill] sm:$0xff] }
 0x330   : > { %9335 = vst [vmem:[#allocation6_spill] sm:$0xff] %v7933_v2 }
 0x331   : > { %v2200_v13 = vmax.f32 %v2005_v48, 0.0  ;;  %v3545_v53 = vpop.f32.mrf.mxu1  ;;  %3632 = vmatpush.bf16.msra.mxu2 %v7635_v63  ;;  %v5788_v63 = vld [vmem:[%s9203_s1 + $0x190] sm:$0xff]  ;;  %v2306_v59 = vpack.c.bf16 %v2240_v7, %v2239_v54  ;;  %v2236_v48 = vmax.f32 %v2095_v18, 0.0  ;;  %v2305_v58 = vpack.c.bf16 %v2238_v9, %v2237_v42  ;;  %v9353_v9 = vld [vmem:[#allocation57_spill] sm:$0xff] }
 0x332   : > { %v7939_v51 = vadd.f32 %v3545_v53, %v7678_v57  ;;  %v9350_v53 = vld [vmem:[#allocation36_spill] sm:$0xff]  ;;  %v3324_v42 = vadd.f32 %v9353_v9, %v2562_v11 }
 0x333   : > { %v7941_v21 = vpack.c.bf16 %v2200_v13, %v2199_v36  ;;  %v9349_v36 = vld [vmem:[#allocation79_spill] sm:$0xff]  ;;  %v5143_v54 = vld [vmem:[%s9205_s3 + $0x50] sm:$0xf]  ;;  %v2304_v19 = vpack.c.bf16 %v2236_v48, %v2235_v8 }
 0x334   : > { %3584 = vmatmul.bf16.gmra.mxu1 %v5364_v45  ;;  %3633 = vmatmul.bf16.vlgmr.msra.gmra.mxu2 %v5112_v37  ;;  %v9348_v37 = vld [vmem:[#allocation54_spill] sm:$0xff]  ;;  %v5144_v24 = vor.u32 %v5816_v6, %v5143_v54  ;;  %v3413_v48 = vadd.f32 %v7711_v4, %v3324_v42  ;;  %v5425_v4 = vld [vmem:[%s9205_s3 + $0x2a8] sm:$0xf0] }
 0x335   : > { %3892 = vmatpush.bf16.msrb.mxu2 %v2308_v32  ;;  %v9347_v32 = vld [vmem:[#allocation80_spill] sm:$0xff]  ;;  %v2088_v13 = vadd.f32 %v9349_v36, %v9348_v37  ;;  %v5883_v37 = vld [vmem:[%s9205_s3 + $0x28c] sm:$0xf]  ;;  %v9354_v36 = vld [vmem:[#allocation30_spill] sm:$0xff] }
 0x336   : > { %v2007_v57 = vpop.f32.mrf.mxu0  ;;  %v2090_v45 = vadd.f32 %v9347_v32, %v9346_v17  ;;  %v5428_v6 = vor.u32 %v5883_v37, %v5425_v4  ;;  %v5791_v4 = vld [vmem:[%s9203_s1 + $0x1a8] sm:$0xff] }
 0x337   : > { %v3496_v35 = vpop.f32.mrf.mxu3  ;;  %v2008_v7 = vadd.f32 %v2007_v57, %v9350_v53  ;;  %v5824_v53 = vld [vmem:[%s9205_s3 + $0xac] sm:$0xf0] }
 0x338   : > { %v7955_v33 = vadd.f32 %v3496_v35, %v7681_v28  ;;  %v5875_v28 = vld [vmem:[%s9205_s3 + $0x24c] sm:$0xf] }
 0x339   : > { %3893 = vmatpush.bf16.msrb.mxu2 %v2307_v15  ;;  %5079 = vmatmul.msk.bf16.gmra.mxu0 %vm1595_vm0, %v5788_v63  ;;  %v3547_v44 = vpop.f32.mrf.mxu1  ;;  %v2234_v15 = vmax.f32 %v2090_v45, 0.0  ;;  %v2233_v63 = vmax.f32 %v2088_v13, 0.0  ;;  %v2201_v18 = vmax.f32 %v2008_v7, 0.0  ;;  %v9355_v7 = vld [vmem:[#allocation41_spill] sm:$0xff] }
 0x33a   : > { %v7959_v12 = vadd.f32 %v3547_v44, %v7699_v16  ;;  %v5393_v16 = vld [vmem:[%s9205_s3 + $0x268] sm:$0xf0]  ;;  %v5789_v44 = vld [vmem:[%s9203_s1 + $0x198] sm:$0xff] }
 0x33b   : > { %v5396_v57 = vor.u32 %v5875_v28, %v5393_v16  ;;  %v5175_v28 = vld [vmem:[%s9205_s3 + $0x90] sm:$0xf] }
 0x33d   : > { %3894 = vmatpush.bf16.msrb.mxu2 %v2306_v59  ;;  %v2303_v59 = vpack.c.bf16 %v2234_v15, %v2233_v63 }
 0x33e   : > { %v2009_v23 = vpop.f32.mrf.mxu0 }
 0x33f   : > { %v2010_v55 = vadd.f32 %v2009_v23, %v9351_v14  ;;  %v7979_v0 = vpop.f32.mrf.mxu3  ;;  %v5176_v23 = vor.u32 %v5824_v53, %v5175_v28 }
 0x340   : > { %9352 = vst [vmem:[#allocation7_spill] sm:$0xff] %v7979_v0  ;;  %v9364_v0 = vld [vmem:[#allocation29_spill] sm:$0xff] }
 0x341   : > { %3895 = vmatpush.bf16.msrb.mxu2 %v2305_v58  ;;  %v2202_v30 = vmax.f32 %v2010_v55, 0.0  ;;  %v3550_v31 = vpop.f32.mrf.mxu1  ;;  %v7991_v58 = vpop.permute.xlu1 %2586 }
 0x342   : > { %v7982_v22 = vadd.f32 %v3550_v31, %v7709_v46 }
 0x343   : > { %v7984_v35 = vpack.c.bf16 %v2202_v30, %v2201_v18  ;;  %v5790_v18 = vld [vmem:[%s9203_s1 + $0x1a0] sm:$0xff] }
 0x344   : > { %3589 = vmatmul.bf16.gmra.mxu1 %v5396_v57  ;;  %3638 = vmatmul.bf16.gmra.mxu2 %v5144_v24  ;;  %v9357_v24 = vld [vmem:[#allocation64_spill] sm:$0xff] }
 0x345   : > { %3896 = vmatpush.bf16.msrb.mxu2 %v2304_v19 }
 0x346   : > { %v2012_v8 = vpop.f32.mrf.mxu0 }
 0x347   : > { %v3501_v46 = vpop.f32.mrf.mxu3  ;;  %v2013_v13 = vadd.f32 %v2012_v8, %v9354_v36  ;;  %v5832_v8 = vld [vmem:[%s9205_s3 + $0xec] sm:$0xf0] }
 0x348   : > { %v7993_v17 = vadd.f32 %v3501_v46, %v3413_v48  ;;  %v5457_v48 = vld [vmem:[%s9205_s3 + $0x2e8] sm:$0xf0] }
 0x349   : > { %3897 = vmatpush.bf16.msrb.mxu2 %v2303_v59  ;;  %5080 = vmatmul.msk.bf16.gmra.mxu0 %vm1595_vm0, %v5789_v44  ;;  %v3552_v32 = vpop.f32.mrf.mxu1  ;;  %v2572_v19 = vpop.permute.xlu1 %2571  ;;  %v2203_v14 = vmax.f32 %v2013_v13, 0.0  ;;  %v5891_v44 = vld [vmem:[%s9205_s3 + $0x2cc] sm:$0xf] }
 0x34a   : > { %v7997_v45 = vadd.f32 %v3552_v32, %v7731_v34  ;;  %v3329_v11 = vadd.f32 %v9357_v24, %v2572_v19  ;;  %v5460_v32 = vor.u32 %v5891_v44, %v5457_v48  ;;  %v5521_v44 = vld [vmem:[%s9205_s3 + $0x368] sm:$0xf0]  ;;  %v5271_v48 = vld [vmem:[%s9205_s3 + $0x150] sm:$0xf] }
 0x34c   : > { %v3418_v30 = vadd.f32 %v7745_v62, %v3329_v11  ;;  %v5207_v62 = vld [vmem:[%s9205_s3 + $0xd0] sm:$0xf] }
 0x34d   : > { %v5208_v37 = vor.u32 %v5832_v8, %v5207_v62  ;;  %v5792_v11 = vld [vmem:[%s9203_s1 + $0x1b0] sm:$0xff] }
 0x34e   : > { %v2014_v34 = vpop.f32.mrf.mxu0 }
 0x34f   : > { %v2015_v16 = vadd.f32 %v2014_v34, %v9355_v7  ;;  %v8013_v54 = vpop.f32.mrf.mxu3 }
 0x350   : > { %9356 = vst [vmem:[#allocation10_spill] sm:$0xff] %v8013_v54 }
 0x351   : > { %v2204_v55 = vmax.f32 %v2015_v16, 0.0  ;;  %v3555_v15 = vpop.f32.mrf.mxu1 }
 0x352   : > { %v8016_v63 = vadd.f32 %v3555_v15, %v7743_v49 }
 0x353   : > { %v8018_v57 = vpack.c.bf16 %v2204_v55, %v2203_v14 }
 0x354   : > { %3594 = vmatmul.bf16.gmra.mxu1 %v5428_v6  ;;  %3643 = vmatmul.bf16.gmra.mxu2 %v5176_v23  ;;  %v5489_v6 = vld [vmem:[%s9205_s3 + $0x328] sm:$0xf0]  ;;  %v5239_v23 = vld [vmem:[%s9205_s3 + $0x110] sm:$0xf] }
 0x356   : > { %v8025_v31 = vpop.f32.mrf.mxu0 }
 0x357   : > { %v3506_v59 = vpop.f32.mrf.mxu3 }
 0x358   : > { %v8027_v9 = vadd.f32 %v3506_v59, %v3418_v30 }
 0x359   : > { %5081 = vmatmul.msk.bf16.gmra.mxu0 %vm1595_vm0, %v5790_v18  ;;  %v3557_v49 = vpop.f32.mrf.mxu1 }
 0x35a   : > { %v8031_v42 = vadd.f32 %v3557_v49, %v7765_v39 }
 0x35e   : > { %v8045_v46 = vpop.f32.mrf.mxu0 }
 0x35f   : > { %v8047_v39 = vpop.f32.mrf.mxu3 }
 0x361   : > { %v3560_v36 = vpop.f32.mrf.mxu1 }
 0x362   : > { %v8050_v13 = vadd.f32 %v3560_v36, %v7775_v43  ;;  %v5899_v43 = vld [vmem:[%s9205_s3 + $0x30c] sm:$0xf] }
 0x364   : > { %3599 = vmatmul.bf16.gmra.mxu1 %v5460_v32  ;;  %3648 = vmatmul.bf16.gmra.mxu2 %v5208_v37 }
 0x366   : > { %v8055_v28 = vpop.f32.mrf.mxu0 }
 0x367   : > { %v3511_v53 = vpop.f32.mrf.mxu3 }
 0x368   : > { %v8058_v34 = vadd.f32 %v3511_v53, %v7779_v26  ;;  %v5840_v26 = vld [vmem:[%s9205_s3 + $0x12c] sm:$0xf0]  ;;  %v5793_v53 = vld [vmem:[%s9203_s1 + $0x1b8] sm:$0xff] }
 0x369   : > { %5082 = vmatmul.msk.bf16.gmra.mxu0 %vm1595_vm0, %v5791_v4  ;;  %v3562_v7 = vpop.f32.mrf.mxu1  ;;  %v5240_v55 = vor.u32 %v5840_v26, %v5239_v23  ;;  %v9360_v26 = vld [vmem:[#allocation16_spill] sm:$0xff] }
 0x36a   : > { %v8062_v16 = vadd.f32 %v3562_v7, %v7796_v27  ;;  %v5492_v27 = vor.u32 %v5899_v43, %v5489_v6 }
 0x36e   : > { %v2024_v19 = vpop.f32.mrf.mxu0 }
 0x36f   : > { %v8076_v14 = vpop.f32.mrf.mxu3  ;;  %v2025_v5 = vadd.f32 %v2024_v19, %v9364_v0  ;;  %v9367_v19 = vld [vmem:[#allocation24_spill] sm:$0xff] }
 0x371   : > { %v3565_v15 = vpop.f32.mrf.mxu1 }
 0x372   : > { %v8079_v24 = vadd.f32 %v3565_v15, %v7804_v29  ;;  %v5907_v29 = vld [vmem:[%s9205_s3 + $0x34c] sm:$0xf]  ;;  %v5303_v15 = vld [vmem:[%s9205_s3 + $0x190] sm:$0xf] }
 0x373   : > { %v5524_v32 = vor.u32 %v5907_v29, %v5521_v44  ;;  %v9362_v44 = vld [vmem:[#allocation23_spill] sm:$0xff] }
 0x374   : > { %3604 = vmatmul.bf16.gmra.mxu1 %v5492_v27  ;;  %3653 = vmatmul.bf16.gmra.mxu2 %v5240_v55  ;;  %v5553_v55 = vld [vmem:[%s9205_s3 + $0x3a8] sm:$0xf0] }
 0x376   : > { %v2027_v18 = vpop.f32.mrf.mxu0 }
 0x377   : > { %v3516_v30 = vpop.f32.mrf.mxu3 }
 0x378   : > { %v8085_v59 = vadd.f32 %v3516_v30, %v7808_v3  ;;  %v5848_v3 = vld [vmem:[%s9205_s3 + $0x16c] sm:$0xf0]  ;;  %v9361_v30 = vld [vmem:[#allocation19_spill] sm:$0xff] }
 0x379   : > { %5083 = vmatmul.msk.bf16.gmra.mxu0 %vm1595_vm0, %v5792_v11  ;;  %v8088_v49 = vpop.f32.mrf.mxu1  ;;  %v5272_v37 = vor.u32 %v5848_v3, %v5271_v48 }
 0x37a   : > { %9358 = vst [vmem:[#allocation11_spill] sm:$0xff] %v8088_v49  ;;  %v9388_v49 = vld [vmem:[#allocation33_spill] sm:$0xff] }
 0x37e   : > { %v2029_v62 = vpop.f32.mrf.mxu0 }
 0x37f   : > { %v8102_v8 = vpop.f32.mrf.mxu3  ;;  %v2030_v29 = vadd.f32 %v2029_v62, %v9361_v30  ;;  %v9365_v62 = vld [vmem:[#allocation20_spill] sm:$0xff] }
 0x381   : > { %v3570_v36 = vpop.f32.mrf.mxu1  ;;  %v2210_v2 = vmax.f32 %v2030_v29, 0.0 }
 0x382   : > { %v8105_v4 = vadd.f32 %v3570_v36, %v7830_v50  ;;  %v5915_v50 = vld [vmem:[%s9205_s3 + $0x38c] sm:$0xf]  ;;  %v9363_v36 = vld [vmem:[#allocation22_spill] sm:$0xff] }
 0x384   : > { %3609 = vmatmul.bf16.gmra.mxu1 %v5524_v32  ;;  %3658 = vmatmul.bf16.gmra.mxu2 %v5272_v37  ;;  %v5556_v32 = vor.u32 %v5915_v50, %v5553_v55  ;;  %v2208_v55 = vmax.f32 %v2025_v5, 0.0  ;;  %v5923_v5 = vld [vmem:[%s9205_s3 + $0x3cc] sm:$0xf] }
 0x386   : > { %v2032_v7 = vpop.f32.mrf.mxu0 }
 0x387   : > { %v3521_v43 = vpop.f32.mrf.mxu3  ;;  %v2033_v27 = vadd.f32 %v2032_v7, %v9360_v26 }
 0x388   : > { %v8111_v6 = vadd.f32 %v3521_v43, %v7834_v56  ;;  %v5856_v56 = vld [vmem:[%s9205_s3 + $0x1ac] sm:$0xf0] }
 0x389   : > { %5084 = vmatmul.msk.bf16.gmra.mxu0 %vm1595_vm0, %v5793_v53  ;;  %v8114_v23 = vpop.f32.mrf.mxu1  ;;  %v5304_v37 = vor.u32 %v5856_v56, %v5303_v15  ;;  %v2028_v53 = vadd.f32 %v2027_v18, %v9363_v36  ;;  %v2211_v7 = vmax.f32 %v2033_v27, 0.0  ;;  %v5794_v18 = vld [vmem:[%s9203_s1 + $0x1c0] sm:$0xff]  ;;  %v9366_v27 = vld [vmem:[#allocation35_spill] sm:$0xff]  ;;  %v2018_v56 = vadd.f32 %v8025_v31, %v9367_v19  ;;  %v5335_v31 = vld [vmem:[%s9205_s3 + $0x1d0] sm:$0xf] }
 0x38a   : > { %9359 = vst [vmem:[#allocation26_spill] sm:$0xff] %v8114_v23 }
 0x38b   : > { %v2209_v30 = vmax.f32 %v2028_v53, 0.0  ;;  %v9370_v53 = vld [vmem:[#allocation65_spill] sm:$0xff] }
 0x38d   : > { %v2291_v15 = vpack.c.bf16 %v2210_v2, %v2209_v30  ;;  %v9369_v2 = vld [vmem:[#allocation66_spill] sm:$0xff] }
 0x38e   : > { %v2034_v11 = vpop.f32.mrf.mxu0 }
 0x38f   : > { %v2035_v48 = vadd.f32 %v2034_v11, %v9362_v44  ;;  %v8131_v3 = vpop.f32.mrf.mxu3  ;;  %v2023_v11 = vadd.f32 %v8055_v28, %v9365_v62 }
 0x391   : > { %v2212_v43 = vmax.f32 %v2035_v48, 0.0  ;;  %v3575_v26 = vpop.f32.mrf.mxu1  ;;  %v2207_v28 = vmax.f32 %v2023_v11, 0.0 }
 0x392   : > { %v8135_v54 = vadd.f32 %v3575_v26, %v7867_v38  ;;  %v2020_v38 = vadd.f32 %v8045_v46, %v9366_v27 }
 0x393   : > { %v2292_v25 = vpack.c.bf16 %v2212_v43, %v2211_v7  ;;  %v2290_v48 = vpack.c.bf16 %v2208_v55, %v2207_v28  ;;  %v5795_v55 = vld [vmem:[%s9203_s1 + $0x1c8] sm:$0xff] }
 0x394   : > { %3614 = vmatmul.bf16.gmra.mxu1 %v5556_v32  ;;  %3663 = vmatmul.bf16.gmra.mxu2 %v5304_v37  ;;  %v2206_v44 = vmax.f32 %v2020_v38, 0.0  ;;  %v2205_v32 = vmax.f32 %v2018_v56, 0.0  ;;  %v5864_v37 = vld [vmem:[%s9205_s3 + $0x1ec] sm:$0xf0] }
 0x395   : > { %3714 = vmatpush.bf16.msra.mxu3 %v2292_v25  ;;  %v5336_v11 = vor.u32 %v5864_v37, %v5335_v31 }
 0x396   : > { %v2037_v50 = vpop.f32.mrf.mxu0  ;;  %v2289_v26 = vpack.c.bf16 %v2206_v44, %v2205_v32  ;;  %v5872_v44 = vld [vmem:[%s9205_s3 + $0x22c] sm:$0xf0]  ;;  %v8199_v32 = vpop.f32.mrf.mxu2 }
 0x397   : > { %v3526_v0 = vpop.f32.mrf.mxu3  ;;  %v2038_v46 = vadd.f32 %v2037_v50, %v9369_v2  ;;  %9374 = vst [vmem:[#allocation42_spill] sm:$0xff] %v8199_v32 }
 0x398   : > { %v8148_v29 = vadd.f32 %v3526_v0, %v7871_v52  ;;  %v5585_v52 = vld [vmem:[%s9205_s3 + $0x3e8] sm:$0xf0] }
 0x399   : > { %5085 = vmatmul.msk.bf16.gmra.mxu0 %vm1595_vm0, %v5794_v18  ;;  %v8151_v25 = vpop.f32.mrf.mxu1  ;;  %3715 = vmatpush.bf16.msra.mxu3 %v2291_v15  ;;  %v5588_v62 = vor.u32 %v5923_v5, %v5585_v52  ;;  %v2213_v30 = vmax.f32 %v2038_v46, 0.0  ;;  %v9375_v5 = vld [vmem:[#allocation63_spill] sm:$0xff] }
 0x39a   : > { %9368 = vst [vmem:[#allocation25_spill] sm:$0xff] %v8151_v25 }
 0x39d   : > { %3716 = vmatpush.bf16.msra.mxu3 %v2290_v48 }
 0x39e   : > { %v2039_v36 = vpop.f32.mrf.mxu0 }
 0x39f   : > { %v2040_v7 = vadd.f32 %v2039_v36, %v9370_v53  ;;  %v8167_v43 = vpop.f32.mrf.mxu3 }
 0x3a0   : > { %9371 = vst [vmem:[#allocation32_spill] sm:$0xff] %v8167_v43 }
 0x3a1   : > { %v2214_v18 = vmax.f32 %v2040_v7, 0.0  ;;  %v3580_v50 = vpop.f32.mrf.mxu1  ;;  %3717 = vmatpush.bf16.msra.mxu3 %v2289_v26 }
 0x3a2   : > { %v8170_v27 = vadd.f32 %v3580_v50, %v7904_v60  ;;  %v5367_v60 = vld [vmem:[%s9205_s3 + $0x210] sm:$0xf]  ;;  %v5812_v50 = vld [vmem:[%s9205_s3 + $0x54] sm:$0xf] }
 0x3a3   : > { %v8172_v38 = vpack.c.bf16 %v2214_v18, %v2213_v30  ;;  %v5368_v46 = vor.u32 %v5872_v44, %v5367_v60  ;;  %v5399_v30 = vld [vmem:[%s9205_s3 + $0x250] sm:$0xf] }
 0x3a4   : > { %3619 = vmatmul.bf16.gmra.mxu1 %v5588_v62  ;;  %3668 = vmatmul.bf16.gmra.mxu2 %v5336_v11  ;;  %v9377_v18 = vld [vmem:[#allocation56_spill] sm:$0xff] }
 0x3a5   : > { %3718 = vmatpush.bf16.msra.mxu3 %v8018_v57  ;;  %v9373_v57 = vld [vmem:[#allocation52_spill] sm:$0xff] }
 0x3a6   : > { %v2042_v15 = vpop.f32.mrf.mxu0 }
 0x3a7   : > { %v3531_v0 = vpop.f32.mrf.mxu3  ;;  %v2043_v28 = vadd.f32 %v2042_v15, %v9373_v57  ;;  %v9378_v15 = vld [vmem:[#allocation50_spill] sm:$0xff] }
 0x3a8   : > { %v8179_v19 = vadd.f32 %v3531_v0, %v7910_v40  ;;  %v5804_v40 = vld [vmem:[%s9205_s3 + $0x14] sm:$0xf] }
 0x3a9   : > { %5086 = vmatmul.msk.bf16.gmra.mxu0 %vm1595_vm0, %v5795_v55  ;;  %v8182_v56 = vpop.f32.mrf.mxu1  ;;  %3719 = vmatpush.bf16.msra.mxu3 %v7984_v35  ;;  %v5113_v35 = vld [vmem:[%s9205_s3 + $0x30] sm:$0xf0] }
 0x3aa   : > { %9372 = vst [vmem:[#allocation31_spill] sm:$0xff] %v8182_v56  ;;  %v5116_v52 = vor.u32 %v5804_v40, %v5113_v35  ;;  %v9387_v56 = vld [vmem:[#allocation34_spill] sm:$0xff] }
 0x3ad   : > { %3720 = vmatpush.bf16.msra.mxu3 %v7941_v21  ;;  %v2215_v21 = vmax.f32 %v2043_v28, 0.0 }
 0x3ae   : > { %v2044_v48 = vpop.f32.mrf.mxu0 }
 0x3af   : > { %v2045_v2 = vadd.f32 %v2044_v48, %v9375_v5 }
 0x3b1   : > { %v2216_v31 = vmax.f32 %v2045_v2, 0.0  ;;  %v3585_v37 = vpop.f32.mrf.mxu1  ;;  %3721 = vmatpush.bf16.msra.mxu3 %v7891_v1 }
 0x3b2   : > { %v8204_v36 = vadd.f32 %v3585_v37, %v7955_v33  ;;  %v5880_v33 = vld [vmem:[%s9205_s3 + $0x26c] sm:$0xf0]  ;;  %v9380_v37 = vld [vmem:[#allocation51_spill] sm:$0xff] }
 0x3b3   : > { %v8206_v53 = vpack.c.bf16 %v2216_v31, %v2215_v21  ;;  %v5400_v28 = vor.u32 %v5880_v33, %v5399_v30 }
 0x3b4   : > { %3673 = vmatmul.bf16.gmra.mxu2 %v5368_v46  ;;  %3722 = vmatmul.bf16.vlgmr.msra.gmra.mxu3 %v5116_v52 }
 0x3b6   : > { %v2047_v7 = vpop.f32.mrf.mxu0 }
 0x3b7   : > { %v3634_v26 = vpop.f32.mrf.mxu2  ;;  %v2048_v1 = vadd.f32 %v2047_v7, %v9377_v18  ;;  %v9381_v18 = vld [vmem:[#allocation45_spill] sm:$0xff] }
 0x3b8   : > { %v8209_v62 = vadd.f32 %v3634_v26, %v7939_v51  ;;  %v5145_v51 = vld [vmem:[%s9205_s3 + $0x70] sm:$0xf0] }
 0x3b9   : > { %v8211_v11 = vpop.f32.mrf.mxu1  ;;  %v5148_v44 = vor.u32 %v5812_v50, %v5145_v51  ;;  %v2217_v40 = vmax.f32 %v2048_v1, 0.0  ;;  %v5820_v26 = vld [vmem:[%s9205_s3 + $0x94] sm:$0xf] }
 0x3ba   : > { %9376 = vst [vmem:[#allocation37_spill] sm:$0xff] %v8211_v11  ;;  %v9384_v11 = vld [vmem:[#allocation28_spill] sm:$0xff] }
 0x3be   : > { %v2049_v55 = vpop.f32.mrf.mxu0 }
 0x3bf   : > { %v2050_v0 = vadd.f32 %v2049_v55, %v9378_v15  ;;  %v3636_v60 = vpop.f32.mrf.mxu2 }
 0x3c0   : > { %v8228_v57 = vadd.f32 %v3636_v60, %v7959_v12  ;;  %v5431_v12 = vld [vmem:[%s9205_s3 + $0x290] sm:$0xf] }
 0x3c1   : > { %v2218_v35 = vmax.f32 %v2050_v0, 0.0  ;;  %v3590_v48 = vpop.f32.mrf.mxu1 }
 0x3c2   : > { %v8231_v5 = vadd.f32 %v3590_v48, %v7993_v17  ;;  %v5888_v17 = vld [vmem:[%s9205_s3 + $0x2ac] sm:$0xf0] }
 0x3c3   : > { %v8233_v2 = vpack.c.bf16 %v2218_v35, %v2217_v40  ;;  %v5432_v51 = vor.u32 %v5888_v17, %v5431_v12  ;;  %v5209_v12 = vld [vmem:[%s9205_s3 + $0xf0] sm:$0xf0] }
 0x3c4   : > { %3678 = vmatmul.bf16.gmra.mxu2 %v5400_v28  ;;  %3727 = vmatmul.bf16.gmra.mxu3 %v5148_v44 }
 0x3c6   : > { %v2052_v46 = vpop.f32.mrf.mxu0 }
 0x3c7   : > { %v3639_v52 = vpop.f32.mrf.mxu2  ;;  %v2053_v7 = vadd.f32 %v2052_v46, %v9380_v37  ;;  %v5463_v46 = vld [vmem:[%s9205_s3 + $0x2d0] sm:$0xf] }
 0x3c8   : > { %v8236_v21 = vadd.f32 %v3639_v52, %v7982_v22  ;;  %v5177_v22 = vld [vmem:[%s9205_s3 + $0xb0] sm:$0xf0] }
 0x3c9   : > { %v8238_v31 = vpop.f32.mrf.mxu1  ;;  %v5180_v55 = vor.u32 %v5820_v26, %v5177_v22  ;;  %v2219_v15 = vmax.f32 %v2053_v7, 0.0  ;;  %v5828_v52 = vld [vmem:[%s9205_s3 + $0xd4] sm:$0xf] }
 0x3ca   : > { %9379 = vst [vmem:[#allocation38_spill] sm:$0xff] %v8238_v31  ;;  %v5212_v26 = vor.u32 %v5828_v52, %v5209_v12  ;;  %v5559_v31 = vld [vmem:[%s9205_s3 + $0x390] sm:$0xf] }
 0x3ce   : > { %v2054_v30 = vpop.f32.mrf.mxu0 }
 0x3cf   : > { %v2055_v1 = vadd.f32 %v2054_v30, %v9381_v18  ;;  %v3641_v33 = vpop.f32.mrf.mxu2 }
 0x3d0   : > { %v8255_v50 = vadd.f32 %v3641_v33, %v7997_v45 }
 0x3d1   : > { %v2220_v0 = vmax.f32 %v2055_v1, 0.0  ;;  %v3595_v60 = vpop.f32.mrf.mxu1 }
 0x3d2   : > { %v8258_v28 = vadd.f32 %v3595_v60, %v8027_v9  ;;  %v5896_v9 = vld [vmem:[%s9205_s3 + $0x2ec] sm:$0xf0] }
 0x3d3   : > { %v8260_v44 = vpack.c.bf16 %v2220_v0, %v2219_v15  ;;  %v5464_v17 = vor.u32 %v5896_v9, %v5463_v46  ;;  %v5241_v15 = vld [vmem:[%s9205_s3 + $0x130] sm:$0xf0] }
 0x3d4   : > { %3683 = vmatmul.bf16.gmra.mxu2 %v5432_v51  ;;  %3732 = vmatmul.bf16.gmra.mxu3 %v5180_v55  ;;  %v5904_v55 = vld [vmem:[%s9205_s3 + $0x32c] sm:$0xf0] }
 0x3d6   : > { %v8262_v40 = vpop.f32.mrf.mxu0 }
 0x3d7   : > { %v3644_v35 = vpop.f32.mrf.mxu2 }
 0x3d8   : > { %v8265_v48 = vadd.f32 %v3644_v35, %v8016_v63 }
 0x3d9   : > { %v8267_v45 = vpop.f32.mrf.mxu1 }
 0x3de   : > { %v8281_v63 = vpop.f32.mrf.mxu0 }
 0x3df   : > { %v3646_v37 = vpop.f32.mrf.mxu2 }
 0x3e0   : > { %v8284_v7 = vadd.f32 %v3646_v37, %v8031_v42  ;;  %v5495_v42 = vld [vmem:[%s9205_s3 + $0x310] sm:$0xf] }
 0x3e1   : > { %v3600_v22 = vpop.f32.mrf.mxu1  ;;  %v5496_v35 = vor.u32 %v5904_v55, %v5495_v42 }
 0x3e2   : > { %v8287_v30 = vadd.f32 %v3600_v22, %v8058_v34  ;;  %v5836_v34 = vld [vmem:[%s9205_s3 + $0x114] sm:$0xf]  ;;  %v5912_v22 = vld [vmem:[%s9205_s3 + $0x36c] sm:$0xf0] }
 0x3e3   : > { %v5244_v46 = vor.u32 %v5836_v34, %v5241_v15 }
 0x3e4   : > { %3688 = vmatmul.bf16.gmra.mxu2 %v5464_v17  ;;  %3737 = vmatmul.bf16.gmra.mxu3 %v5212_v26 }
 0x3e6   : > { %v2062_v18 = vpop.f32.mrf.mxu0 }
 0x3e7   : > { %v3649_v1 = vpop.f32.mrf.mxu2 }
 0x3e8   : > { %v8290_v33 = vadd.f32 %v3649_v1, %v8050_v13  ;;  %v5273_v1 = vld [vmem:[%s9205_s3 + $0x170] sm:$0xf0] }
 0x3e9   : > { %v8292_v51 = vpop.f32.mrf.mxu1 }
 0x3ee   : > { %v2064_v13 = vpop.f32.mrf.mxu0 }
 0x3ef   : > { %v3651_v0 = vpop.f32.mrf.mxu2  ;;  %v2065_v32 = vadd.f32 %v2064_v13, %v9388_v49 }
 0x3f0   : > { %v8307_v60 = vadd.f32 %v3651_v0, %v8062_v16  ;;  %v5527_v16 = vld [vmem:[%s9205_s3 + $0x350] sm:$0xf] }
 0x3f1   : > { %v3605_v9 = vpop.f32.mrf.mxu1  ;;  %v5528_v55 = vor.u32 %v5912_v22, %v5527_v16  ;;  %v5852_v22 = vld [vmem:[%s9205_s3 + $0x194] sm:$0xf] }
 0x3f2   : > { %v8310_v52 = vadd.f32 %v3605_v9, %v8085_v59  ;;  %v5844_v59 = vld [vmem:[%s9205_s3 + $0x154] sm:$0xf] }
 0x3f3   : > { %v5276_v34 = vor.u32 %v5844_v59, %v5273_v1  ;;  %v9385_v1 = vld [vmem:[#allocation27_spill] sm:$0xff] }
 0x3f4   : > { %3693 = vmatmul.bf16.gmra.mxu2 %v5496_v35  ;;  %3742 = vmatmul.bf16.gmra.mxu3 %v5244_v46 }
 0x3f6   : > { %v2067_v12 = vpop.f32.mrf.mxu0 }
 0x3f7   : > { %v3654_v37 = vpop.f32.mrf.mxu2  ;;  %v2068_v25 = vadd.f32 %v2067_v12, %v9387_v56  ;;  %v2224_v12 = vmax.f32 %v2065_v32, 0.0  ;;  %v5337_v32 = vld [vmem:[%s9205_s3 + $0x1f0] sm:$0xf0] }
 0x3f8   : > { %v8313_v17 = vadd.f32 %v3654_v37, %v8079_v24 }
 0x3f9   : > { %v8315_v26 = vpop.f32.mrf.mxu1 }
 0x3fe   : > { %v2069_v24 = vpop.f32.mrf.mxu0 }
 0x3ff   : > { %v8329_v42 = vpop.f32.mrf.mxu2 }
 0x400   : > { %9382 = vst [vmem:[#allocation86_spill] sm:$0xff] %v8329_v42 }
 0x401   : > { %v3610_v15 = vpop.f32.mrf.mxu1 }
 0x402   : > { %v8332_v0 = vadd.f32 %v3610_v15, %v8111_v6  ;;  %v5920_v6 = vld [vmem:[%s9205_s3 + $0x3ac] sm:$0xf0] }
 0x404   : > { %3698 = vmatmul.bf16.gmra.mxu2 %v5528_v55  ;;  %3747 = vmatmul.bf16.gmra.mxu3 %v5276_v34  ;;  %v2070_v55 = vadd.f32 %v2069_v24, %v9385_v1  ;;  %v9386_v34 = vld [vmem:[#allocation21_spill] sm:$0xff]  ;;  %v9389_v24 = vld [vmem:[#allocation40_spill] sm:$0xff]  ;;  %v2225_v1 = vmax.f32 %v2068_v25, 0.0 }
 0x406   : > { %v2072_v35 = vpop.f32.mrf.mxu0  ;;  %v2226_v43 = vmax.f32 %v2070_v55, 0.0 }
 0x407   : > { %v3659_v46 = vpop.f32.mrf.mxu2  ;;  %v2073_v16 = vadd.f32 %v2072_v35, %v9384_v11  ;;  %v5560_v11 = vor.u32 %v5920_v6, %v5559_v31  ;;  %v9390_v6 = vld [vmem:[#allocation39_spill] sm:$0xff] }
 0x408   : > { %v8335_v9 = vadd.f32 %v3659_v46, %v8105_v4  ;;  %v5305_v4 = vld [vmem:[%s9205_s3 + $0x1b0] sm:$0xf0]  ;;  %v2060_v56 = vadd.f32 %v8281_v63, %v9390_v6  ;;  %v5591_v63 = vld [vmem:[%s9205_s3 + $0x3d0] sm:$0xf]  ;;  %v9392_v6 = vld [vmem:[#allocation59_spill] sm:$0xff] }
 0x409   : > { %v8337_v37 = vpop.f32.mrf.mxu1  ;;  %v5308_v35 = vor.u32 %v5852_v22, %v5305_v4  ;;  %v9391_v4 = vld [vmem:[#allocation46_spill] sm:$0xff] }
 0x40a   : > { %9383 = vst [vmem:[#allocation43_spill] sm:$0xff] %v8335_v9  ;;  %v2227_v9 = vmax.f32 %v2073_v16, 0.0  ;;  %v2299_v16 = vpack.c.bf16 %v2226_v43, %v2225_v1  ;;  %v5928_v43 = vld [vmem:[%s9205_s3 + $0x3ec] sm:$0xf0]  ;;  %v5868_v1 = vld [vmem:[%s9205_s3 + $0x214] sm:$0xf] }
 0x40b   : > { %v5592_v55 = vor.u32 %v5928_v43, %v5591_v63 }
 0x40e   : > { %v2074_v59 = vpop.f32.mrf.mxu0 }
 0x40f   : > { %v2075_v15 = vadd.f32 %v2074_v59, %v9386_v34  ;;  %v8354_v46 = vpop.f32.mrf.mxu2  ;;  %v2063_v59 = vadd.f32 %v2062_v18, %v9389_v24  ;;  %v2222_v18 = vmax.f32 %v2060_v56, 0.0 }
 0x411   : > { %v2228_v23 = vmax.f32 %v2075_v15, 0.0  ;;  %v3615_v10 = vpop.f32.mrf.mxu1 }
 0x412   : > { %v8358_v42 = vadd.f32 %v3615_v10, %v8148_v29  ;;  %v2058_v10 = vadd.f32 %v8262_v40, %v9391_v4  ;;  %v9394_v4 = vld [vmem:[#allocation58_spill] sm:$0xff] }
 0x413   : > { %v2300_v20 = vpack.c.bf16 %v2228_v23, %v2227_v9  ;;  %v2223_v23 = vmax.f32 %v2063_v59, 0.0 }
 0x414   : > { %3703 = vmatmul.bf16.gmra.mxu2 %v5560_v11  ;;  %3752 = vmatmul.bf16.gmra.mxu3 %v5308_v35 }
 0x415   : > { %3803 = vmatpush.bf16.msra.mxu1 %v2300_v20  ;;  %v2298_v25 = vpack.c.bf16 %v2224_v12, %v2223_v23  ;;  %v2221_v20 = vmax.f32 %v2058_v10, 0.0  ;;  %v8407_v12 = vpop.f32.mrf.mxu3 }
 0x416   : > { %v2077_v31 = vpop.f32.mrf.mxu0 }
 0x417   : > { %v3664_v22 = vpop.f32.mrf.mxu2  ;;  %v2297_v13 = vpack.c.bf16 %v2222_v18, %v2221_v20 }
 0x418   : > { %v8367_v49 = vadd.f32 %v3664_v22, %v8135_v54  ;;  %v5860_v54 = vld [vmem:[%s9205_s3 + $0x1d4] sm:$0xf] }
 0x419   : > { %v8369_v29 = vpop.f32.mrf.mxu1  ;;  %3804 = vmatpush.bf16.msra.mxu1 %v2299_v16  ;;  %v5340_v34 = vor.u32 %v5860_v54, %v5337_v32  ;;  %v9393_v16 = vld [vmem:[#allocation55_spill] sm:$0xff] }
 0x41d   : > { %3805 = vmatpush.bf16.msra.mxu1 %v2298_v25  ;;  %v9395_v25 = vld [vmem:[#allocation62_spill] sm:$0xff] }
 0x41e   : > { %v2079_v40 = vpop.f32.mrf.mxu0  ;;  %v2078_v20 = vadd.f32 %v2077_v31, %v9395_v25  ;;  %v5884_v25 = vld [vmem:[%s9205_s3 + $0x294] sm:$0xf] }
 0x41f   : > { %v8383_v9 = vpop.f32.mrf.mxu2  ;;  %v2080_v22 = vadd.f32 %v2079_v40, %v9393_v16  ;;  %v5805_v40 = vld [vmem:[%s9205_s3 + $0x1c] sm:$0xf] }
 0x420   : > { %v5813_v16 = vld [vmem:[%s9205_s3 + $0x5c] sm:$0xf] }
 0x421   : > { %v3620_v15 = vpop.f32.mrf.mxu1  ;;  %3806 = vmatpush.bf16.msra.mxu1 %v2297_v13  ;;  %v2230_v54 = vmax.f32 %v2080_v22, 0.0  ;;  %v2229_v13 = vmax.f32 %v2078_v20, 0.0  ;;  %v5153_v22 = vld [vmem:[%s9205_s3 + $0x78] sm:$0xf0]  ;;  %v5433_v20 = vld [vmem:[%s9205_s3 + $0x2b0] sm:$0xf0] }
 0x422   : > { %v8386_v11 = vadd.f32 %v3620_v15, %v8179_v19  ;;  %v5369_v19 = vld [vmem:[%s9205_s3 + $0x230] sm:$0xf0] }
 0x423   : > { %v5372_v23 = vor.u32 %v5868_v1, %v5369_v19  ;;  %v5876_v1 = vld [vmem:[%s9205_s3 + $0x254] sm:$0xf] }
 0x424   : > { %3708 = vmatmul.bf16.gmra.mxu2 %v5592_v55  ;;  %3757 = vmatmul.bf16.gmra.mxu3 %v5340_v34  ;;  %v5121_v55 = vld [vmem:[%s9205_s3 + $0x38] sm:$0xf0]  ;;  %v2301_v34 = vpack.c.bf16 %v2230_v54, %v2229_v13 }
 0x425   : > { %3807 = vmatpush.bf16.msra.mxu1 %v8260_v44  ;;  %v5119_v44 = vld [vmem:[%s9205_s3 + $0x18] sm:$0xf] }
 0x426   : > { %v2082_v35 = vpop.f32.mrf.mxu0 }
 0x427   : > { %v3669_v24 = vpop.f32.mrf.mxu2  ;;  %v2083_v56 = vadd.f32 %v2082_v35, %v9392_v6  ;;  %v5401_v6 = vld [vmem:[%s9205_s3 + $0x270] sm:$0xf0] }
 0x428   : > { %v8390_v59 = vadd.f32 %v3669_v24, %v8170_v27  ;;  %v5809_v27 = vld [vmem:[%s9205_s3 + $0x34] sm:$0xf0]  ;;  %v5124_v24 = vor.u32 %v5805_v40, %v5121_v55  ;;  %v5821_v40 = vld [vmem:[%s9205_s3 + $0x9c] sm:$0xf] }
 0x429   : > { %3808 = vmatpush.bf16.msra.mxu1 %v8233_v2  ;;  %v5120_v18 = vor.u32 %v5809_v27, %v5119_v44  ;;  %v2231_v63 = vmax.f32 %v2083_v56, 0.0  ;;  %v5151_v56 = vld [vmem:[%s9205_s3 + $0x58] sm:$0xf]  ;;  %v5404_v27 = vor.u32 %v5876_v1, %v5401_v6  ;;  %v5185_v55 = vld [vmem:[%s9205_s3 + $0xb8] sm:$0xf0] }
 0x42a   : > { %v5188_v6 = vor.u32 %v5821_v40, %v5185_v55  ;;  %v5900_v55 = vld [vmem:[%s9205_s3 + $0x314] sm:$0xf] }
 0x42d   : > { %3809 = vmatpush.bf16.msra.mxu1 %v8206_v53 }
 0x42e   : > { %v2084_v2 = vpop.f32.mrf.mxu0 }
 0x42f   : > { %v2085_v10 = vadd.f32 %v2084_v2, %v9394_v4  ;;  %v8411_v53 = vpop.f32.mrf.mxu2 }
 0x431   : > { %v2232_v43 = vmax.f32 %v2085_v10, 0.0  ;;  %3810 = vmatpush.bf16.msra.mxu1 %v8172_v38 }
 0x433   : > { %v2302_v32 = vpack.c.bf16 %v2232_v43, %v2231_v63  ;;  %v5183_v63 = vld [vmem:[%s9205_s3 + $0x98] sm:$0xf] }
 0x434   : > { %3762 = vmatmul.bf16.gmra.mxu3 %v5372_v23  ;;  %3811 = vmatmul.bf16.vlgmr.msra.gmra.mxu1 %v5120_v18  ;;  %v5156_v18 = vor.u32 %v5813_v16, %v5153_v22 }
 0x435   : > { %3898 = vmatpush.bf16.msrb.mxu2 %v2302_v32  ;;  %v5436_v32 = vor.u32 %v5884_v25, %v5433_v20  ;;  %v9397_v20 = vld [vmem:[#allocation72_spill] sm:$0xff] }
 0x437   : > { %v3674_v31 = vpop.f32.mrf.mxu2  ;;  %v3723_v15 = vpop.f32.mrf.mxu3 }
 0x438   : > { %v8422_v35 = vadd.f32 %v3674_v31, %v8204_v36  ;;  %v8425_v38 = vadd.f32 %v3723_v15, %v8209_v62  ;;  %v5817_v36 = vld [vmem:[%s9205_s3 + $0x74] sm:$0xf0]  ;;  %v9396_v15 = vld [vmem:[#allocation68_spill] sm:$0xff] }
 0x439   : > { %3899 = vmatpush.bf16.msrb.mxu2 %v2301_v34  ;;  %v5152_v2 = vor.u32 %v5817_v36, %v5151_v56 }
 0x43c   : > { %3900 = vmatmul.bf16.vlgmr.msrb.gmra.mxu2 %v5124_v24  ;;  %v3331_v24 = vadd.f32 %v9396_v15, %v7653_v41  ;;  %v5465_v41 = vld [vmem:[%s9205_s3 + $0x2f0] sm:$0xf0] }
 0x43e   : > { %v3420_v56 = vadd.f32 %v7767_v47, %v3331_v24 }
 0x43f   : > { %v8439_v62 = vpop.f32.mrf.mxu2  ;;  %v3725_v19 = vpop.f32.mrf.mxu3 }
 0x440   : > { %v8442_v44 = vadd.f32 %v3725_v19, %v8228_v57  ;;  %v3509_v36 = vadd.f32 %v8047_v39, %v3420_v56  ;;  %v5892_v19 = vld [vmem:[%s9205_s3 + $0x2d4] sm:$0xf] }
 0x441   : > { %v5468_v22 = vor.u32 %v5892_v19, %v5465_v41  ;;  %v5249_v19 = vld [vmem:[%s9205_s3 + $0x138] sm:$0xf0] }
 0x442   : > { %v3598_v47 = vadd.f32 %v8267_v45, %v3509_v36  ;;  %v5837_v36 = vld [vmem:[%s9205_s3 + $0x11c] sm:$0xf] }
 0x444   : > { %3767 = vmatmul.bf16.gmra.mxu3 %v5404_v27  ;;  %3816 = vmatmul.bf16.gmra.mxu1 %v5152_v2 }
 0x447   : > { %v3679_v4 = vpop.f32.mrf.mxu2  ;;  %v3728_v10 = vpop.f32.mrf.mxu3 }
 0x448   : > { %v8451_v23 = vadd.f32 %v3679_v4, %v8231_v5  ;;  %v8454_v57 = vadd.f32 %v3728_v10, %v8236_v21  ;;  %v5825_v5 = vld [vmem:[%s9205_s3 + $0xb4] sm:$0xf0]  ;;  %v5829_v10 = vld [vmem:[%s9205_s3 + $0xdc] sm:$0xf] }
 0x449   : > { %v5184_v13 = vor.u32 %v5825_v5, %v5183_v63  ;;  %v3336_v63 = vadd.f32 %v9397_v20, %v7991_v58  ;;  %v5497_v58 = vld [vmem:[%s9205_s3 + $0x330] sm:$0xf0] }
 0x44c   : > { %3905 = vmatmul.bf16.gmra.mxu2 %v5156_v18  ;;  %v5217_v18 = vld [vmem:[%s9205_s3 + $0xf8] sm:$0xf0] }
 0x44f   : > { %v8468_v21 = vpop.f32.mrf.mxu2  ;;  %v3730_v43 = vpop.f32.mrf.mxu3 }
 0x450   : > { %v8471_v54 = vadd.f32 %v3730_v43, %v8255_v50  ;;  %v5220_v43 = vor.u32 %v5829_v10, %v5217_v18  ;;  %v5529_v10 = vld [vmem:[%s9205_s3 + $0x370] sm:$0xf0] }
 0x454   : > { %3772 = vmatmul.bf16.gmra.mxu3 %v5436_v32  ;;  %3821 = vmatmul.bf16.gmra.mxu1 %v5184_v13  ;;  %v9398_v32 = vld [vmem:[#allocation14_spill] sm:$0xff] }
 0x455   : > { %v3425_v13 = vadd.f32 %v9398_v32, %v3336_v63  ;;  %v5281_v32 = vld [vmem:[%s9205_s3 + $0x178] sm:$0xf0] }
 0x457   : > { %v3684_v34 = vpop.f32.mrf.mxu2  ;;  %v3733_v31 = vpop.f32.mrf.mxu3  ;;  %v3514_v40 = vadd.f32 %v8076_v14, %v3425_v13 }
 0x458   : > { %v8482_v50 = vadd.f32 %v3684_v34, %v8258_v28  ;;  %v8485_v1 = vadd.f32 %v3733_v31, %v8265_v48  ;;  %v5215_v28 = vld [vmem:[%s9205_s3 + $0xd8] sm:$0xf] }
 0x459   : > { %v5833_v48 = vld [vmem:[%s9205_s3 + $0xf4] sm:$0xf0]  ;;  %v3603_v34 = vadd.f32 %v8292_v51, %v3514_v40 }
 0x45a   : > { %v5216_v4 = vor.u32 %v5833_v48, %v5215_v28  ;;  %v5252_v48 = vor.u32 %v5837_v36, %v5249_v19 }
 0x45c   : > { %3910 = vmatmul.bf16.gmra.mxu2 %v5188_v6  ;;  %v5500_v6 = vor.u32 %v5900_v55, %v5497_v58  ;;  %v9402_v55 = vld [vmem:[#allocation75_spill] sm:$0xff] }
 0x45f   : > { %v3686_v39 = vpop.f32.mrf.mxu2  ;;  %v3735_v27 = vpop.f32.mrf.mxu3 }
 0x460   : > { %v8502_v2 = vadd.f32 %v3686_v39, %v3598_v47  ;;  %v8505_v16 = vadd.f32 %v3735_v27, %v8284_v7  ;;  %v9399_v47 = vld [vmem:[#allocation76_spill] sm:$0xff] }
 0x461   : > { %v9400_v39 = vld [vmem:[#allocation12_spill] sm:$0xff] }
 0x462   : > { %v3430_v27 = vadd.f32 %v9400_v39, %v9399_v47  ;;  %v5313_v47 = vld [vmem:[%s9205_s3 + $0x1b8] sm:$0xf0] }
 0x464   : > { %3777 = vmatmul.bf16.gmra.mxu3 %v5468_v22  ;;  %3826 = vmatmul.bf16.gmra.mxu1 %v5216_v4  ;;  %v3519_v22 = vadd.f32 %v8102_v8, %v3430_v27  ;;  %v5908_v4 = vld [vmem:[%s9205_s3 + $0x354] sm:$0xf] }
 0x465   : > { %v5532_v20 = vor.u32 %v5908_v4, %v5529_v10 }
 0x466   : > { %v3608_v18 = vadd.f32 %v8315_v26, %v3519_v22  ;;  %v9401_v26 = vld [vmem:[#allocation71_spill] sm:$0xff]  ;;  %v9404_v22 = vld [vmem:[#allocation77_spill] sm:$0xff] }
 0x467   : > { %v3689_v45 = vpop.f32.mrf.mxu2  ;;  %v3738_v25 = vpop.f32.mrf.mxu3  ;;  %v3346_v58 = vadd.f32 %v9402_v55, %v9401_v26 }
 0x468   : > { %v8516_v7 = vadd.f32 %v3689_v45, %v8287_v30  ;;  %v8519_v5 = vadd.f32 %v3738_v25, %v8290_v33  ;;  %v5247_v30 = vld [vmem:[%s9205_s3 + $0x118] sm:$0xf] }
 0x469   : > { %v5841_v33 = vld [vmem:[%s9205_s3 + $0x134] sm:$0xf0] }
 0x46a   : > { %v5248_v56 = vor.u32 %v5841_v33, %v5247_v30 }
 0x46c   : > { %3915 = vmatmul.bf16.gmra.mxu2 %v5220_v43  ;;  %v5845_v43 = vld [vmem:[%s9205_s3 + $0x15c] sm:$0xf] }
 0x46d   : > { %v5284_v33 = vor.u32 %v5845_v43, %v5281_v32  ;;  %v5593_v43 = vld [vmem:[%s9205_s3 + $0x3f0] sm:$0xf0]  ;;  %v5343_v32 = vld [vmem:[%s9205_s3 + $0x1d8] sm:$0xf] }
 0x46f   : > { %v3691_v14 = vpop.f32.mrf.mxu2  ;;  %v3740_v31 = vpop.f32.mrf.mxu3 }
 0x470   : > { %v8536_v15 = vadd.f32 %v3691_v14, %v3603_v34  ;;  %v8539_v24 = vadd.f32 %v3740_v31, %v8307_v60  ;;  %v3435_v34 = vadd.f32 %v7854_v61, %v3346_v58  ;;  %v5916_v31 = vld [vmem:[%s9205_s3 + $0x394] sm:$0xf] }
 0x472   : > { %v3524_v14 = vadd.f32 %v8131_v3, %v3435_v34 }
 0x474   : > { %3782 = vmatmul.bf16.gmra.mxu3 %v5500_v6  ;;  %3831 = vmatmul.bf16.gmra.mxu1 %v5248_v56  ;;  %v5561_v6 = vld [vmem:[%s9205_s3 + $0x3b0] sm:$0xf0]  ;;  %v5311_v56 = vld [vmem:[%s9205_s3 + $0x198] sm:$0xf]  ;;  %v3613_v61 = vadd.f32 %v8337_v37, %v3524_v14  ;;  %v9403_v37 = vld [vmem:[#allocation74_spill] sm:$0xff] }
 0x475   : > { %v3351_v4 = vadd.f32 %v9404_v22, %v9403_v37  ;;  %v5861_v14 = vld [vmem:[%s9205_s3 + $0x1dc] sm:$0xf]  ;;  %v5375_v37 = vld [vmem:[%s9205_s3 + $0x218] sm:$0xf] }
 0x476   : > { %v5873_v22 = vld [vmem:[%s9205_s3 + $0x234] sm:$0xf0] }
 0x477   : > { %v3694_v51 = vpop.f32.mrf.mxu2  ;;  %v3743_v41 = vpop.f32.mrf.mxu3 }
 0x478   : > { %v8548_v28 = vadd.f32 %v3694_v51, %v8310_v52  ;;  %v8551_v60 = vadd.f32 %v3743_v41, %v8313_v17  ;;  %v5279_v52 = vld [vmem:[%s9205_s3 + $0x158] sm:$0xf]  ;;  %v5564_v51 = vor.u32 %v5916_v31, %v5561_v6  ;;  %v5345_v31 = vld [vmem:[%s9205_s3 + $0x1f8] sm:$0xf0] }
 0x479   : > { %v5849_v17 = vld [vmem:[%s9205_s3 + $0x174] sm:$0xf0] }
 0x47a   : > { %v5280_v63 = vor.u32 %v5849_v17, %v5279_v52  ;;  %v9405_v17 = vld [vmem:[#allocation2_spill] sm:$0xff] }
 0x47c   : > { %3920 = vmatmul.bf16.gmra.mxu2 %v5252_v48  ;;  %v5853_v48 = vld [vmem:[%s9205_s3 + $0x19c] sm:$0xf] }
 0x47d   : > { %v5316_v52 = vor.u32 %v5853_v48, %v5313_v47  ;;  %v9409_v48 = vld [vmem:[#allocation42_spill] sm:$0xff] }
 0x47f   : > { %v3696_v8 = vpop.f32.mrf.mxu2  ;;  %v8569_v45 = vpop.f32.mrf.mxu3 }
 0x480   : > { %v8571_v25 = vadd.f32 %v3696_v8, %v3608_v18  ;;  %v3440_v18 = vadd.f32 %v9405_v17, %v3351_v4  ;;  %v9406_v8 = vld [vmem:[#allocation32_spill] sm:$0xff] }
 0x484   : > { %3787 = vmatmul.bf16.gmra.mxu3 %v5532_v20  ;;  %3836 = vmatmul.bf16.gmra.mxu1 %v5280_v63  ;;  %v3529_v20 = vadd.f32 %v9406_v8, %v3440_v18  ;;  %v5924_v63 = vld [vmem:[%s9205_s3 + $0x3d4] sm:$0xf]  ;;  %v5376_v18 = vor.u32 %v5873_v22, %v5375_v37 }
 0x487   : > { %v3699_v13 = vpop.f32.mrf.mxu2  ;;  %v8579_v40 = vpop.f32.mrf.mxu3 }
 0x488   : > { %v8584_v30 = vadd.f32 %v3699_v13, %v8332_v0  ;;  %v5857_v0 = vld [vmem:[%s9205_s3 + $0x1b4] sm:$0xf0]  ;;  %v3618_v13 = vadd.f32 %v8369_v29, %v3529_v20 }
 0x489   : > { %v5312_v41 = vor.u32 %v5857_v0, %v5311_v56  ;;  %v9407_v29 = vld [vmem:[#allocation73_spill] sm:$0xff]  ;;  %v9408_v0 = vld [vmem:[#allocation78_spill] sm:$0xff] }
 0x48c   : > { %3925 = vmatmul.bf16.gmra.mxu2 %v5284_v33  ;;  %v5596_v33 = vor.u32 %v5924_v63, %v5593_v43  ;;  %v5377_v63 = vld [vmem:[%s9205_s3 + $0x238] sm:$0xf0] }
 0x48f   : > { %v3701_v3 = vpop.f32.mrf.mxu2  ;;  %v8601_v36 = vpop.f32.mrf.mxu3 }
 0x490   : > { %v8603_v19 = vadd.f32 %v3701_v3, %v3613_v61  ;;  %v3356_v61 = vadd.f32 %v9408_v0, %v9407_v29  ;;  %v5409_v0 = vld [vmem:[%s9205_s3 + $0x278] sm:$0xf0] }
 0x492   : > { %v3445_v47 = vadd.f32 %v9409_v48, %v3356_v61 }
 0x494   : > { %3792 = vmatmul.bf16.gmra.mxu3 %v5564_v51  ;;  %3841 = vmatmul.bf16.gmra.mxu1 %v5312_v41  ;;  %v5348_v51 = vor.u32 %v5861_v14, %v5345_v31  ;;  %v3622_v41 = vpop.f32.mrf.mxu1 }
 0x497   : > { %v3704_v39 = vpop.f32.mrf.mxu2  ;;  %v8611_v27 = vpop.f32.mrf.mxu3 }
 0x498   : > { %v8616_v10 = vadd.f32 %v3704_v39, %v8358_v42  ;;  %v5865_v42 = vld [vmem:[%s9205_s3 + $0x1f4] sm:$0xf0]  ;;  %v3534_v39 = vadd.f32 %v8407_v12, %v3445_v47  ;;  %v5869_v12 = vld [vmem:[%s9205_s3 + $0x21c] sm:$0xf] }
 0x499   : > { %v5344_v34 = vor.u32 %v5865_v42, %v5343_v32  ;;  %v5380_v42 = vor.u32 %v5869_v12, %v5377_v63 }
 0x49a   : > { %v3623_v4 = vadd.f32 %v3622_v41, %v3534_v39 }
 0x49c   : > { %3930 = vmatmul.bf16.gmra.mxu2 %v5316_v52 }
 0x49f   : > { %v3706_v26 = vpop.f32.mrf.mxu2  ;;  %v8633_v55 = vpop.f32.mrf.mxu3 }
 0x4a0   : > { %v8635_v58 = vadd.f32 %v3706_v26, %v3618_v13 }
 0x4a4   : > { %3797 = vmatmul.bf16.gmra.mxu3 %v5596_v33  ;;  %3846 = vmatmul.bf16.gmra.mxu1 %v5344_v34  ;;  %v5881_v33 = vld [vmem:[%s9205_s3 + $0x274] sm:$0xf0] }
 0x4a7   : > { %v3709_v6 = vpop.f32.mrf.mxu2  ;;  %v8643_v56 = vpop.f32.mrf.mxu3 }
 0x4a8   : > { %v8648_v3 = vadd.f32 %v3709_v6, %v8386_v11 }
 0x4ac   : > { %3935 = vmatmul.bf16.gmra.mxu2 %v5348_v51 }
 0x4af   : > { %v3711_v52 = vpop.f32.mrf.mxu2  ;;  %v8658_v17 = vpop.f32.mrf.mxu3 }
 0x4b0   : > { %v8660_v11 = vadd.f32 %v3711_v52, %v3623_v4  ;;  %v5439_v52 = vld [vmem:[%s9205_s3 + $0x298] sm:$0xf] }
 0x4b1   : > { %v3812_v8 = vpop.f32.mrf.mxu1 }
 0x4b2   : > { %v3813_v20 = vadd.f32 %v3812_v8, %v8425_v38  ;;  %v5407_v38 = vld [vmem:[%s9205_s3 + $0x258] sm:$0xf] }
 0x4b3   : > { %v5408_v6 = vor.u32 %v5881_v33, %v5407_v38 }
 0x4b4   : > { %3851 = vmatmul.bf16.gmra.mxu1 %v5376_v18  ;;  %v5889_v18 = vld [vmem:[%s9205_s3 + $0x2b4] sm:$0xf0] }
 0x4b5   : > { %v5440_v12 = vor.u32 %v5889_v18, %v5439_v52 }
 0x4b7   : > { %v3763_v43 = vpop.f32.mrf.mxu3 }
 0x4b8   : > { %v8670_v32 = vadd.f32 %v3763_v43, %v8422_v35 }
 0x4b9   : > { %v3814_v13 = vpop.f32.mrf.mxu1 }
 0x4ba   : > { %v3815_v26 = vadd.f32 %v3814_v13, %v8442_v44  ;;  %v5877_v44 = vld [vmem:[%s9205_s3 + $0x25c] sm:$0xf] }
 0x4bb   : > { %v5412_v47 = vor.u32 %v5877_v44, %v5409_v0  ;;  %v5471_v44 = vld [vmem:[%s9205_s3 + $0x2d8] sm:$0xf] }
 0x4bc   : > { %3940 = vmatmul.bf16.gmra.mxu2 %v5380_v42  ;;  %v5441_v42 = vld [vmem:[%s9205_s3 + $0x2b8] sm:$0xf0]  ;;  %v5897_v0 = vld [vmem:[%s9205_s3 + $0x2f4] sm:$0xf0] }
 0x4bf   : > { %v8679_v34 = vpop.f32.mrf.mxu3  ;;  %v3901_v14 = vpop.f32.mrf.mxu2 }
 0x4c0   : > { %v3902_v31 = vadd.f32 %v3901_v14, %v3813_v20 }
 0x4c1   : > { %v3817_v35 = vpop.f32.mrf.mxu1 }
 0x4c2   : > { %v3818_v29 = vadd.f32 %v3817_v35, %v8454_v57  ;;  %v3981_v37 = vmax.f32 %v3902_v31, 0.0 }
 0x4c4   : > { %3856 = vmatmul.bf16.gmra.mxu1 %v5408_v6 }
 0x4c7   : > { %v3768_v61 = vpop.f32.mrf.mxu3  ;;  %v3903_v51 = vpop.f32.mrf.mxu2 }
 0x4c8   : > { %v8689_v41 = vadd.f32 %v3768_v61, %v8451_v23  ;;  %v3904_v48 = vadd.f32 %v3903_v51, %v3815_v26 }
 0x4c9   : > { %v3819_v39 = vpop.f32.mrf.mxu1 }
 0x4ca   : > { %v3982_v22 = vmax.f32 %v3904_v48, 0.0  ;;  %v3820_v57 = vadd.f32 %v3819_v39, %v8471_v54  ;;  %v5885_v54 = vld [vmem:[%s9205_s3 + $0x29c] sm:$0xf]  ;;  %v5472_v48 = vor.u32 %v5897_v0, %v5471_v44 }
 0x4cb   : > { %v5444_v14 = vor.u32 %v5885_v54, %v5441_v42  ;;  %v5503_v54 = vld [vmem:[%s9205_s3 + $0x318] sm:$0xf] }
 0x4cc   : > { %3945 = vmatmul.bf16.gmra.mxu2 %v5412_v47  ;;  %v8692_v4 = vpack.c.bf16 %v3982_v22, %v3981_v37  ;;  %v5473_v37 = vld [vmem:[%s9205_s3 + $0x2f8] sm:$0xf0]  ;;  %v5905_v42 = vld [vmem:[%s9205_s3 + $0x334] sm:$0xf0] }
 0x4cf   : > { %v8700_v23 = vpop.f32.mrf.mxu3  ;;  %v3906_v8 = vpop.f32.mrf.mxu2 }
 0x4d0   : > { %v3907_v20 = vadd.f32 %v3906_v8, %v3818_v29 }
 0x4d1   : > { %v3822_v63 = vpop.f32.mrf.mxu1 }
 0x4d2   : > { %v3823_v43 = vadd.f32 %v3822_v63, %v8485_v1  ;;  %v3983_v6 = vmax.f32 %v3907_v20, 0.0 }
 0x4d4   : > { %3861 = vmatmul.bf16.gmra.mxu1 %v5440_v12 }
 0x4d7   : > { %v3773_v13 = vpop.f32.mrf.mxu3  ;;  %v3908_v26 = vpop.f32.mrf.mxu2 }
 0x4d8   : > { %v8710_v38 = vadd.f32 %v3773_v13, %v8482_v50  ;;  %v3909_v33 = vadd.f32 %v3908_v26, %v3820_v57 }
 0x4d9   : > { %v3824_v31 = vpop.f32.mrf.mxu1 }
 0x4da   : > { %v3984_v35 = vmax.f32 %v3909_v33, 0.0  ;;  %v3825_v1 = vadd.f32 %v3824_v31, %v8505_v16  ;;  %v5893_v16 = vld [vmem:[%s9205_s3 + $0x2dc] sm:$0xf]  ;;  %v5504_v33 = vor.u32 %v5905_v42, %v5503_v54 }
 0x4db   : > { %v5476_v8 = vor.u32 %v5893_v16, %v5473_v37  ;;  %v9412_v37 = vld [vmem:[#allocation87_spill] sm:$0xff] }
 0x4dc   : > { %3950 = vmatmul.bf16.gmra.mxu2 %v5444_v14  ;;  %v8713_v29 = vpack.c.bf16 %v3984_v35, %v3983_v6  ;;  %v5505_v6 = vld [vmem:[%s9205_s3 + $0x338] sm:$0xf0] }
 0x4df   : > { %v8721_v50 = vpop.f32.mrf.mxu3  ;;  %v3911_v61 = vpop.f32.mrf.mxu2 }
 0x4e0   : > { %v3912_v51 = vadd.f32 %v3911_v61, %v3823_v43 }
 0x4e1   : > { %v3827_v47 = vpop.f32.mrf.mxu1 }
 0x4e2   : > { %v3828_v39 = vadd.f32 %v3827_v47, %v8519_v5  ;;  %v3985_v12 = vmax.f32 %v3912_v51, 0.0  ;;  %v9411_v47 = vld [vmem:[#allocation84_spill] sm:$0xff] }
 0x4e4   : > { %3866 = vmatmul.bf16.gmra.mxu1 %v5472_v48  ;;  %v9410_v48 = vld [vmem:[#allocation67_spill] sm:$0xff] }
 0x4e7   : > { %v3778_v22 = vpop.f32.mrf.mxu3  ;;  %v3913_v57 = vpop.f32.mrf.mxu2 }
 0x4e8   : > { %v8731_v52 = vadd.f32 %v3778_v22, %v8516_v7  ;;  %v3914_v18 = vadd.f32 %v3913_v57, %v3825_v1 }
 0x4e9   : > { %v3829_v20 = vpop.f32.mrf.mxu1 }
 0x4ea   : > { %v3986_v63 = vmax.f32 %v3914_v18, 0.0  ;;  %v3830_v5 = vadd.f32 %v3829_v20, %v8539_v24  ;;  %v5901_v24 = vld [vmem:[%s9205_s3 + $0x31c] sm:$0xf]  ;;  %v5535_v18 = vld [vmem:[%s9205_s3 + $0x358] sm:$0xf] }
 0x4eb   : > { %v5508_v61 = vor.u32 %v5901_v24, %v5505_v6  ;;  %v5909_v24 = vld [vmem:[%s9205_s3 + $0x35c] sm:$0xf] }
 0x4ec   : > { %3955 = vmatmul.bf16.gmra.mxu2 %v5476_v8  ;;  %v8734_v43 = vpack.c.bf16 %v3986_v63, %v3985_v12  ;;  %v9413_v8 = vld [vmem:[#allocation13_spill] sm:$0xff]  ;;  %v9414_v63 = vld [vmem:[#allocation11_spill] sm:$0xff] }
 0x4ed   : > { %v5537_v6 = vld [vmem:[%s9205_s3 + $0x378] sm:$0xf0] }
 0x4ef   : > { %v8742_v7 = vpop.f32.mrf.mxu3  ;;  %v3916_v13 = vpop.f32.mrf.mxu2 }
 0x4f0   : > { %v3917_v26 = vadd.f32 %v3916_v13, %v3828_v39 }
 0x4f1   : > { %v3832_v14 = vpop.f32.mrf.mxu1 }
 0x4f2   : > { %v3833_v31 = vadd.f32 %v3832_v14, %v8551_v60  ;;  %v3301_v60 = vadd.f32 %v9411_v47, %v9410_v48  ;;  %v3987_v39 = vmax.f32 %v3917_v26, 0.0  ;;  %v9415_v26 = vld [vmem:[#allocation86_spill] sm:$0xff]  ;;  %v9417_v47 = vld [vmem:[#allocation88_spill] sm:$0xff] }
 0x4f3   : > { %v9416_v48 = vld [vmem:[#allocation70_spill] sm:$0xff] }
 0x4f4   : > { %3871 = vmatmul.bf16.gmra.mxu1 %v5504_v33  ;;  %v3390_v22 = vadd.f32 %v9412_v37, %v3301_v60  ;;  %v3306_v60 = vadd.f32 %v9417_v47, %v9416_v48 }
 0x4f6   : > { %v3479_v20 = vadd.f32 %v9413_v8, %v3390_v22 }
 0x4f7   : > { %v3783_v35 = vpop.f32.mrf.mxu3  ;;  %v3918_v1 = vpop.f32.mrf.mxu2 }
 0x4f8   : > { %v8752_v44 = vadd.f32 %v3783_v35, %v8548_v28  ;;  %v3919_v0 = vadd.f32 %v3918_v1, %v3830_v5  ;;  %v5913_v28 = vld [vmem:[%s9205_s3 + $0x374] sm:$0xf0]  ;;  %v3568_v5 = vadd.f32 %v9414_v63, %v3479_v20 }
 0x4f9   : > { %v3834_v51 = vpop.f32.mrf.mxu1  ;;  %v5536_v42 = vor.u32 %v5913_v28, %v5535_v18  ;;  %v5567_v18 = vld [vmem:[%s9205_s3 + $0x398] sm:$0xf]  ;;  %v9419_v28 = vld [vmem:[#allocation3_spill] sm:$0xff] }
 0x4fa   : > { %v3988_v16 = vmax.f32 %v3919_v0, 0.0  ;;  %v3657_v33 = vadd.f32 %v9415_v26, %v3568_v5  ;;  %v9421_v26 = vld [vmem:[#allocation43_spill] sm:$0xff] }
 0x4fc   : > { %3960 = vmatmul.bf16.gmra.mxu2 %v5508_v61  ;;  %v8757_v57 = vpack.c.bf16 %v3988_v16, %v3987_v39  ;;  %v3746_v14 = vadd.f32 %v8569_v45, %v3657_v33  ;;  %v5540_v61 = vor.u32 %v5909_v24, %v5537_v6  ;;  %v9418_v45 = vld [vmem:[#allocation89_spill] sm:$0xff]  ;;  %v3749_v33 = vadd.f32 %v8579_v40, %v9421_v26 }
 0x4fd   : > { %v3395_v37 = vadd.f32 %v9418_v45, %v3306_v60  ;;  %v5917_v6 = vld [vmem:[%s9205_s3 + $0x39c] sm:$0xf]  ;;  %v9422_v60 = vld [vmem:[#allocation60_spill] sm:$0xff]  ;;  %v3754_v26 = vadd.f32 %v8611_v27, %v8367_v49  ;;  %v9428_v49 = vld [vmem:[#allocation90_spill] sm:$0xff] }
 0x4fe   : > { %v3835_v35 = vadd.f32 %v3834_v51, %v3746_v14  ;;  %v5921_v51 = vld [vmem:[%s9205_s3 + $0x3b4] sm:$0xf0] }
 0x4ff   : > { %v3921_v12 = vpop.f32.mrf.mxu2  ;;  %v3484_v8 = vadd.f32 %v9419_v28, %v3395_v37  ;;  %v5568_v5 = vor.u32 %v5921_v51, %v5567_v18  ;;  %v9423_v40 = vld [vmem:[#allocation9_spill] sm:$0xff]  ;;  %v9425_v51 = vld [vmem:[#allocation4_spill] sm:$0xff] }
 0x500   : > { %v3922_v54 = vadd.f32 %v3921_v12, %v3833_v31  ;;  %v9420_v12 = vld [vmem:[#allocation26_spill] sm:$0xff]  ;;  %v5599_v18 = vld [vmem:[%s9205_s3 + $0x3d8] sm:$0xf] }
 0x501   : > { %v3837_v13 = vpop.f32.mrf.mxu1  ;;  %v3573_v63 = vadd.f32 %v9420_v12, %v3484_v8 }
 0x502   : > { %v3989_v39 = vmax.f32 %v3922_v54, 0.0  ;;  %v3838_v24 = vadd.f32 %v3837_v13, %v3749_v33 }
 0x504   : > { %3876 = vmatmul.bf16.gmra.mxu1 %v5536_v42  ;;  %v3662_v42 = vadd.f32 %v8354_v46, %v3573_v63 }
 0x506   : > { %v3751_v14 = vadd.f32 %v8601_v36, %v3662_v42 }
 0x507   : > { %v3923_v1 = vpop.f32.mrf.mxu2 }
 0x508   : > { %v3924_v0 = vadd.f32 %v3923_v1, %v3835_v35  ;;  %v5569_v35 = vld [vmem:[%s9205_s3 + $0x3b8] sm:$0xf0] }
 0x509   : > { %v3839_v31 = vpop.f32.mrf.mxu1  ;;  %v5572_v46 = vor.u32 %v5917_v6, %v5569_v35  ;;  %v5601_v6 = vld [vmem:[%s9205_s3 + $0x3f8] sm:$0xf0] }
 0x50a   : > { %v3990_v16 = vmax.f32 %v3924_v0, 0.0  ;;  %v3840_v1 = vadd.f32 %v3839_v31, %v3751_v14  ;;  %v5929_v31 = vld [vmem:[%s9205_s3 + $0x3f4] sm:$0xf0] }
 0x50b   : > { %v5600_v63 = vor.u32 %v5929_v31, %v5599_v18 }
 0x50c   : > { %3965 = vmatmul.bf16.gmra.mxu2 %v5540_v61  ;;  %v8778_v22 = vpack.c.bf16 %v3990_v16, %v3989_v39  ;;  %v3311_v39 = vadd.f32 %v9423_v40, %v9422_v60  ;;  %v9424_v16 = vld [vmem:[#allocation8_spill] sm:$0xff]  ;;  %v9429_v60 = vld [vmem:[#allocation18_spill] sm:$0xff] }
 0x50e   : > { %v3400_v45 = vadd.f32 %v9424_v16, %v3311_v39 }
 0x50f   : > { %v3926_v20 = vpop.f32.mrf.mxu2 }
 0x510   : > { %v3927_v0 = vadd.f32 %v3926_v20, %v3838_v24  ;;  %v3489_v28 = vadd.f32 %v9425_v51, %v3400_v45  ;;  %v9426_v20 = vld [vmem:[#allocation25_spill] sm:$0xff]  ;;  %v9431_v45 = vld [vmem:[#allocation31_spill] sm:$0xff]  ;;  %v3759_v51 = vadd.f32 %v8643_v56, %v8390_v59 }
 0x511   : > { %v3842_v54 = vpop.f32.mrf.mxu1  ;;  %v5925_v24 = vld [vmem:[%s9205_s3 + $0x3dc] sm:$0xf] }
 0x512   : > { %v3991_v36 = vmax.f32 %v3927_v0, 0.0  ;;  %v3578_v12 = vadd.f32 %v9426_v20, %v3489_v28  ;;  %v3843_v14 = vadd.f32 %v3842_v54, %v3754_v26 }
 0x514   : > { %3881 = vmatmul.bf16.gmra.mxu1 %v5568_v5  ;;  %v3667_v42 = vadd.f32 %v8383_v9, %v3578_v12  ;;  %v5604_v9 = vor.u32 %v5925_v24, %v5601_v6  ;;  %v9432_v24 = vld [vmem:[#allocation5_spill] sm:$0xff] }
 0x516   : > { %v3756_v33 = vadd.f32 %v8633_v55, %v3667_v42 }
 0x517   : > { %v3928_v61 = vpop.f32.mrf.mxu2 }
 0x518   : > { %v3929_v48 = vadd.f32 %v3928_v61, %v3840_v1 }
 0x519   : > { %v3844_v47 = vpop.f32.mrf.mxu1 }
 0x51a   : > { %v3992_v13 = vmax.f32 %v3929_v48, 0.0  ;;  %v3845_v35 = vadd.f32 %v3844_v47, %v3756_v33  ;;  %v2557_v33 = vpop.permute.xlu0 %2556 }
 0x51b   : > { %v3321_v6 = vadd.f32 %v9432_v24, %v2557_v33 }
 0x51c   : > { %v4018_v37 = vpack.c.bf16 %v3992_v13, %v3991_v36  ;;  %3970 = vmatmul.bf16.gmra.mxu2 %v5572_v46  ;;  %v9427_v46 = vld [vmem:[#allocation69_spill] sm:$0xff]  ;;  %v9430_v36 = vld [vmem:[#allocation6_spill] sm:$0xff] }
 0x51d   : > { %v3316_v27 = vadd.f32 %v9428_v49, %v9427_v46 }
 0x51f   : > { %v3931_v8 = vpop.f32.mrf.mxu2  ;;  %v3405_v40 = vadd.f32 %v9429_v60, %v3316_v27 }
 0x520   : > { %v3932_v1 = vadd.f32 %v3931_v8, %v3843_v14 }
 0x521   : > { %v3847_v5 = vpop.f32.mrf.mxu1  ;;  %v3494_v13 = vadd.f32 %v9430_v36, %v3405_v40 }
 0x522   : > { %v3993_v55 = vmax.f32 %v3932_v1, 0.0  ;;  %v3848_v20 = vadd.f32 %v3847_v5, %v3759_v51 }
 0x523   : > { %v3583_v18 = vadd.f32 %v9431_v45, %v3494_v13  ;;  %v9436_v13 = vld [vmem:[#allocation61_spill] sm:$0xff] }
 0x524   : > { %3886 = vmatmul.bf16.gmra.mxu1 %v5600_v63 }
 0x525   : > { %v3672_v31 = vadd.f32 %v8411_v53, %v3583_v18 }
 0x527   : > { %v3933_v0 = vpop.f32.mrf.mxu2  ;;  %v3761_v8 = vadd.f32 %v8658_v17, %v3672_v31 }
 0x528   : > { %v3934_v61 = vadd.f32 %v3933_v0, %v3845_v35  ;;  %v9433_v0 = vld [vmem:[#allocation17_spill] sm:$0xff] }
 0x529   : > { %v3849_v48 = vpop.f32.mrf.mxu1  ;;  %v3410_v53 = vadd.f32 %v9433_v0, %v3321_v6 }
 0x52a   : > { %v3994_v54 = vmax.f32 %v3934_v61, 0.0  ;;  %v3850_v12 = vadd.f32 %v3849_v48, %v3761_v8 }
 0x52c   : > { %v4019_v39 = vpack.c.bf16 %v3994_v54, %v3993_v55  ;;  %3975 = vmatmul.bf16.gmra.mxu2 %v5604_v9  ;;  %v9434_v9 = vld [vmem:[#allocation7_spill] sm:$0xff]  ;;  %v2567_v54 = vpop.permute.xlu1 %2566 }
 0x52d   : > { %v3499_v59 = vadd.f32 %v9434_v9, %v3410_v53  ;;  %v5615_v53 = vld [vmem:[%s9207_s5 + $0x10] sm:$0xf] }
 0x52f   : > { %v3936_v16 = vpop.f32.mrf.mxu2 }
 0x530   : > { %v3937_v63 = vadd.f32 %v3936_v16, %v3848_v20  ;;  %v3326_v16 = vadd.f32 %v9436_v13, %v2567_v54  ;;  %v5935_v54 = vld [vmem:[%s9207_s5 + $0x24] sm:$0xf0] }
 0x531   : > { %v3852_v47 = vpop.f32.mrf.mxu1 }
 0x532   : > { %v3853_v28 = vadd.f32 %v3852_v47, %v8670_v32  ;;  %v3995_v35 = vmax.f32 %v3937_v63, 0.0  ;;  %v9435_v32 = vld [vmem:[#allocation37_spill] sm:$0xff]  ;;  %v9437_v47 = vld [vmem:[#allocation15_spill] sm:$0xff] }
 0x533   : > { %v3588_v17 = vadd.f32 %v9435_v32, %v3499_v59  ;;  %v3415_v31 = vadd.f32 %v9437_v47, %v3326_v16 }
 0x535   : > { %v3677_v46 = vadd.f32 %v8439_v62, %v3588_v17 }
 0x537   : > { %v3938_v42 = vpop.f32.mrf.mxu2  ;;  %v3766_v27 = vadd.f32 %v8679_v34, %v3677_v46  ;;  %v3781_v46 = vadd.f32 %v8742_v7, %v8536_v15 }
 0x538   : > { %v3939_v26 = vadd.f32 %v3938_v42, %v3850_v12  ;;  %v5931_v42 = vld [vmem:[%s9207_s5 + $0x4] sm:$0xf0] }
 0x539   : > { %v3854_v14 = vpop.f32.mrf.mxu1 }
 0x53a   : > { %v3996_v1 = vmax.f32 %v3939_v26, 0.0  ;;  %v3855_v55 = vadd.f32 %v3854_v14, %v3766_v27 }
 0x53c   : > { %v4020_v61 = vpack.c.bf16 %v3996_v1, %v3995_v35  ;;  %v3776_v1 = vadd.f32 %v8721_v50, %v8502_v2 }
 0x53e   : > { %4413 = vmatpush.bf16.msrb.mxu3 %v4020_v61 }
 0x53f   : > { %v3941_v56 = vpop.f32.mrf.mxu2 }
 0x540   : > { %v3942_v5 = vadd.f32 %v3941_v56, %v3853_v28 }
 0x541   : > { %v3857_v48 = vpop.f32.mrf.mxu1 }
 0x542   : > { %v3858_v49 = vadd.f32 %v3857_v48, %v8689_v41  ;;  %4414 = vmatpush.bf16.msrb.mxu3 %v4019_v39  ;;  %v3997_v45 = vmax.f32 %v3942_v5, 0.0  ;;  %v9438_v41 = vld [vmem:[#allocation10_spill] sm:$0xff] }
 0x543   : > { %v3504_v39 = vadd.f32 %v9438_v41, %v3415_v31 }
 0x546   : > { %4415 = vmatpush.bf16.msrb.mxu3 %v4018_v37  ;;  %v9439_v37 = vld [vmem:[#allocation38_spill] sm:$0xff] }
 0x547   : > { %v3943_v60 = vpop.f32.mrf.mxu2  ;;  %v3593_v51 = vadd.f32 %v9439_v37, %v3504_v39  ;;  %v5631_v39 = vld [vmem:[%s9207_s5 + $0x30] sm:$0xf] }
 0x548   : > { %v3944_v40 = vadd.f32 %v3943_v60, %v3855_v55  ;;  %v5623_v55 = vld [vmem:[%s9207_s5 + $0x20] sm:$0xf] }
 0x549   : > { %v3859_v36 = vpop.f32.mrf.mxu1  ;;  %v3682_v20 = vadd.f32 %v8468_v21, %v3593_v51  ;;  %v5624_v13 = vor.u32 %v5935_v54, %v5623_v55 }
 0x54a   : > { %v3998_v18 = vmax.f32 %v3944_v40, 0.0  ;;  %4416 = vmatpush.bf16.msrb.mxu3 %v8778_v22 }
 0x54b   : > { %v3771_v22 = vadd.f32 %v8700_v23, %v3682_v20 }
 0x54c   : > { %v8839_v62 = vpack.c.bf16 %v3998_v18, %v3997_v45 }
 0x54d   : > { %v3860_v63 = vadd.f32 %v3859_v36, %v3771_v22 }
 0x54e   : > { %4417 = vmatpush.bf16.msrb.mxu3 %v8757_v57  ;;  %v5607_v57 = vld [vmem:[%s9207_s5] sm:$0xf] }
 0x54f   : > { %v3946_v34 = vpop.f32.mrf.mxu2  ;;  %v5608_v14 = vor.u32 %v5931_v42, %v5607_v57 }
 0x550   : > { %v3947_v28 = vadd.f32 %v3946_v34, %v3858_v49  ;;  %v3785_v49 = vpop.f32.mrf.mxu3  ;;  %v5937_v34 = vld [vmem:[%s9207_s5 + $0x34] sm:$0xf0] }
 0x551   : > { %v3862_v8 = vpop.f32.mrf.mxu1  ;;  %v3786_v31 = vadd.f32 %v3785_v49, %v8571_v25 }
 0x552   : > { %v3863_v12 = vadd.f32 %v3862_v8, %v8710_v38  ;;  %4418 = vmatpush.bf16.msrb.mxu3 %v8734_v43  ;;  %v3999_v38 = vmax.f32 %v3947_v28, 0.0  ;;  %v5632_v8 = vor.u32 %v5937_v34, %v5631_v39  ;;  %v5945_v34 = vld [vmem:[%s9207_s5 + $0x74] sm:$0xf0] }
 0x556   : > { %4419 = vmatpush.bf16.msrb.mxu3 %v8713_v29 }
 0x557   : > { %v3948_v26 = vpop.f32.mrf.mxu2 }
 0x558   : > { %v3949_v33 = vadd.f32 %v3948_v26, %v3860_v63  ;;  %v3788_v15 = vpop.f32.mrf.mxu3 }
 0x559   : > { %v3864_v21 = vpop.f32.mrf.mxu1  ;;  %v3789_v25 = vadd.f32 %v3788_v15, %v8584_v30  ;;  %v5655_v15 = vld [vmem:[%s9207_s5 + $0x60] sm:$0xf] }
 0x55a   : > { %v4000_v24 = vmax.f32 %v3949_v33, 0.0  ;;  %4420 = vmatpush.bf16.msrb.mxu3 %v8692_v4  ;;  %v3865_v0 = vadd.f32 %v3864_v21, %v3776_v1  ;;  %v5933_v4 = vld [vmem:[%s9207_s5 + $0x14] sm:$0xf0] }
 0x55b   : > { %v5616_v56 = vor.u32 %v5933_v4, %v5615_v53 }
 0x55c   : > { %v8856_v23 = vpack.c.bf16 %v4000_v24, %v3999_v38  ;;  %v5639_v24 = vld [vmem:[%s9207_s5 + $0x40] sm:$0xf] }
 0x55d   : > { %4421 = vmatmul.bf16.vlgmr.msrb.gmra.mxu3 %v5608_v14 }
 0x55f   : > { %v3951_v29 = vpop.f32.mrf.mxu2 }
 0x560   : > { %v3952_v43 = vadd.f32 %v3951_v29, %v3863_v12  ;;  %v3790_v28 = vpop.f32.mrf.mxu3  ;;  %v5939_v29 = vld [vmem:[%s9207_s5 + $0x44] sm:$0xf0] }
 0x561   : > { %v3867_v6 = vpop.f32.mrf.mxu1  ;;  %v3791_v26 = vadd.f32 %v3790_v28, %v8603_v19  ;;  %v5947_v28 = vld [vmem:[%s9207_s5 + $0x84] sm:$0xf0] }
 0x562   : > { %v3868_v35 = vadd.f32 %v3867_v6, %v8731_v52  ;;  %v4001_v32 = vmax.f32 %v3952_v43, 0.0 }
 0x567   : > { %v3953_v61 = vpop.f32.mrf.mxu2 }
 0x568   : > { %v3954_v9 = vadd.f32 %v3953_v61, %v3865_v0  ;;  %v3793_v42 = vpop.f32.mrf.mxu3 }
 0x569   : > { %v3869_v59 = vpop.f32.mrf.mxu1  ;;  %v3794_v61 = vadd.f32 %v3793_v42, %v8616_v10  ;;  %v5951_v42 = vld [vmem:[%s9207_s5 + $0xa4] sm:$0xf0] }
 0x56a   : > { %v4002_v17 = vmax.f32 %v3954_v9, 0.0  ;;  %v3870_v27 = vadd.f32 %v3869_v59, %v3781_v46 }
 0x56c   : > { %v8867_v5 = vpack.c.bf16 %v4002_v17, %v4001_v32  ;;  %v5647_v17 = vld [vmem:[%s9207_s5 + $0x50] sm:$0xf] }
 0x56d   : > { %4426 = vmatmul.bf16.gmra.mxu3 %v5616_v56 }
 0x56f   : > { %v3956_v52 = vpop.f32.mrf.mxu2 }
 0x570   : > { %v3957_v2 = vadd.f32 %v3956_v52, %v3868_v35  ;;  %v5640_v35 = vor.u32 %v5939_v29, %v5639_v24  ;;  %v3795_v53 = vpop.f32.mrf.mxu3  ;;  %v5941_v52 = vld [vmem:[%s9207_s5 + $0x54] sm:$0xf0]  ;;  %v5695_v24 = vld [vmem:[%s9207_s5 + $0xb0] sm:$0xf]  ;;  %v8962_v29 = vpop.permute.xlu0 %4245 }
 0x571   : > { %v3872_v50 = vpop.f32.mrf.mxu1  ;;  %v3796_v9 = vadd.f32 %v3795_v53, %v8635_v58  ;;  %v5648_v49 = vor.u32 %v5941_v52, %v5647_v17  ;;  %v8995_v17 = vpop.permute.xlu1 %4165 }
 0x572   : > { %v3873_v48 = vadd.f32 %v3872_v50, %v8752_v44  ;;  %v4003_v16 = vmax.f32 %v3957_v2, 0.0 }
 0x577   : > { %v3958_v60 = vpop.f32.mrf.mxu2 }
 0x578   : > { %v3959_v40 = vadd.f32 %v3958_v60, %v3870_v27  ;;  %v3798_v2 = vpop.f32.mrf.mxu3 }
 0x579   : > { %v3874_v36 = vpop.f32.mrf.mxu1  ;;  %v3799_v60 = vadd.f32 %v3798_v2, %v8648_v3 }
 0x57a   : > { %v4004_v45 = vmax.f32 %v3959_v40, 0.0  ;;  %v3875_v41 = vadd.f32 %v3874_v36, %v3786_v31 }
 0x57c   : > { %v8878_v44 = vpack.c.bf16 %v4004_v45, %v4003_v16 }
 0x57d   : > { %4431 = vmatmul.bf16.gmra.mxu3 %v5624_v13 }
 0x57f   : > { %v3961_v7 = vpop.f32.mrf.mxu2 }
 0x580   : > { %v3962_v18 = vadd.f32 %v3961_v7, %v3873_v48  ;;  %v3800_v54 = vpop.f32.mrf.mxu3  ;;  %v5943_v7 = vld [vmem:[%s9207_s5 + $0x64] sm:$0xf0] }
 0x581   : > { %v3877_v47 = vpop.f32.mrf.mxu1  ;;  %v3801_v36 = vadd.f32 %v3800_v54, %v8660_v11  ;;  %v5656_v31 = vor.u32 %v5943_v7, %v5655_v15  ;;  %v5663_v11 = vld [vmem:[%s9207_s5 + $0x70] sm:$0xf]  ;;  %v5957_v54 = vld [vmem:[%s9207_s5 + $0xd4] sm:$0xf0] }
 0x582   : > { %v4005_v20 = vmax.f32 %v3962_v18, 0.0  ;;  %v3878_v33 = vadd.f32 %v3877_v47, %v3789_v25  ;;  %v5687_v25 = vld [vmem:[%s9207_s5 + $0xa0] sm:$0xf] }
 0x587   : > { %v3963_v37 = vpop.f32.mrf.mxu2 }
 0x588   : > { %v3964_v51 = vadd.f32 %v3963_v37, %v3875_v41  ;;  %v5664_v37 = vor.u32 %v5945_v34, %v5663_v11 }
 0x589   : > { %v3879_v22 = vpop.f32.mrf.mxu1 }
 0x58a   : > { %v4006_v12 = vmax.f32 %v3964_v51, 0.0  ;;  %v3880_v14 = vadd.f32 %v3879_v22, %v3791_v26  ;;  %v5671_v51 = vld [vmem:[%s9207_s5 + $0x80] sm:$0xf]  ;;  %v5932_v22 = vld [vmem:[%s9207_s5 + $0x14] sm:$0xf] }
 0x58b   : > { %v5934_v26 = vld [vmem:[%s9207_s5 + $0x24] sm:$0xf] }
 0x58c   : > { %v4025_v63 = vpack.c.bf16 %v4006_v12, %v4005_v20  ;;  %v5672_v20 = vor.u32 %v5947_v28, %v5671_v51  ;;  %v5949_v12 = vld [vmem:[%s9207_s5 + $0x94] sm:$0xf0] }
 0x58d   : > { %4436 = vmatmul.bf16.gmra.mxu3 %v5632_v8  ;;  %v5930_v8 = vld [vmem:[%s9207_s5 + $0x4] sm:$0xf] }
 0x58f   : > { %v3966_v57 = vpop.f32.mrf.mxu2 }
 0x590   : > { %v3967_v38 = vadd.f32 %v3966_v57, %v3878_v33  ;;  %v5625_v33 = vld [vmem:[%s9207_s5 + $0x28] sm:$0xf0] }
 0x591   : > { %v3882_v21 = vpop.f32.mrf.mxu1 }
 0x592   : > { %v4007_v1 = vmax.f32 %v3967_v38, 0.0  ;;  %v3883_v59 = vadd.f32 %v3882_v21, %v3794_v61  ;;  %v5688_v21 = vor.u32 %v5951_v42, %v5687_v25  ;;  %v8957_v38 = vpop.permute.xlu2 %4170 }
 0x597   : > { %v3968_v43 = vpop.f32.mrf.mxu2 }
 0x598   : > { %v3969_v6 = vadd.f32 %v3968_v43, %v3880_v14  ;;  %v5628_v14 = vor.u32 %v5934_v26, %v5625_v33  ;;  %v5953_v43 = vld [vmem:[%s9207_s5 + $0xb4] sm:$0xf0] }
 0x599   : > { %v3884_v19 = vpop.f32.mrf.mxu1 }
 0x59a   : > { %v4008_v30 = vmax.f32 %v3969_v6, 0.0  ;;  %v3885_v56 = vadd.f32 %v3884_v19, %v3796_v9  ;;  %v5936_v6 = vld [vmem:[%s9207_s5 + $0x34] sm:$0xf]  ;;  %v8977_v19 = vpop.permute.xlu0 %4160  ;;  %v5703_v9 = vld [vmem:[%s9207_s5 + $0xc0] sm:$0xf] }
 0x59c   : > { %v4026_v0 = vpack.c.bf16 %v4008_v30, %v4007_v1  ;;  %v8975_v30 = vpop.permute.xlu2 %4155 }
 0x59d   : > { %4441 = vmatmul.bf16.gmra.mxu3 %v5640_v35  ;;  %v5633_v35 = vld [vmem:[%s9207_s5 + $0x38] sm:$0xf0] }
 0x59e   : > { %v5636_v53 = vor.u32 %v5936_v6, %v5633_v35 }
 0x59f   : > { %v3971_v4 = vpop.f32.mrf.mxu2 }
 0x5a0   : > { %v3972_v32 = vadd.f32 %v3971_v4, %v3883_v59  ;;  %v5955_v59 = vld [vmem:[%s9207_s5 + $0xc4] sm:$0xf0] }
 0x5a1   : > { %v3887_v46 = vpop.f32.mrf.mxu1  ;;  %v5704_v52 = vor.u32 %v5955_v59, %v5703_v9 }
 0x5a2   : > { %v4009_v27 = vmax.f32 %v3972_v32, 0.0  ;;  %v3888_v13 = vadd.f32 %v3887_v46, %v3799_v60  ;;  %v5641_v32 = vld [vmem:[%s9207_s5 + $0x48] sm:$0xf0]  ;;  %v5940_v60 = vld [vmem:[%s9207_s5 + $0x54] sm:$0xf] }
 0x5a4   : > { %v8981_v61 = vpop.permute.xlu2 %4240 }
 0x5a7   : > { %v3973_v50 = vpop.f32.mrf.mxu2 }
 0x5a8   : > { %v3974_v48 = vadd.f32 %v3973_v50, %v3885_v56  ;;  %v5938_v56 = vld [vmem:[%s9207_s5 + $0x44] sm:$0xf]  ;;  %v8997_v50 = vpop.permute.xlu0 %4145 }
 0x5a9   : > { %v3889_v40 = vpop.f32.mrf.mxu1  ;;  %v5644_v2 = vor.u32 %v5938_v56, %v5641_v32 }
 0x5aa   : > { %v4010_v10 = vmax.f32 %v3974_v48, 0.0  ;;  %v3890_v16 = vadd.f32 %v3889_v40, %v3801_v36  ;;  %v5649_v40 = vld [vmem:[%s9207_s5 + $0x58] sm:$0xf0] }
 0x5ac   : > { %v4027_v55 = vpack.c.bf16 %v4010_v10, %v4009_v27  ;;  %v9001_v46 = vpop.permute.xlu2 %4225 }
 0x5ad   : > { %4446 = vmatmul.bf16.gmra.mxu3 %v5648_v49  ;;  %v9003_v49 = vpop.permute.xlu1 %4250 }
 0x5af   : > { %v3976_v58 = vpop.f32.mrf.mxu2 }
 0x5b0   : > { %v3977_v45 = vadd.f32 %v3976_v58, %v3888_v13  ;;  %v9005_v27 = vpop.permute.xlu0 %4230  ;;  %v5652_v13 = vor.u32 %v5940_v60, %v5649_v40 }
 0x5b2   : > { %v4011_v41 = vmax.f32 %v3977_v45, 0.0 }
 0x5b4   : > { %v9012_v58 = vpop.permute.xlu2 %4140 }
 0x5b7   : > { %v3978_v18 = vpop.f32.mrf.mxu2 }
 0x5b8   : > { %v3979_v47 = vadd.f32 %v3978_v18, %v3890_v16  ;;  %v9023_v16 = vpop.permute.xlu1 %4235  ;;  %v9025_v45 = vpop.permute.xlu0 %4215  ;;  %v5719_v18 = vld [vmem:[%s9207_s5 + $0xe0] sm:$0xf] }
 0x5ba   : > { %v4012_v39 = vmax.f32 %v3979_v47, 0.0 }
 0x5bc   : > { %v4028_v3 = vpack.c.bf16 %v4012_v39, %v4011_v41  ;;  %v9029_v7 = vpop.permute.xlu2 %4125  ;;  %v5942_v41 = vld [vmem:[%s9207_s5 + $0x64] sm:$0xf]  ;;  %v5657_v39 = vld [vmem:[%s9207_s5 + $0x68] sm:$0xf0] }
 0x5bd   : > { %4451 = vmatmul.bf16.gmra.mxu3 %v5656_v31  ;;  %v5959_v31 = vld [vmem:[%s9207_s5 + $0xe4] sm:$0xf0] }
 0x5be   : > { %4502 = vmatpush.bf16.msrb.mxu1 %v4028_v3  ;;  %v5720_v34 = vor.u32 %v5959_v31, %v5719_v18 }
 0x5c0   : > { %v9034_v47 = vpop.permute.xlu1 %4150  ;;  %v9045_v3 = vpop.permute.xlu0 %4130 }
 0x5c2   : > { %4503 = vmatpush.bf16.msrb.mxu1 %v4027_v55  ;;  %v5711_v55 = vld [vmem:[%s9207_s5 + $0xd0] sm:$0xf] }
 0x5c3   : > { %v5712_v36 = vor.u32 %v5957_v54, %v5711_v55  ;;  %v5948_v54 = vld [vmem:[%s9207_s5 + $0x94] sm:$0xf] }
 0x5c4   : > { %v9049_v51 = vpop.permute.xlu2 %4210 }
 0x5c6   : > { %4504 = vmatpush.bf16.msrb.mxu1 %v4026_v0  ;;  %v5696_v0 = vor.u32 %v5953_v43, %v5695_v24  ;;  %v5673_v24 = vld [vmem:[%s9207_s5 + $0x88] sm:$0xf0] }
 0x5c8   : > { %v9051_v28 = vpop.permute.xlu1 %4135 }
 0x5ca   : > { %4505 = vmatpush.bf16.msrb.mxu1 %v4025_v63  ;;  %v5617_v63 = vld [vmem:[%s9207_s5 + $0x18] sm:$0xf0] }
 0x5cd   : > { %4456 = vmatmul.bf16.gmra.mxu3 %v5664_v37  ;;  %v5660_v37 = vor.u32 %v5942_v41, %v5657_v39 }
 0x5ce   : > { %4506 = vmatpush.bf16.msrb.mxu1 %v8878_v44  ;;  %v5609_v44 = vld [vmem:[%s9207_s5 + $0x8] sm:$0xf0] }
 0x5d2   : > { %4507 = vmatpush.bf16.msrb.mxu1 %v8867_v5  ;;  %v5612_v5 = vor.u32 %v5930_v8, %v5609_v44  ;;  %v4116_v8 = vpop.permute.xlu0 %4115 }
 0x5d6   : > { %4508 = vmatpush.bf16.msrb.mxu1 %v8856_v23  ;;  %v5679_v23 = vld [vmem:[%s9207_s5 + $0x90] sm:$0xf] }
 0x5d7   : > { %v5680_v57 = vor.u32 %v5949_v12, %v5679_v23  ;;  %v5961_v23 = vld [vmem:[%s9207_s5 + $0xf4] sm:$0xf0]  ;;  %v5944_v12 = vld [vmem:[%s9207_s5 + $0x74] sm:$0xf] }
 0x5da   : > { %4509 = vmatpush.bf16.msrb.mxu1 %v8839_v62  ;;  %v5620_v62 = vor.u32 %v5932_v22, %v5617_v63  ;;  %v5665_v22 = vld [vmem:[%s9207_s5 + $0x78] sm:$0xf0]  ;;  %v9071_v25 = vpop.permute.xlu0 %4200 }
 0x5dd   : > { %4461 = vmatmul.bf16.gmra.mxu3 %v5672_v20  ;;  %4510 = vmatmul.bf16.vlgmr.msrb.gmra.mxu1 %v5612_v5  ;;  %v9055_v20 = vpop.permute.xlu2 %4195  ;;  %v5727_v5 = vld [vmem:[%s9207_s5 + $0xf0] sm:$0xf] }
 0x5de   : > { %v5728_v63 = vor.u32 %v5961_v23, %v5727_v5 }
 0x5e0   : > { %v8973_v1 = vpop.f32.mrf.mxu3 }
 0x5e5   : > { %v4111_v26 = vpop.permute.xlu2 %4110 }
 0x5e8   : > { %v8979_v4 = vpop.f32.mrf.mxu3 }
 0x5ed   : > { %4466 = vmatmul.bf16.gmra.mxu3 %v5680_v57  ;;  %4515 = vmatmul.bf16.gmra.mxu1 %v5620_v62  ;;  %v5668_v57 = vor.u32 %v5944_v12, %v5665_v22  ;;  %v9069_v62 = vpop.permute.xlu1 %4220  ;;  %v4096_v43 = vpop.permute.xlu2 %4095  ;;  %v5950_v12 = vld [vmem:[%s9207_s5 + $0xa4] sm:$0xf] }
 0x5ee   : > { %v4423_v6 = vadd.f32 %v8973_v1, %v4096_v43  ;;  %v5681_v1 = vld [vmem:[%s9207_s5 + $0x98] sm:$0xf0] }
 0x5ef   : > { %v5684_v18 = vor.u32 %v5948_v54, %v5681_v1 }
 0x5f0   : > { %v8999_v48 = vpop.f32.mrf.mxu3 }
 0x5f5   : > { %v9073_v33 = vpop.permute.xlu1 %4205 }
 0x5f8   : > { %v9007_v10 = vpop.f32.mrf.mxu3 }
 0x5f9   : > { %v4430_v41 = vadd.f32 %v9007_v10, %v4111_v26 }
 0x5fd   : > { %4471 = vmatmul.bf16.gmra.mxu3 %v5688_v21  ;;  %4520 = vmatmul.bf16.gmra.mxu1 %v5628_v14  ;;  %v9075_v21 = vpop.permute.xlu0 %4185  ;;  %v5946_v14 = vld [vmem:[%s9207_s5 + $0x84] sm:$0xf]  ;;  %v4121_v9 = vpop.permute.xlu1 %4120 }
 0x5fe   : > { %v5676_v35 = vor.u32 %v5946_v14, %v5673_v24 }
 0x600   : > { %v9027_v15 = vpop.f32.mrf.mxu3 }
 0x605   : > { %v4101_v59 = vpop.permute.xlu0 %4100  ;;  %v4106_v40 = vpop.permute.xlu1 %4105 }
 0x606   : > { %v4425_v56 = vadd.f32 %v8979_v4, %v4101_v59  ;;  %v5952_v59 = vld [vmem:[%s9207_s5 + $0xb4] sm:$0xf] }
 0x608   : > { %v9047_v11 = vpop.f32.mrf.mxu3 }
 0x609   : > { %v4435_v24 = vadd.f32 %v9047_v11, %v4121_v9 }
 0x60d   : > { %4476 = vmatmul.bf16.gmra.mxu3 %v5696_v0  ;;  %4525 = vmatmul.bf16.gmra.mxu1 %v5636_v53 }
 0x610   : > { %v9053_v44 = vpop.f32.mrf.mxu3 }
 0x618   : > { %v4439_v42 = vpop.f32.mrf.mxu3 }
 0x61d   : > { %4481 = vmatmul.bf16.gmra.mxu3 %v5704_v52  ;;  %4530 = vmatmul.bf16.gmra.mxu1 %v5644_v2 }
 0x62d   : > { %4486 = vmatmul.bf16.gmra.mxu3 %v5712_v36  ;;  %4535 = vmatmul.bf16.gmra.mxu1 %v5652_v13  ;;  %v4442_v36 = vpop.f32.mrf.mxu3  ;;  %v4428_v13 = vadd.f32 %v8999_v48, %v4106_v40  ;;  %v5689_v48 = vld [vmem:[%s9207_s5 + $0xa8] sm:$0xf0] }
 0x635   : > { %v9095_v39 = vpop.f32.mrf.mxu3 }
 0x63d   : > { %4491 = vmatmul.bf16.gmra.mxu3 %v5720_v34  ;;  %4540 = vmatmul.bf16.gmra.mxu1 %v5660_v37  ;;  %v9106_v14 = vpop.f32.mrf.mxu3 }
 0x64d   : > { %4496 = vmatmul.bf16.gmra.mxu3 %v5728_v63  ;;  %4545 = vmatmul.bf16.gmra.mxu1 %v5668_v57  ;;  %v4433_v63 = vadd.f32 %v9027_v15, %v4116_v8  ;;  %v5692_v57 = vor.u32 %v5950_v12, %v5689_v48  ;;  %v5697_v15 = vld [vmem:[%s9207_s5 + $0xb8] sm:$0xf0]  ;;  %v5958_v48 = vld [vmem:[%s9207_s5 + $0xe4] sm:$0xf] }
 0x65a   : > { %v4511_v0 = vpop.f32.mrf.mxu1 }
 0x65b   : > { %v4512_v53 = vadd.f32 %v4511_v0, %v4423_v6 }
 0x65d   : > { %4550 = vmatmul.bf16.gmra.mxu1 %v5676_v35  ;;  %v4591_v2 = vmax.f32 %v4512_v53, 0.0  ;;  %v4449_v53 = vpop.f32.mrf.mxu3 }
 0x662   : > { %v4513_v32 = vpop.f32.mrf.mxu1 }
 0x663   : > { %v4514_v52 = vadd.f32 %v4513_v32, %v4425_v56  ;;  %v4438_v56 = vadd.f32 %v9053_v44, %v9029_v7  ;;  %v5700_v32 = vor.u32 %v5952_v59, %v5697_v15  ;;  %v4443_v44 = vadd.f32 %v4442_v36, %v9051_v28 }
 0x665   : > { %v4592_v55 = vmax.f32 %v4514_v52, 0.0  ;;  %v4452_v52 = vpop.f32.mrf.mxu3 }
 0x667   : > { %v9091_v60 = vpack.c.bf16 %v4592_v55, %v4591_v2  ;;  %v4440_v2 = vadd.f32 %v4439_v42, %v9045_v3 }
 0x66a   : > { %v4516_v4 = vpop.f32.mrf.mxu1 }
 0x66b   : > { %v4517_v31 = vadd.f32 %v4516_v4, %v4428_v13  ;;  %v5954_v13 = vld [vmem:[%s9207_s5 + $0xc4] sm:$0xf] }
 0x66d   : > { %4555 = vmatmul.bf16.gmra.mxu1 %v5684_v18  ;;  %v4593_v5 = vmax.f32 %v4517_v31, 0.0  ;;  %v5705_v18 = vld [vmem:[%s9207_s5 + $0xc8] sm:$0xf0]  ;;  %v4454_v31 = vpop.f32.mrf.mxu3 }
 0x66e   : > { %v5708_v4 = vor.u32 %v5954_v13, %v5705_v18  ;;  %v4450_v13 = vadd.f32 %v4449_v53, %v9034_v47 }
 0x672   : > { %v4518_v34 = vpop.f32.mrf.mxu1 }
 0x673   : > { %v4519_v37 = vadd.f32 %v4518_v34, %v4430_v41 }
 0x675   : > { %v4594_v23 = vmax.f32 %v4519_v37, 0.0  ;;  %v4457_v34 = vpop.f32.mrf.mxu3  ;;  %v5956_v37 = vld [vmem:[%s9207_s5 + $0xd4] sm:$0xf] }
 0x677   : > { %v9103_v22 = vpack.c.bf16 %v4594_v23, %v4593_v5  ;;  %v5713_v5 = vld [vmem:[%s9207_s5 + $0xd8] sm:$0xf0] }
 0x678   : > { %v5716_v23 = vor.u32 %v5956_v37, %v5713_v5  ;;  %v4448_v37 = vadd.f32 %v9106_v14, %v8997_v50  ;;  %v4181_v14 = vpop.permute.xlu2 %4180 }
 0x67a   : > { %v4521_v10 = vpop.f32.mrf.mxu1 }
 0x67b   : > { %v4522_v26 = vadd.f32 %v4521_v10, %v4433_v63  ;;  %v5721_v63 = vld [vmem:[%s9207_s5 + $0xe8] sm:$0xf0] }
 0x67c   : > { %v5724_v10 = vor.u32 %v5958_v48, %v5721_v63 }
 0x67d   : > { %4560 = vmatmul.bf16.gmra.mxu1 %v5692_v57  ;;  %v4595_v35 = vmax.f32 %v4522_v26, 0.0  ;;  %v4459_v28 = vpop.f32.mrf.mxu3 }
 0x682   : > { %v4523_v43 = vpop.f32.mrf.mxu1 }
 0x683   : > { %v4524_v6 = vadd.f32 %v4523_v43, %v4435_v24 }
 0x685   : > { %v4596_v0 = vmax.f32 %v4524_v6, 0.0  ;;  %v4462_v57 = vpop.f32.mrf.mxu3  ;;  %v5960_v6 = vld [vmem:[%s9207_s5 + $0xf4] sm:$0xf] }
 0x687   : > { %v9115_v8 = vpack.c.bf16 %v4596_v0, %v4595_v35  ;;  %v5729_v35 = vld [vmem:[%s9207_s5 + $0xf8] sm:$0xf0] }
 0x688   : > { %v5732_v0 = vor.u32 %v5960_v6, %v5729_v35 }
 0x68a   : > { %v4526_v11 = vpop.f32.mrf.mxu1 }
 0x68b   : > { %v4527_v9 = vadd.f32 %v4526_v11, %v4438_v56  ;;  %v4191_v56 = vpop.permute.xlu1 %4190  ;;  %v4455_v11 = vadd.f32 %v4454_v31, %v8977_v19 }
 0x68d   : > { %4565 = vmatmul.bf16.gmra.mxu1 %v5700_v32  ;;  %v4597_v1 = vmax.f32 %v4527_v9, 0.0  ;;  %v4464_v24 = vpop.f32.mrf.mxu3  ;;  %v4458_v32 = vadd.f32 %v4457_v34, %v8995_v17  ;;  %v4460_v9 = vadd.f32 %v4459_v28, %v8957_v38  ;;  %v4445_v38 = vadd.f32 %v9095_v39, %v9012_v58 }
 0x692   : > { %v4528_v55 = vpop.f32.mrf.mxu1 }
 0x693   : > { %v4529_v54 = vadd.f32 %v4528_v55, %v4440_v2  ;;  %v4176_v31 = vpop.permute.xlu1 %4175 }
 0x694   : > { %v4463_v5 = vadd.f32 %v4462_v57, %v4176_v31 }
 0x695   : > { %v4598_v40 = vmax.f32 %v4529_v54, 0.0  ;;  %v4467_v15 = vpop.f32.mrf.mxu3  ;;  %v4453_v54 = vadd.f32 %v4452_v52, %v8975_v30 }
 0x696   : > { %v4468_v35 = vadd.f32 %v4467_v15, %v9075_v21 }
 0x697   : > { %v9126_v7 = vpack.c.bf16 %v4598_v40, %v4597_v1 }
 0x69a   : > { %v4531_v41 = vpop.f32.mrf.mxu1 }
 0x69b   : > { %v9129_v3 = vadd.f32 %v4531_v41, %v4443_v44 }
 0x69d   : > { %4570 = vmatmul.bf16.gmra.mxu1 %v5708_v4  ;;  %v4469_v41 = vpop.f32.mrf.mxu3 }
 0x6a2   : > { %v4533_v42 = vpop.f32.mrf.mxu1 }
 0x6a3   : > { %v4534_v47 = vadd.f32 %v4533_v42, %v4445_v38 }
 0x6aa   : > { %v4536_v12 = vpop.f32.mrf.mxu1 }
 0x6ab   : > { %v4537_v30 = vadd.f32 %v4536_v12, %v4448_v37 }
 0x6ad   : > { %4575 = vmatmul.bf16.gmra.mxu1 %v5716_v23  ;;  %v4601_v63 = vmax.f32 %v4537_v30, 0.0 }
 0x6b2   : > { %v4538_v36 = vpop.f32.mrf.mxu1 }
 0x6b3   : > { %v4539_v17 = vadd.f32 %v4538_v36, %v4450_v13  ;;  %v4472_v36 = vpop.f32.mrf.mxu3 }
 0x6b5   : > { %v4602_v53 = vmax.f32 %v4539_v17, 0.0 }
 0x6b7   : > { %v4628_v50 = vpack.c.bf16 %v4602_v53, %v4601_v63 }
 0x6ba   : > { %v4541_v26 = vpop.f32.mrf.mxu1 }
 0x6bb   : > { %v4542_v18 = vadd.f32 %v4541_v26, %v4453_v54  ;;  %v4465_v26 = vadd.f32 %v4464_v24, %v4181_v14 }
 0x6bd   : > { %4580 = vmatmul.bf16.gmra.mxu1 %v5724_v10  ;;  %v4603_v52 = vmax.f32 %v4542_v18, 0.0  ;;  %v4600_v10 = vmax.f32 %v4534_v47, 0.0 }
 0x6c2   : > { %v4543_v43 = vpop.f32.mrf.mxu1 }
 0x6c3   : > { %v4544_v1 = vadd.f32 %v4543_v43, %v4455_v11  ;;  %v4599_v43 = vmax.f32 %v9129_v3, 0.0  ;;  %v9167_v3 = vld [vmem:[%s9209_s7] sm:$0xff]  ;;  %v4470_v11 = vadd.f32 %v4469_v41, %v4191_v56 }
 0x6c4   : > { %v4647_v24 = vunpack.c.l.b16 %v9167_v3 }
 0x6c5   : > { %v4604_v34 = vmax.f32 %v4544_v1, 0.0  ;;  %v4627_v39 = vpack.c.bf16 %v4600_v10, %v4599_v43 }
 0x6c6   : > { %v4649_v15 = vpack.c.b16 %v4647_v24, %v4647_v24 }
 0x6c7   : > { %v4629_v28 = vpack.c.bf16 %v4604_v34, %v4603_v52 }
 0x6ca   : > { %v4546_v59 = vpop.f32.mrf.mxu1 }
 0x6cb   : > { %v4547_v2 = vadd.f32 %v4546_v59, %v4458_v32 }
 0x6cd   : > { %4585 = vmatmul.bf16.gmra.mxu1 %v5732_v0  ;;  %v4605_v44 = vmax.f32 %v4547_v2, 0.0  ;;  %v4474_v0 = vpop.f32.mrf.mxu3 }
 0x6ce   : > { %v4475_v56 = vadd.f32 %v4474_v0, %v9071_v25 }
 0x6d2   : > { %v4548_v55 = vpop.f32.mrf.mxu1 }
 0x6d3   : > { %v4549_v40 = vadd.f32 %v4548_v55, %v4460_v9 }
 0x6d5   : > { %v4606_v4 = vmax.f32 %v4549_v40, 0.0  ;;  %v4477_v21 = vpop.f32.mrf.mxu3 }
 0x6d6   : > { %v4478_v17 = vadd.f32 %v4477_v21, %v9073_v33 }
 0x6d7   : > { %v4630_v19 = vpack.c.bf16 %v4606_v4, %v4605_v44 }
 0x6d9   : > { %4653 = vmatpush.bf16.msra.mxu2 %v4630_v19 }
 0x6da   : > { %v4551_v23 = vpop.f32.mrf.mxu1 }
 0x6db   : > { %v4552_v48 = vadd.f32 %v4551_v23, %v4463_v5 }
 0x6dd   : > { %4654 = vmatpush.bf16.msra.mxu2 %v4629_v28  ;;  %v4607_v57 = vmax.f32 %v4552_v48, 0.0  ;;  %v4479_v13 = vpop.f32.mrf.mxu3 }
 0x6de   : > { %v4480_v19 = vadd.f32 %v4479_v13, %v9049_v51 }
 0x6e1   : > { %4655 = vmatpush.bf16.msra.mxu2 %v4628_v50 }
 0x6e2   : > { %v4553_v58 = vpop.f32.mrf.mxu1 }
 0x6e3   : > { %v4554_v12 = vadd.f32 %v4553_v58, %v4465_v26 }
 0x6e5   : > { %v4608_v6 = vmax.f32 %v4554_v12, 0.0  ;;  %4656 = vmatpush.bf16.msra.mxu2 %v4627_v39  ;;  %v4482_v37 = vpop.f32.mrf.mxu3 }
 0x6e6   : > { %v4483_v25 = vadd.f32 %v4482_v37, %v9025_v45 }
 0x6e7   : > { %v9159_v42 = vpack.c.bf16 %v4608_v6, %v4607_v57 }
 0x6e9   : > { %4657 = vmatpush.bf16.msra.mxu2 %v9126_v7 }
 0x6ea   : > { %v4556_v59 = vpop.f32.mrf.mxu1 }
 0x6eb   : > { %v4557_v32 = vadd.f32 %v4556_v59, %v4468_v35 }
 0x6ed   : > { %4658 = vmatpush.bf16.msra.mxu2 %v9115_v8  ;;  %v4609_v7 = vmax.f32 %v4557_v32, 0.0  ;;  %v4473_v8 = vadd.f32 %v4472_v36, %v9055_v20  ;;  %v4484_v31 = vpop.f32.mrf.mxu3 }
 0x6f1   : > { %4659 = vmatpush.bf16.msra.mxu2 %v9103_v22 }
 0x6f2   : > { %v4558_v9 = vpop.f32.mrf.mxu1 }
 0x6f3   : > { %v4559_v2 = vadd.f32 %v4558_v9, %v4470_v11 }
 0x6f5   : > { %v4610_v55 = vmax.f32 %v4559_v2, 0.0  ;;  %4660 = vmatpush.bf16.msra.mxu2 %v9091_v60  ;;  %v4487_v53 = vpop.f32.mrf.mxu3 }
 0x6f6   : > { %v4488_v9 = vadd.f32 %v4487_v53, %v9001_v46  ;;  %v4648_v46 = vunpack.c.h.b16 %v9167_v3 }
 0x6f7   : > { %v9172_v54 = vpack.c.bf16 %v4610_v55, %v4609_v7 }
 0x6f8   : > { %4661 = vmatmul.bf16.vlgmr.msra.gmra.mxu2 %v4649_v15 }
 0x6fa   : > { %v4561_v1 = vpop.f32.mrf.mxu1 }
 0x6fb   : > { %v4562_v40 = vadd.f32 %v4561_v1, %v4473_v8 }
 0x6fd   : > { %v4611_v44 = vmax.f32 %v4562_v40, 0.0  ;;  %v4489_v48 = vpop.f32.mrf.mxu3 }
 0x6fe   : > { %v4490_v59 = vadd.f32 %v4489_v48, %v9005_v27 }
 0x702   : > { %v4563_v18 = vpop.f32.mrf.mxu1 }
 0x703   : > { %v4564_v22 = vadd.f32 %v4563_v18, %v4475_v56 }
 0x705   : > { %v4612_v4 = vmax.f32 %v4564_v22, 0.0  ;;  %v4492_v10 = vpop.f32.mrf.mxu3  ;;  %v4644_v22 = vpop.permute.xlu0 %4643 }
 0x706   : > { %v4493_v6 = vadd.f32 %v4492_v10, %v9023_v16 }
 0x707   : > { %v4633_v41 = vpack.c.bf16 %v4612_v4, %v4611_v44 }
 0x70a   : > { %v4566_v34 = vpop.f32.mrf.mxu1 }
 0x70b   : > { %v4567_v60 = vadd.f32 %v4566_v34, %v4478_v17 }
 0x70d   : > { %v4613_v5 = vmax.f32 %v4567_v60, 0.0  ;;  %v4494_v50 = vpop.f32.mrf.mxu3 }
 0x70e   : > { %v4495_v39 = vadd.f32 %v4494_v50, %v8981_v61  ;;  %v4485_v61 = vadd.f32 %v4484_v31, %v9069_v62  ;;  %v4650_v62 = vpack.c.b16 %v4648_v46, %v4648_v46 }
 0x712   : > { %v4568_v38 = vpop.f32.mrf.mxu1 }
 0x713   : > { %v4569_v20 = vadd.f32 %v4568_v38, %v4480_v19 }
 0x715   : > { %v4614_v30 = vmax.f32 %v4569_v20, 0.0  ;;  %v4497_v51 = vpop.f32.mrf.mxu3 }
 0x716   : > { %v4498_v58 = vadd.f32 %v4497_v51, %v8962_v29 }
 0x717   : > { %v4634_v52 = vpack.c.bf16 %v4614_v30, %v4613_v5 }
 0x71a   : > { %v4571_v23 = vpop.f32.mrf.mxu1 }
 0x71b   : > { %v4572_v47 = vadd.f32 %v4571_v23, %v4483_v25 }
 0x71d   : > { %v4499_v43 = vpop.f32.mrf.mxu3  ;;  %v4615_v40 = vmax.f32 %v4572_v47, 0.0 }
 0x71e   : > { %v4500_v45 = vadd.f32 %v4499_v43, %v9003_v49 }
 0x722   : > { %v4573_v28 = vpop.f32.mrf.mxu1 }
 0x723   : > { %v4574_v7 = vadd.f32 %v4573_v28, %v4485_v61 }
 0x725   : > { %v4616_v27 = vmax.f32 %v4574_v7, 0.0 }
 0x727   : > { %v4635_v13 = vpack.c.bf16 %v4616_v27, %v4615_v40 }
 0x72a   : > { %v4576_v63 = vpop.f32.mrf.mxu1 }
 0x72b   : > { %v4577_v15 = vadd.f32 %v4576_v63, %v4488_v9 }
 0x72d   : > { %v4617_v8 = vmax.f32 %v4577_v15, 0.0 }
 0x732   : > { %v4578_v33 = vpop.f32.mrf.mxu1 }
 0x733   : > { %v4579_v2 = vadd.f32 %v4578_v33, %v4490_v59 }
 0x735   : > { %v4618_v55 = vmax.f32 %v4579_v2, 0.0 }
 0x737   : > { %v4636_v1 = vpack.c.bf16 %v4618_v55, %v4617_v8 }
 0x73a   : > { %v4581_v14 = vpop.f32.mrf.mxu1 }
 0x73b   : > { %v4582_v32 = vadd.f32 %v4581_v14, %v4493_v6 }
 0x73d   : > { %v4619_v49 = vmax.f32 %v4582_v32, 0.0 }
 0x742   : > { %v4583_v36 = vpop.f32.mrf.mxu1 }
 0x743   : > { %v4584_v35 = vadd.f32 %v4583_v36, %v4495_v39 }
 0x745   : > { %v4620_v21 = vmax.f32 %v4584_v35, 0.0 }
 0x747   : > { %v4637_v16 = vpack.c.bf16 %v4620_v21, %v4619_v49 }
 0x74a   : > { %v4586_v26 = vpop.f32.mrf.mxu1 }
 0x74b   : > { %v4587_v12 = vadd.f32 %v4586_v26, %v4498_v58 }
 0x74d   : > { %v4621_v24 = vmax.f32 %v4587_v12, 0.0 }
 0x752   : > { %v4588_v57 = vpop.f32.mrf.mxu1 }
 0x753   : > { %v4589_v0 = vadd.f32 %v4588_v57, %v4500_v45 }
 0x755   : > { %v4622_v11 = vmax.f32 %v4589_v0, 0.0 }
 0x757   : > { %v4638_v29 = vpack.c.bf16 %v4622_v11, %v4621_v24 }
 0x759   : > { %4666 = vmatpush.bf16.msra.mxu3 %v4638_v29 }
 0x75d   : > { %4667 = vmatpush.bf16.msra.mxu3 %v4637_v16 }
 0x761   : > { %4668 = vmatpush.bf16.msra.mxu3 %v4636_v1 }
 0x765   : > { %4669 = vmatpush.bf16.msra.mxu3 %v4635_v13 }
 0x769   : > { %4670 = vmatpush.bf16.msra.mxu3 %v4634_v52 }
 0x76d   : > { %4671 = vmatpush.bf16.msra.mxu3 %v4633_v41 }
 0x771   : > { %4672 = vmatpush.bf16.msra.mxu3 %v9172_v54 }
 0x775   : > { %4673 = vmatpush.bf16.msra.mxu3 %v9159_v42 }
 0x778   : > { %4674 = vmatmul.bf16.vlgmr.msra.gmra.mxu3 %v4650_v62 }
 0x77b   : > { %v4662_v56 = vpop.f32.mrf.mxu2 }
 0x77c   : > { %v4663_v44 = vadd.f32 %v4662_v56, %v4644_v22 }
 0x783   : > { %v4664_v18 = vpop.f32.mrf.mxu2 }
 0x7fb   : > { %v4675_v4 = vpop.f32.mrf.mxu3 }
 0x7fc   : > { %v4676_v37 = vadd.f32 %v4675_v4, %v4663_v44 }
 0x7fe   : > { %4679 = vst [vmem:[%s361_s20] sm:$0xff] %v4676_v37 }
 0x803   : > { %v4677_v41 = vpop.f32.mrf.mxu3 }
 0x804 PF: > { %s19_s11 = sadd.s32 1, %s6022_s11   ;;  %s9440_s30 = smov %s6018_s10 }
 0x805   : > { %p16_p5 = scmp.ge.s32.totalorder %s19_s11, 4   ;;  %s9441_s10 = smov %s9443_s12 }
 0x807   :  { %18 = sbr.rel (!%p16_p5) target bundleno = 2 (0x2), region = 86 }

</bundles_post_ra>
